<compile_context>
chip_gen: v6e
topology: v6e:2x2x1
jax: 0.10.0
libtpu: 0.0.40
codegen_flags: <defaults>
</compile_context>

<pallas_src>
import math

import jax
import jax.numpy as jnp
from jax.experimental import pallas as pl
from jax.experimental.pallas import tpu as pltpu

# ---- small synthetic "KoBERT-like" config (real model: H=768, NH=12, L=12) ----
B = 2            # batch
S = 8            # sequence length
H = 256          # hidden size (multiple of 128 -> lane dense)
NH = 2           # attention heads
HD = H // NH     # head dim = 128 -> every head slice is 128-lane aligned
I = 512          # FFN intermediate size
L = 2            # encoder layers
V = 100          # vocab size
MAXP = 16        # max position embeddings
NCLASS = 5       # classifier classes
NPAD = 128       # lane-dense padded classifier width (sliced back to NCLASS)
EPS = 1e-12      # BERT layernorm eps


# --------------------------- in-kernel helpers -------------------------------

def _layernorm(x, g, b):
    mean = jnp.mean(x, axis=-1, keepdims=True)
    var = jnp.mean(jnp.square(x - mean), axis=-1, keepdims=True)
    return (x - mean) * jax.lax.rsqrt(var + EPS) * g + b


def _gelu(x):
    # TODO(synk): HF/KoBERT BertIntermediate uses exact (erf) GELU; tanh approx here.
    c = math.sqrt(2.0 / math.pi)
    return 0.5 * x * (1.0 + jnp.tanh(c * (x + 0.044715 * x * x * x)))


# ------------------------------ fused kernel ---------------------------------

def fused_bert_kernel(mask_ref, emb_ref, emb_g_ref, emb_b_ref,
                      qkv_w_ref, qkv_b_ref, ao_w_ref, ao_b_ref,
                      ln1_g_ref, ln1_b_ref, ff1_w_ref, ff1_b_ref,
                      ff2_w_ref, ff2_b_ref, ln2_g_ref, ln2_b_ref,
                      pool_w_ref, pool_b_ref, fc_w_ref, fc_b_ref,
                      logits_ref, h_scratch, ctx_scratch):
    l = pl.program_id(0)

    # Layer 0: embedding layernorm straight into the resident hidden state.
    @pl.when(l == 0)
    def _():
        h_scratch[...] = _layernorm(emb_ref[...], emb_g_ref[...], emb_b_ref[...])

    h = h_scratch[...]                                        # (B*S, H) f32

    # Fused QKV projection: one (B*S, H) @ (H, 3H) MXU matmul.
    qkv = jnp.dot(h.astype(jnp.bfloat16), qkv_w_ref[0],
                  preferred_element_type=jnp.float32) + qkv_b_ref[0]

    # Scaled-dot-product attention; heads via 128-lane-aligned slices (HD=128).
    scale = 1.0 / math.sqrt(HD)
    for b in range(B):                                        # static: B*NH = 4 heads
        bias_b = (mask_ref[b] - 1.0) * 1e9                    # (1, S) additive bias, f32
        r0 = b * S
        for hh in range(NH):
            q = qkv[r0:r0 + S, hh * HD:(hh + 1) * HD]
            k = qkv[r0:r0 + S, H + hh * HD:H + (hh + 1) * HD]
            v = qkv[r0:r0 + S, 2 * H + hh * HD:2 * H + (hh + 1) * HD]
            s = jax.lax.dot_general(q.astype(jnp.bfloat16), k.astype(jnp.bfloat16),
                                    (((1,), (1,)), ((), ())),
                                    preferred_element_type=jnp.float32)
            s = s * scale + bias_b                            # score/softmax path in f32
            s = s - jnp.max(s, axis=-1, keepdims=True)
            p = jnp.exp(s)
            p = p * pl.reciprocal(jnp.sum(p, axis=-1, keepdims=True), approx=True)
            ctx_scratch[r0:r0 + S, hh * HD:(hh + 1) * HD] = jnp.dot(
                p.astype(jnp.bfloat16), v.astype(jnp.bfloat16),
                preferred_element_type=jnp.float32)

    # Attention output projection + residual + LN1 (fused epilogue).
    attn_out = jnp.dot(ctx_scratch[...].astype(jnp.bfloat16), ao_w_ref[0],
                       preferred_element_type=jnp.float32) + ao_b_ref[0]
    h1 = _layernorm(h + attn_out, ln1_g_ref[0], ln1_b_ref[0])

    # FFN (GELU) + residual + LN2 (fused epilogue).
    ff = jnp.dot(h1.astype(jnp.bfloat16), ff1_w_ref[0],
                 preferred_element_type=jnp.float32) + ff1_b_ref[0]
    ff = _gelu(ff)
    ff = jnp.dot(ff.astype(jnp.bfloat16), ff2_w_ref[0],
                 preferred_element_type=jnp.float32) + ff2_b_ref[0]
    h2 = _layernorm(h1 + ff, ln2_g_ref[0], ln2_b_ref[0])

    h_scratch[...] = h2                                       # carry to next layer

    # Last layer: fused pooler(tanh) + dropout(eval=identity) + classifier head.
    @pl.when(l == pl.num_programs(0) - 1)
    def _():
        for b in range(B):
            cls_b = h2[b * S:b * S + 1, :]                    # CLS token, (1, H)
            pooled = jnp.tanh(
                jnp.dot(cls_b.astype(jnp.bfloat16), pool_w_ref[...],
                        preferred_element_type=jnp.float32) + pool_b_ref[...])
            # TODO(synk): nn.Dropout(p=0.3) is identity in eval mode; training-mode
            # stochastic dropout (pltpu.prng_*) not implemented.
            logits_ref[b:b + 1, :] = jnp.dot(
                pooled.astype(jnp.bfloat16), fc_w_ref[...],
                preferred_element_type=jnp.float32) + fc_b_ref[...]


# --------------------------- forward (JAX wrapper) ----------------------------

def pet_product_classifier_forward(params, input_ids, attention_mask):
    # --- BERT embeddings: gather + add is plain-JAX glue, LN is fused in-kernel ---
    pos_ids = jnp.arange(S)
    emb = (params["word_emb"][input_ids]
           + params["pos_emb"][pos_ids][None, :, :]
           + params["type_emb"][0][None, None, :])            # token_type_ids = 0
    emb = emb.reshape(B * S, H).astype(jnp.float32)

    mask = attention_mask.astype(jnp.float32).reshape(B, 1, S)

    # Lane-dense (H, 128) classifier weights; real width NCLASS sliced afterwards.
    fc_w_pad = jnp.zeros((H, NPAD), jnp.float32).at[:, :NCLASS].set(
        params["fc_w"]).astype(jnp.bfloat16)
    fc_b_pad = jnp.zeros((1, NPAD), jnp.float32).at[0, :NCLASS].set(params["fc_b"])

    logits_pad = pl.pallas_call(
        fused_bert_kernel,
        out_shape=jax.ShapeDtypeStruct((B, NPAD), jnp.float32),
        grid=(L,),
        in_specs=[
            pl.BlockSpec((B, 1, S), lambda l: (0, 0, 0)),       # attention mask
            pl.BlockSpec((B * S, H), lambda l: (0, 0)),         # embeddings
            pl.BlockSpec((1, H), lambda l: (0, 0)),             # emb LN gamma
            pl.BlockSpec((1, H), lambda l: (0, 0)),             # emb LN beta
            pl.BlockSpec((1, H, 3 * H), lambda l: (l, 0, 0)),   # fused QKV weight
            pl.BlockSpec((1, 1, 3 * H), lambda l: (l, 0, 0)),   # fused QKV bias
            pl.BlockSpec((1, H, H), lambda l: (l, 0, 0)),       # attn out weight
            pl.BlockSpec((1, 1, H), lambda l: (l, 0, 0)),       # attn out bias
            pl.BlockSpec((1, 1, H), lambda l: (l, 0, 0)),       # LN1 gamma
            pl.BlockSpec((1, 1, H), lambda l: (l, 0, 0)),       # LN1 beta
            pl.BlockSpec((1, H, I), lambda l: (l, 0, 0)),       # FFN up weight
            pl.BlockSpec((1, 1, I), lambda l: (l, 0, 0)),       # FFN up bias
            pl.BlockSpec((1, I, H), lambda l: (l, 0, 0)),       # FFN down weight
            pl.BlockSpec((1, 1, H), lambda l: (l, 0, 0)),       # FFN down bias
            pl.BlockSpec((1, 1, H), lambda l: (l, 0, 0)),       # LN2 gamma
            pl.BlockSpec((1, 1, H), lambda l: (l, 0, 0)),       # LN2 beta
            pl.BlockSpec((H, H), lambda l: (0, 0)),             # pooler weight
            pl.BlockSpec((1, H), lambda l: (0, 0)),             # pooler bias
            pl.BlockSpec((H, NPAD), lambda l: (0, 0)),          # fc weight (padded)
            pl.BlockSpec((1, NPAD), lambda l: (0, 0)),          # fc bias (padded)
        ],
        out_specs=pl.BlockSpec((B, NPAD), lambda l: (0, 0)),
        scratch_shapes=[pltpu.VMEM((B * S, H), jnp.float32),    # resident hidden state
                        pltpu.VMEM((B * S, H), jnp.float32)],   # attention context
        compiler_params=pltpu.CompilerParams(
            dimension_semantics=("arbitrary",)),                # layers are sequential
    )(mask, emb, params["emb_ln_g"], params["emb_ln_b"],
      params["qkv_w"], params["qkv_b"], params["ao_w"], params["ao_b"],
      params["ln1_g"], params["ln1_b"], params["ff1_w"], params["ff1_b"],
      params["ff2_w"], params["ff2_b"], params["ln2_g"], params["ln2_b"],
      params["pool_w"], params["pool_b"], fc_w_pad, fc_b_pad)

    return logits_pad[:, :NCLASS]


# --------------------------- deterministic init ------------------------------

def init_params(key):
    ks = jax.random.split(key, 9)

    def dense(kk, *shape):
        return 0.02 * jax.random.normal(kk, shape, jnp.float32)

    return {
        "word_emb": dense(ks[0], V, H),
        "pos_emb": dense(ks[1], MAXP, H),
        "type_emb": dense(ks[2], 2, H),
        "emb_ln_g": jnp.ones((1, H), jnp.float32),
        "emb_ln_b": jnp.zeros((1, H), jnp.float32),
        # per-layer weights stacked on a leading L axis; matmul weights in bf16
        "qkv_w": dense(ks[3], L, H, 3 * H).astype(jnp.bfloat16),   # [Wq | Wk | Wv]
        "qkv_b": jnp.zeros((L, 1, 3 * H), jnp.float32),
        "ao_w": dense(ks[4], L, H, H).astype(jnp.bfloat16),
        "ao_b": jnp.zeros((L, 1, H), jnp.float32),
        "ln1_g": jnp.ones((L, 1, H), jnp.float32),
        "ln1_b": jnp.zeros((L, 1, H), jnp.float32),
        "ff1_w": dense(ks[5], L, H, I).astype(jnp.bfloat16),
        "ff1_b": jnp.zeros((L, 1, I), jnp.float32),
        "ff2_w": dense(ks[6], L, I, H).astype(jnp.bfloat16),
        "ff2_b": jnp.zeros((L, 1, H), jnp.float32),
        "ln2_g": jnp.ones((L, 1, H), jnp.float32),
        "ln2_b": jnp.zeros((L, 1, H), jnp.float32),
        "pool_w": dense(ks[7], H, H).astype(jnp.bfloat16),
        "pool_b": jnp.zeros((1, H), jnp.float32),
        "fc_w": dense(ks[8], H, NCLASS),
        "fc_b": jnp.zeros((NCLASS,), jnp.float32),
    }


# --------------------------------- main --------------------------------------

if __name__ == "__main__":
    key = jax.random.PRNGKey(0)
    pkey, ikey = jax.random.split(key)

    params = init_params(pkey)
    input_ids = jax.random.randint(ikey, (B, S), 0, V, dtype=jnp.int32)
    attention_mask = jnp.array(
        [[1, 1, 1, 1, 1, 1, 1, 1],
         [1, 1, 1, 1, 1, 0, 0, 0]], dtype=jnp.int32)

    fwd = jax.jit(pet_product_classifier_forward)
    logits = fwd(params, input_ids, attention_mask)
    jax.block_until_ready(logits)

    assert logits.shape == (B, NCLASS), logits.shape
    assert bool(jnp.all(jnp.isfinite(logits)))
    print("KERNEL_OK")
</pallas_src>

<mosaic_0001>
module attributes {stable_mosaic.version = 11 : i64} {
  func.func @fused_bert_kernel(%arg0: i32, %arg1: memref<2x1x8xf32, #tpu.memory_space<vmem>>, %arg2: memref<16x256xf32, #tpu.memory_space<vmem>>, %arg3: memref<1x256xf32, #tpu.memory_space<vmem>>, %arg4: memref<1x256xf32, #tpu.memory_space<vmem>>, %arg5: memref<1x256x768xbf16, #tpu.memory_space<vmem>>, %arg6: memref<1x1x768xf32, #tpu.memory_space<vmem>>, %arg7: memref<1x256x256xbf16, #tpu.memory_space<vmem>>, %arg8: memref<1x1x256xf32, #tpu.memory_space<vmem>>, %arg9: memref<1x1x256xf32, #tpu.memory_space<vmem>>, %arg10: memref<1x1x256xf32, #tpu.memory_space<vmem>>, %arg11: memref<1x256x512xbf16, #tpu.memory_space<vmem>>, %arg12: memref<1x1x512xf32, #tpu.memory_space<vmem>>, %arg13: memref<1x512x256xbf16, #tpu.memory_space<vmem>>, %arg14: memref<1x1x256xf32, #tpu.memory_space<vmem>>, %arg15: memref<1x1x256xf32, #tpu.memory_space<vmem>>, %arg16: memref<1x1x256xf32, #tpu.memory_space<vmem>>, %arg17: memref<256x256xbf16, #tpu.memory_space<vmem>>, %arg18: memref<1x256xf32, #tpu.memory_space<vmem>>, %arg19: memref<256x128xbf16, #tpu.memory_space<vmem>>, %arg20: memref<1x128xf32, #tpu.memory_space<vmem>>, %arg21: memref<2x128xf32, #tpu.memory_space<vmem>>, %arg22: memref<16x256xf32, #tpu.memory_space<vmem>>, %arg23: memref<16x256xf32, #tpu.memory_space<vmem>>) attributes {dimension_semantics = [#tpu.dimension_semantics<arbitrary>], iteration_bounds = array<i64: 2>, scalar_prefetch = 0 : i64, scratch_operands = 2 : i64, tpu.core_type = #tpu.core_type<tc>, window_params = [{pipeline_mode = #tpu.pipeline_mode<synchronous>, transform_indices = @transform_0, window_bounds = array<i64: 2, 1, 8>}, {pipeline_mode = #tpu.pipeline_mode<synchronous>, transform_indices = @transform_1, window_bounds = array<i64: 16, 256>}, {pipeline_mode = #tpu.pipeline_mode<synchronous>, transform_indices = @transform_2, window_bounds = array<i64: 1, 256>}, {pipeline_mode = #tpu.pipeline_mode<synchronous>, transform_indices = @transform_3, window_bounds = array<i64: 1, 256>}, {transform_indices = @transform_4, window_bounds = array<i64: 1, 256, 768>}, {transform_indices = @transform_5, window_bounds = array<i64: 1, 1, 768>}, {transform_indices = @transform_6, window_bounds = array<i64: 1, 256, 256>}, {transform_indices = @transform_7, window_bounds = array<i64: 1, 1, 256>}, {transform_indices = @transform_8, window_bounds = array<i64: 1, 1, 256>}, {transform_indices = @transform_9, window_bounds = array<i64: 1, 1, 256>}, {transform_indices = @transform_10, window_bounds = array<i64: 1, 256, 512>}, {transform_indices = @transform_11, window_bounds = array<i64: 1, 1, 512>}, {transform_indices = @transform_12, window_bounds = array<i64: 1, 512, 256>}, {transform_indices = @transform_13, window_bounds = array<i64: 1, 1, 256>}, {transform_indices = @transform_14, window_bounds = array<i64: 1, 1, 256>}, {transform_indices = @transform_15, window_bounds = array<i64: 1, 1, 256>}, {pipeline_mode = #tpu.pipeline_mode<synchronous>, transform_indices = @transform_16, window_bounds = array<i64: 256, 256>}, {pipeline_mode = #tpu.pipeline_mode<synchronous>, transform_indices = @transform_17, window_bounds = array<i64: 1, 256>}, {pipeline_mode = #tpu.pipeline_mode<synchronous>, transform_indices = @transform_18, window_bounds = array<i64: 256, 128>}, {pipeline_mode = #tpu.pipeline_mode<synchronous>, transform_indices = @transform_19, window_bounds = array<i64: 1, 128>}, {pipeline_mode = #tpu.pipeline_mode<synchronous>, transform_indices = @transform_20, window_bounds = array<i64: 2, 128>}]} {
    %c0_i32 = arith.constant 0 : i32
    %0 = arith.cmpi eq, %arg0, %c0_i32 : i32
    %1 = arith.extui %0 : i1 to i32
    %c0_i32_0 = arith.constant 0 : i32
    %2 = arith.cmpi ne, %1, %c0_i32_0 : i32
    scf.if %2 {
      %c0_95 = arith.constant 0 : index
      %c0_96 = arith.constant 0 : index
      %216 = vector.load %arg2[%c0_95, %c0_96] : memref<16x256xf32, #tpu.memory_space<vmem>>, vector<16x256xf32>
      %c0_97 = arith.constant 0 : index
      %c0_98 = arith.constant 0 : index
      %217 = vector.load %arg3[%c0_97, %c0_98] : memref<1x256xf32, #tpu.memory_space<vmem>>, vector<1x256xf32>
      %c0_99 = arith.constant 0 : index
      %c0_100 = arith.constant 0 : index
      %218 = vector.load %arg4[%c0_99, %c0_100] : memref<1x256xf32, #tpu.memory_space<vmem>>, vector<1x256xf32>
      %cst_101 = arith.constant dense<0.000000e+00> : vector<16xf32>
      %219 = vector.multi_reduction <add>, %216, %cst_101 [1] : vector<16x256xf32> to vector<16xf32>
      %220 = vector.shape_cast %219 : vector<16xf32> to vector<16x1xf32>
      %cst_102 = arith.constant 2.560000e+02 : f32
      %221 = vector.broadcast %cst_102 : f32 to vector<16x1xf32>
      %222 = arith.divf %220, %221 : vector<16x1xf32>
      %223 = vector.broadcast %222 : vector<16x1xf32> to vector<16x256xf32>
      %224 = arith.subf %216, %223 : vector<16x256xf32>
      %225 = arith.mulf %224, %224 : vector<16x256xf32>
      %cst_103 = arith.constant dense<0.000000e+00> : vector<16xf32>
      %226 = vector.multi_reduction <add>, %225, %cst_103 [1] : vector<16x256xf32> to vector<16xf32>
      %227 = vector.shape_cast %226 : vector<16xf32> to vector<16x1xf32>
      %cst_104 = arith.constant 2.560000e+02 : f32
      %228 = vector.broadcast %cst_104 : f32 to vector<16x1xf32>
      %229 = arith.divf %227, %228 : vector<16x1xf32>
      %230 = vector.broadcast %222 : vector<16x1xf32> to vector<16x256xf32>
      %231 = arith.subf %216, %230 : vector<16x256xf32>
      %cst_105 = arith.constant 9.99999996E-13 : f32
      %232 = vector.broadcast %cst_105 : f32 to vector<16x1xf32>
      %233 = arith.addf %229, %232 : vector<16x1xf32>
      %234 = math.rsqrt %233 : vector<16x1xf32>
      %235 = vector.broadcast %234 : vector<16x1xf32> to vector<16x256xf32>
      %236 = arith.mulf %231, %235 : vector<16x256xf32>
      %237 = vector.broadcast %217 : vector<1x256xf32> to vector<16x256xf32>
      %238 = arith.mulf %236, %237 : vector<16x256xf32>
      %239 = vector.broadcast %218 : vector<1x256xf32> to vector<16x256xf32>
      %240 = arith.addf %238, %239 : vector<16x256xf32>
      %c0_106 = arith.constant 0 : index
      %c0_107 = arith.constant 0 : index
      %241 = vector.load %arg22[%c0_106, %c0_107] : memref<16x256xf32, #tpu.memory_space<vmem>>, vector<16x256xf32>
      tpu.vector_store %arg22[%c0_106, %c0_107], %240 {strides = array<i32>} : memref<16x256xf32, #tpu.memory_space<vmem>>, vector<16x256xf32>,
    } else {
    }
    %c0 = arith.constant 0 : index
    %c0_1 = arith.constant 0 : index
    %3 = vector.load %arg22[%c0, %c0_1] : memref<16x256xf32, #tpu.memory_space<vmem>>, vector<16x256xf32>
    %4 = arith.truncf %3 : vector<16x256xf32> to vector<16x256xbf16>
    %c0_2 = arith.constant 0 : index
    %c0_3 = arith.constant 0 : index
    %c0_4 = arith.constant 0 : index
    %5 = vector.load %arg5[%c0_2, %c0_3, %c0_4] : memref<1x256x768xbf16, #tpu.memory_space<vmem>>, vector<1x256x768xbf16>
    %6 = vector.shape_cast %5 : vector<1x256x768xbf16> to vector<256x768xbf16>
    %cst = arith.constant dense<0.000000e+00> : vector<16x768xf32>
    %7 = tpu.matmul %4, %6, %cst {dimension_numbers = #tpu.dot_dimension_numbers<[1], [0], [0], [1], [0, 0, 1, 1], [], []>} : vector<16x256xbf16>, vector<256x768xbf16>, vector<16x768xf32> -> vector<16x768xf32>
    %c0_5 = arith.constant 0 : index
    %c0_6 = arith.constant 0 : index
    %c0_7 = arith.constant 0 : index
    %8 = vector.load %arg6[%c0_5, %c0_6, %c0_7] : memref<1x1x768xf32, #tpu.memory_space<vmem>>, vector<1x1x768xf32>
    %9 = vector.shape_cast %8 : vector<1x1x768xf32> to vector<1x768xf32>
    %10 = vector.broadcast %9 : vector<1x768xf32> to vector<16x768xf32>
    %11 = arith.addf %7, %10 : vector<16x768xf32>
    %c0_8 = arith.constant 0 : index
    %c0_9 = arith.constant 0 : index
    %c0_10 = arith.constant 0 : index
    %12 = vector.load %arg1[%c0_8, %c0_9, %c0_10] : memref<2x1x8xf32, #tpu.memory_space<vmem>>, vector<1x1x8xf32>
    %13 = vector.shape_cast %12 : vector<1x1x8xf32> to vector<1x8xf32>
    %cst_11 = arith.constant 1.000000e+00 : f32
    %14 = vector.broadcast %cst_11 : f32 to vector<1x8xf32>
    %15 = arith.subf %13, %14 : vector<1x8xf32>
    %cst_12 = arith.constant 1.000000e+09 : f32
    %16 = vector.broadcast %cst_12 : f32 to vector<1x8xf32>
    %17 = arith.mulf %15, %16 : vector<1x8xf32>
    %18 = vector.extract_strided_slice %11 {offsets = [0, 0], sizes = [8, 128], strides = [1, 1]} : vector<16x768xf32> to vector<8x128xf32>
    %19 = vector.extract_strided_slice %11 {offsets = [0, 256], sizes = [8, 128], strides = [1, 1]} : vector<16x768xf32> to vector<8x128xf32>
    %20 = vector.extract_strided_slice %11 {offsets = [0, 512], sizes = [8, 128], strides = [1, 1]} : vector<16x768xf32> to vector<8x128xf32>
    %21 = arith.truncf %18 : vector<8x128xf32> to vector<8x128xbf16>
    %22 = arith.truncf %19 : vector<8x128xf32> to vector<8x128xbf16>
    %cst_13 = arith.constant dense<0.000000e+00> : vector<8x8xf32>
    %23 = tpu.matmul %21, %22, %cst_13 {dimension_numbers = #tpu.dot_dimension_numbers<[1], [1], [0], [0], [0, 0, 1, 0], [], []>} : vector<8x128xbf16>, vector<8x128xbf16>, vector<8x8xf32> -> vector<8x8xf32>
    %cst_14 = arith.constant 0.0883883461 : f32
    %24 = vector.broadcast %cst_14 : f32 to vector<8x8xf32>
    %25 = arith.mulf %23, %24 : vector<8x8xf32>
    %26 = vector.broadcast %17 : vector<1x8xf32> to vector<8x8xf32>
    %27 = arith.addf %25, %26 : vector<8x8xf32>
    %cst_15 = arith.constant dense<0xFF800000> : vector<8xf32>
    %28 = vector.multi_reduction <maximumf>, %27, %cst_15 [1] : vector<8x8xf32> to vector<8xf32>
    %29 = vector.shape_cast %28 : vector<8xf32> to vector<8x1xf32>
    %30 = vector.broadcast %29 : vector<8x1xf32> to vector<8x8xf32>
    %31 = arith.subf %27, %30 : vector<8x8xf32>
    %32 = math.exp %31 : vector<8x8xf32>
    %cst_16 = arith.constant dense<0.000000e+00> : vector<8xf32>
    %33 = vector.multi_reduction <add>, %32, %cst_16 [1] : vector<8x8xf32> to vector<8xf32>
    %34 = vector.shape_cast %33 : vector<8xf32> to vector<8x1xf32>
    %35 = tpu.reciprocal %34 {approx = true} : vector<8x1xf32> -> vector<8x1xf32>
    %36 = vector.broadcast %35 : vector<8x1xf32> to vector<8x8xf32>
    %37 = arith.mulf %32, %36 : vector<8x8xf32>
    %38 = arith.truncf %37 : vector<8x8xf32> to vector<8x8xbf16>
    %39 = arith.truncf %20 : vector<8x128xf32> to vector<8x128xbf16>
    %cst_17 = arith.constant dense<0.000000e+00> : vector<8x128xf32>
    %40 = tpu.matmul %38, %39, %cst_17 {dimension_numbers = #tpu.dot_dimension_numbers<[1], [0], [0], [1], [0, 0, 1, 1], [], []>} : vector<8x8xbf16>, vector<8x128xbf16>, vector<8x128xf32> -> vector<8x128xf32>
    %c0_18 = arith.constant 0 : index
    %c0_19 = arith.constant 0 : index
    %41 = vector.load %arg23[%c0_18, %c0_19] : memref<16x256xf32, #tpu.memory_space<vmem>>, vector<8x128xf32>
    tpu.vector_store %arg23[%c0_18, %c0_19], %40 {strides = array<i32>} : memref<16x256xf32, #tpu.memory_space<vmem>>, vector<8x128xf32>,
    %42 = vector.extract_strided_slice %11 {offsets = [0, 128], sizes = [8, 128], strides = [1, 1]} : vector<16x768xf32> to vector<8x128xf32>
    %43 = vector.extract_strided_slice %11 {offsets = [0, 384], sizes = [8, 128], strides = [1, 1]} : vector<16x768xf32> to vector<8x128xf32>
    %44 = vector.extract_strided_slice %11 {offsets = [0, 640], sizes = [8, 128], strides = [1, 1]} : vector<16x768xf32> to vector<8x128xf32>
    %45 = arith.truncf %42 : vector<8x128xf32> to vector<8x128xbf16>
    %46 = arith.truncf %43 : vector<8x128xf32> to vector<8x128xbf16>
    %cst_20 = arith.constant dense<0.000000e+00> : vector<8x8xf32>
    %47 = tpu.matmul %45, %46, %cst_20 {dimension_numbers = #tpu.dot_dimension_numbers<[1], [1], [0], [0], [0, 0, 1, 0], [], []>} : vector<8x128xbf16>, vector<8x128xbf16>, vector<8x8xf32> -> vector<8x8xf32>
    %cst_21 = arith.constant 0.0883883461 : f32
    %48 = vector.broadcast %cst_21 : f32 to vector<8x8xf32>
    %49 = arith.mulf %47, %48 : vector<8x8xf32>
    %50 = vector.broadcast %17 : vector<1x8xf32> to vector<8x8xf32>
    %51 = arith.addf %49, %50 : vector<8x8xf32>
    %cst_22 = arith.constant dense<0xFF800000> : vector<8xf32>
    %52 = vector.multi_reduction <maximumf>, %51, %cst_22 [1] : vector<8x8xf32> to vector<8xf32>
    %53 = vector.shape_cast %52 : vector<8xf32> to vector<8x1xf32>
    %54 = vector.broadcast %53 : vector<8x1xf32> to vector<8x8xf32>
    %55 = arith.subf %51, %54 : vector<8x8xf32>
    %56 = math.exp %55 : vector<8x8xf32>
    %cst_23 = arith.constant dense<0.000000e+00> : vector<8xf32>
    %57 = vector.multi_reduction <add>, %56, %cst_23 [1] : vector<8x8xf32> to vector<8xf32>
    %58 = vector.shape_cast %57 : vector<8xf32> to vector<8x1xf32>
    %59 = tpu.reciprocal %58 {approx = true} : vector<8x1xf32> -> vector<8x1xf32>
    %60 = vector.broadcast %59 : vector<8x1xf32> to vector<8x8xf32>
    %61 = arith.mulf %56, %60 : vector<8x8xf32>
    %62 = arith.truncf %61 : vector<8x8xf32> to vector<8x8xbf16>
    %63 = arith.truncf %44 : vector<8x128xf32> to vector<8x128xbf16>
    %cst_24 = arith.constant dense<0.000000e+00> : vector<8x128xf32>
    %64 = tpu.matmul %62, %63, %cst_24 {dimension_numbers = #tpu.dot_dimension_numbers<[1], [0], [0], [1], [0, 0, 1, 1], [], []>} : vector<8x8xbf16>, vector<8x128xbf16>, vector<8x128xf32> -> vector<8x128xf32>
    %c0_25 = arith.constant 0 : index
    %c128 = arith.constant 128 : index
    %65 = vector.load %arg23[%c0_25, %c128] : memref<16x256xf32, #tpu.memory_space<vmem>>, vector<8x128xf32>
    tpu.vector_store %arg23[%c0_25, %c128], %64 {strides = array<i32>} : memref<16x256xf32, #tpu.memory_space<vmem>>, vector<8x128xf32>,
    %c1 = arith.constant 1 : index
    %c0_26 = arith.constant 0 : index
    %c0_27 = arith.constant 0 : index
    %66 = vector.load %arg1[%c1, %c0_26, %c0_27] : memref<2x1x8xf32, #tpu.memory_space<vmem>>, vector<1x1x8xf32>
    %67 = vector.shape_cast %66 : vector<1x1x8xf32> to vector<1x8xf32>
    %cst_28 = arith.constant 1.000000e+00 : f32
    %68 = vector.broadcast %cst_28 : f32 to vector<1x8xf32>
    %69 = arith.subf %67, %68 : vector<1x8xf32>
    %cst_29 = arith.constant 1.000000e+09 : f32
    %70 = vector.broadcast %cst_29 : f32 to vector<1x8xf32>
    %71 = arith.mulf %69, %70 : vector<1x8xf32>
    %72 = vector.extract_strided_slice %11 {offsets = [8, 0], sizes = [8, 128], strides = [1, 1]} : vector<16x768xf32> to vector<8x128xf32>
    %73 = vector.extract_strided_slice %11 {offsets = [8, 256], sizes = [8, 128], strides = [1, 1]} : vector<16x768xf32> to vector<8x128xf32>
    %74 = vector.extract_strided_slice %11 {offsets = [8, 512], sizes = [8, 128], strides = [1, 1]} : vector<16x768xf32> to vector<8x128xf32>
    %75 = arith.truncf %72 : vector<8x128xf32> to vector<8x128xbf16>
    %76 = arith.truncf %73 : vector<8x128xf32> to vector<8x128xbf16>
    %cst_30 = arith.constant dense<0.000000e+00> : vector<8x8xf32>
    %77 = tpu.matmul %75, %76, %cst_30 {dimension_numbers = #tpu.dot_dimension_numbers<[1], [1], [0], [0], [0, 0, 1, 0], [], []>} : vector<8x128xbf16>, vector<8x128xbf16>, vector<8x8xf32> -> vector<8x8xf32>
    %cst_31 = arith.constant 0.0883883461 : f32
    %78 = vector.broadcast %cst_31 : f32 to vector<8x8xf32>
    %79 = arith.mulf %77, %78 : vector<8x8xf32>
    %80 = vector.broadcast %71 : vector<1x8xf32> to vector<8x8xf32>
    %81 = arith.addf %79, %80 : vector<8x8xf32>
    %cst_32 = arith.constant dense<0xFF800000> : vector<8xf32>
    %82 = vector.multi_reduction <maximumf>, %81, %cst_32 [1] : vector<8x8xf32> to vector<8xf32>
    %83 = vector.shape_cast %82 : vector<8xf32> to vector<8x1xf32>
    %84 = vector.broadcast %83 : vector<8x1xf32> to vector<8x8xf32>
    %85 = arith.subf %81, %84 : vector<8x8xf32>
    %86 = math.exp %85 : vector<8x8xf32>
    %cst_33 = arith.constant dense<0.000000e+00> : vector<8xf32>
    %87 = vector.multi_reduction <add>, %86, %cst_33 [1] : vector<8x8xf32> to vector<8xf32>
    %88 = vector.shape_cast %87 : vector<8xf32> to vector<8x1xf32>
    %89 = tpu.reciprocal %88 {approx = true} : vector<8x1xf32> -> vector<8x1xf32>
    %90 = vector.broadcast %89 : vector<8x1xf32> to vector<8x8xf32>
    %91 = arith.mulf %86, %90 : vector<8x8xf32>
    %92 = arith.truncf %91 : vector<8x8xf32> to vector<8x8xbf16>
    %93 = arith.truncf %74 : vector<8x128xf32> to vector<8x128xbf16>
    %cst_34 = arith.constant dense<0.000000e+00> : vector<8x128xf32>
    %94 = tpu.matmul %92, %93, %cst_34 {dimension_numbers = #tpu.dot_dimension_numbers<[1], [0], [0], [1], [0, 0, 1, 1], [], []>} : vector<8x8xbf16>, vector<8x128xbf16>, vector<8x128xf32> -> vector<8x128xf32>
    %c8 = arith.constant 8 : index
    %c0_35 = arith.constant 0 : index
    %95 = vector.load %arg23[%c8, %c0_35] : memref<16x256xf32, #tpu.memory_space<vmem>>, vector<8x128xf32>
    tpu.vector_store %arg23[%c8, %c0_35], %94 {strides = array<i32>} : memref<16x256xf32, #tpu.memory_space<vmem>>, vector<8x128xf32>,
    %96 = vector.extract_strided_slice %11 {offsets = [8, 128], sizes = [8, 128], strides = [1, 1]} : vector<16x768xf32> to vector<8x128xf32>
    %97 = vector.extract_strided_slice %11 {offsets = [8, 384], sizes = [8, 128], strides = [1, 1]} : vector<16x768xf32> to vector<8x128xf32>
    %98 = vector.extract_strided_slice %11 {offsets = [8, 640], sizes = [8, 128], strides = [1, 1]} : vector<16x768xf32> to vector<8x128xf32>
    %99 = arith.truncf %96 : vector<8x128xf32> to vector<8x128xbf16>
    %100 = arith.truncf %97 : vector<8x128xf32> to vector<8x128xbf16>
    %cst_36 = arith.constant dense<0.000000e+00> : vector<8x8xf32>
    %101 = tpu.matmul %99, %100, %cst_36 {dimension_numbers = #tpu.dot_dimension_numbers<[1], [1], [0], [0], [0, 0, 1, 0], [], []>} : vector<8x128xbf16>, vector<8x128xbf16>, vector<8x8xf32> -> vector<8x8xf32>
    %cst_37 = arith.constant 0.0883883461 : f32
    %102 = vector.broadcast %cst_37 : f32 to vector<8x8xf32>
    %103 = arith.mulf %101, %102 : vector<8x8xf32>
    %104 = vector.broadcast %71 : vector<1x8xf32> to vector<8x8xf32>
    %105 = arith.addf %103, %104 : vector<8x8xf32>
    %cst_38 = arith.constant dense<0xFF800000> : vector<8xf32>
    %106 = vector.multi_reduction <maximumf>, %105, %cst_38 [1] : vector<8x8xf32> to vector<8xf32>
    %107 = vector.shape_cast %106 : vector<8xf32> to vector<8x1xf32>
    %108 = vector.broadcast %107 : vector<8x1xf32> to vector<8x8xf32>
    %109 = arith.subf %105, %108 : vector<8x8xf32>
    %110 = math.exp %109 : vector<8x8xf32>
    %cst_39 = arith.constant dense<0.000000e+00> : vector<8xf32>
    %111 = vector.multi_reduction <add>, %110, %cst_39 [1] : vector<8x8xf32> to vector<8xf32>
    %112 = vector.shape_cast %111 : vector<8xf32> to vector<8x1xf32>
    %113 = tpu.reciprocal %112 {approx = true} : vector<8x1xf32> -> vector<8x1xf32>
    %114 = vector.broadcast %113 : vector<8x1xf32> to vector<8x8xf32>
    %115 = arith.mulf %110, %114 : vector<8x8xf32>
    %116 = arith.truncf %115 : vector<8x8xf32> to vector<8x8xbf16>
    %117 = arith.truncf %98 : vector<8x128xf32> to vector<8x128xbf16>
    %cst_40 = arith.constant dense<0.000000e+00> : vector<8x128xf32>
    %118 = tpu.matmul %116, %117, %cst_40 {dimension_numbers = #tpu.dot_dimension_numbers<[1], [0], [0], [1], [0, 0, 1, 1], [], []>} : vector<8x8xbf16>, vector<8x128xbf16>, vector<8x128xf32> -> vector<8x128xf32>
    %c8_41 = arith.constant 8 : index
    %c128_42 = arith.constant 128 : index
    %119 = vector.load %arg23[%c8_41, %c128_42] : memref<16x256xf32, #tpu.memory_space<vmem>>, vector<8x128xf32>
    tpu.vector_store %arg23[%c8_41, %c128_42], %118 {strides = array<i32>} : memref<16x256xf32, #tpu.memory_space<vmem>>, vector<8x128xf32>,
    %c0_43 = arith.constant 0 : index
    %c0_44 = arith.constant 0 : index
    %120 = vector.load %arg23[%c0_43, %c0_44] : memref<16x256xf32, #tpu.memory_space<vmem>>, vector<16x256xf32>
    %121 = arith.truncf %120 : vector<16x256xf32> to vector<16x256xbf16>
    %c0_45 = arith.constant 0 : index
    %c0_46 = arith.constant 0 : index
    %c0_47 = arith.constant 0 : index
    %122 = vector.load %arg7[%c0_45, %c0_46, %c0_47] : memref<1x256x256xbf16, #tpu.memory_space<vmem>>, vector<1x256x256xbf16>
    %123 = vector.shape_cast %122 : vector<1x256x256xbf16> to vector<256x256xbf16>
    %cst_48 = arith.constant dense<0.000000e+00> : vector<16x256xf32>
    %124 = tpu.matmul %121, %123, %cst_48 {dimension_numbers = #tpu.dot_dimension_numbers<[1], [0], [0], [1], [0, 0, 1, 1], [], []>} : vector<16x256xbf16>, vector<256x256xbf16>, vector<16x256xf32> -> vector<16x256xf32>
    %c0_49 = arith.constant 0 : index
    %c0_50 = arith.constant 0 : index
    %c0_51 = arith.constant 0 : index
    %125 = vector.load %arg8[%c0_49, %c0_50, %c0_51] : memref<1x1x256xf32, #tpu.memory_space<vmem>>, vector<1x1x256xf32>
    %126 = vector.shape_cast %125 : vector<1x1x256xf32> to vector<1x256xf32>
    %127 = vector.broadcast %126 : vector<1x256xf32> to vector<16x256xf32>
    %128 = arith.addf %124, %127 : vector<16x256xf32>
    %129 = arith.addf %3, %128 : vector<16x256xf32>
    %c0_52 = arith.constant 0 : index
    %c0_53 = arith.constant 0 : index
    %c0_54 = arith.constant 0 : index
    %130 = vector.load %arg9[%c0_52, %c0_53, %c0_54] : memref<1x1x256xf32, #tpu.memory_space<vmem>>, vector<1x1x256xf32>
    %131 = vector.shape_cast %130 : vector<1x1x256xf32> to vector<1x256xf32>
    %c0_55 = arith.constant 0 : index
    %c0_56 = arith.constant 0 : index
    %c0_57 = arith.constant 0 : index
    %132 = vector.load %arg10[%c0_55, %c0_56, %c0_57] : memref<1x1x256xf32, #tpu.memory_space<vmem>>, vector<1x1x256xf32>
    %133 = vector.shape_cast %132 : vector<1x1x256xf32> to vector<1x256xf32>
    %cst_58 = arith.constant dense<0.000000e+00> : vector<16xf32>
    %134 = vector.multi_reduction <add>, %129, %cst_58 [1] : vector<16x256xf32> to vector<16xf32>
    %135 = vector.shape_cast %134 : vector<16xf32> to vector<16x1xf32>
    %cst_59 = arith.constant 2.560000e+02 : f32
    %136 = vector.broadcast %cst_59 : f32 to vector<16x1xf32>
    %137 = arith.divf %135, %136 : vector<16x1xf32>
    %138 = vector.broadcast %137 : vector<16x1xf32> to vector<16x256xf32>
    %139 = arith.subf %129, %138 : vector<16x256xf32>
    %140 = arith.mulf %139, %139 : vector<16x256xf32>
    %cst_60 = arith.constant dense<0.000000e+00> : vector<16xf32>
    %141 = vector.multi_reduction <add>, %140, %cst_60 [1] : vector<16x256xf32> to vector<16xf32>
    %142 = vector.shape_cast %141 : vector<16xf32> to vector<16x1xf32>
    %cst_61 = arith.constant 2.560000e+02 : f32
    %143 = vector.broadcast %cst_61 : f32 to vector<16x1xf32>
    %144 = arith.divf %142, %143 : vector<16x1xf32>
    %145 = vector.broadcast %137 : vector<16x1xf32> to vector<16x256xf32>
    %146 = arith.subf %129, %145 : vector<16x256xf32>
    %cst_62 = arith.constant 9.99999996E-13 : f32
    %147 = vector.broadcast %cst_62 : f32 to vector<16x1xf32>
    %148 = arith.addf %144, %147 : vector<16x1xf32>
    %149 = math.rsqrt %148 : vector<16x1xf32>
    %150 = vector.broadcast %149 : vector<16x1xf32> to vector<16x256xf32>
    %151 = arith.mulf %146, %150 : vector<16x256xf32>
    %152 = vector.broadcast %131 : vector<1x256xf32> to vector<16x256xf32>
    %153 = arith.mulf %151, %152 : vector<16x256xf32>
    %154 = vector.broadcast %133 : vector<1x256xf32> to vector<16x256xf32>
    %155 = arith.addf %153, %154 : vector<16x256xf32>
    %156 = arith.truncf %155 : vector<16x256xf32> to vector<16x256xbf16>
    %c0_63 = arith.constant 0 : index
    %c0_64 = arith.constant 0 : index
    %c0_65 = arith.constant 0 : index
    %157 = vector.load %arg11[%c0_63, %c0_64, %c0_65] : memref<1x256x512xbf16, #tpu.memory_space<vmem>>, vector<1x256x512xbf16>
    %158 = vector.shape_cast %157 : vector<1x256x512xbf16> to vector<256x512xbf16>
    %cst_66 = arith.constant dense<0.000000e+00> : vector<16x512xf32>
    %159 = tpu.matmul %156, %158, %cst_66 {dimension_numbers = #tpu.dot_dimension_numbers<[1], [0], [0], [1], [0, 0, 1, 1], [], []>} : vector<16x256xbf16>, vector<256x512xbf16>, vector<16x512xf32> -> vector<16x512xf32>
    %c0_67 = arith.constant 0 : index
    %c0_68 = arith.constant 0 : index
    %c0_69 = arith.constant 0 : index
    %160 = vector.load %arg12[%c0_67, %c0_68, %c0_69] : memref<1x1x512xf32, #tpu.memory_space<vmem>>, vector<1x1x512xf32>
    %161 = vector.shape_cast %160 : vector<1x1x512xf32> to vector<1x512xf32>
    %162 = vector.broadcast %161 : vector<1x512xf32> to vector<16x512xf32>
    %163 = arith.addf %159, %162 : vector<16x512xf32>
    %cst_70 = arith.constant 5.000000e-01 : f32
    %164 = vector.broadcast %cst_70 : f32 to vector<16x512xf32>
    %165 = arith.mulf %164, %163 : vector<16x512xf32>
    %cst_71 = arith.constant 4.471500e-02 : f32
    %166 = vector.broadcast %cst_71 : f32 to vector<16x512xf32>
    %167 = arith.mulf %166, %163 : vector<16x512xf32>
    %168 = arith.mulf %167, %163 : vector<16x512xf32>
    %169 = arith.mulf %168, %163 : vector<16x512xf32>
    %170 = arith.addf %163, %169 : vector<16x512xf32>
    %cst_72 = arith.constant 0.797884583 : f32
    %171 = vector.broadcast %cst_72 : f32 to vector<16x512xf32>
    %172 = arith.mulf %171, %170 : vector<16x512xf32>
    %173 = math.tanh %172 : vector<16x512xf32>
    %cst_73 = arith.constant 1.000000e+00 : f32
    %174 = vector.broadcast %cst_73 : f32 to vector<16x512xf32>
    %175 = arith.addf %174, %173 : vector<16x512xf32>
    %176 = arith.mulf %165, %175 : vector<16x512xf32>
    %177 = arith.truncf %176 : vector<16x512xf32> to vector<16x512xbf16>
    %c0_74 = arith.constant 0 : index
    %c0_75 = arith.constant 0 : index
    %c0_76 = arith.constant 0 : index
    %178 = vector.load %arg13[%c0_74, %c0_75, %c0_76] : memref<1x512x256xbf16, #tpu.memory_space<vmem>>, vector<1x512x256xbf16>
    %179 = vector.shape_cast %178 : vector<1x512x256xbf16> to vector<512x256xbf16>
    %cst_77 = arith.constant dense<0.000000e+00> : vector<16x256xf32>
    %180 = tpu.matmul %177, %179, %cst_77 {dimension_numbers = #tpu.dot_dimension_numbers<[1], [0], [0], [1], [0, 0, 1, 1], [], []>} : vector<16x512xbf16>, vector<512x256xbf16>, vector<16x256xf32> -> vector<16x256xf32>
    %c0_78 = arith.constant 0 : index
    %c0_79 = arith.constant 0 : index
    %c0_80 = arith.constant 0 : index
    %181 = vector.load %arg14[%c0_78, %c0_79, %c0_80] : memref<1x1x256xf32, #tpu.memory_space<vmem>>, vector<1x1x256xf32>
    %182 = vector.shape_cast %181 : vector<1x1x256xf32> to vector<1x256xf32>
    %183 = vector.broadcast %182 : vector<1x256xf32> to vector<16x256xf32>
    %184 = arith.addf %180, %183 : vector<16x256xf32>
    %185 = arith.addf %155, %184 : vector<16x256xf32>
    %c0_81 = arith.constant 0 : index
    %c0_82 = arith.constant 0 : index
    %c0_83 = arith.constant 0 : index
    %186 = vector.load %arg15[%c0_81, %c0_82, %c0_83] : memref<1x1x256xf32, #tpu.memory_space<vmem>>, vector<1x1x256xf32>
    %187 = vector.shape_cast %186 : vector<1x1x256xf32> to vector<1x256xf32>
    %c0_84 = arith.constant 0 : index
    %c0_85 = arith.constant 0 : index
    %c0_86 = arith.constant 0 : index
    %188 = vector.load %arg16[%c0_84, %c0_85, %c0_86] : memref<1x1x256xf32, #tpu.memory_space<vmem>>, vector<1x1x256xf32>
    %189 = vector.shape_cast %188 : vector<1x1x256xf32> to vector<1x256xf32>
    %cst_87 = arith.constant dense<0.000000e+00> : vector<16xf32>
    %190 = vector.multi_reduction <add>, %185, %cst_87 [1] : vector<16x256xf32> to vector<16xf32>
    %191 = vector.shape_cast %190 : vector<16xf32> to vector<16x1xf32>
    %cst_88 = arith.constant 2.560000e+02 : f32
    %192 = vector.broadcast %cst_88 : f32 to vector<16x1xf32>
    %193 = arith.divf %191, %192 : vector<16x1xf32>
    %194 = vector.broadcast %193 : vector<16x1xf32> to vector<16x256xf32>
    %195 = arith.subf %185, %194 : vector<16x256xf32>
    %196 = arith.mulf %195, %195 : vector<16x256xf32>
    %cst_89 = arith.constant dense<0.000000e+00> : vector<16xf32>
    %197 = vector.multi_reduction <add>, %196, %cst_89 [1] : vector<16x256xf32> to vector<16xf32>
    %198 = vector.shape_cast %197 : vector<16xf32> to vector<16x1xf32>
    %cst_90 = arith.constant 2.560000e+02 : f32
    %199 = vector.broadcast %cst_90 : f32 to vector<16x1xf32>
    %200 = arith.divf %198, %199 : vector<16x1xf32>
    %201 = vector.broadcast %193 : vector<16x1xf32> to vector<16x256xf32>
    %202 = arith.subf %185, %201 : vector<16x256xf32>
    %cst_91 = arith.constant 9.99999996E-13 : f32
    %203 = vector.broadcast %cst_91 : f32 to vector<16x1xf32>
    %204 = arith.addf %200, %203 : vector<16x1xf32>
    %205 = math.rsqrt %204 : vector<16x1xf32>
    %206 = vector.broadcast %205 : vector<16x1xf32> to vector<16x256xf32>
    %207 = arith.mulf %202, %206 : vector<16x256xf32>
    %208 = vector.broadcast %187 : vector<1x256xf32> to vector<16x256xf32>
    %209 = arith.mulf %207, %208 : vector<16x256xf32>
    %210 = vector.broadcast %189 : vector<1x256xf32> to vector<16x256xf32>
    %211 = arith.addf %209, %210 : vector<16x256xf32>
    %c0_92 = arith.constant 0 : index
    %c0_93 = arith.constant 0 : index
    %212 = vector.load %arg22[%c0_92, %c0_93] : memref<16x256xf32, #tpu.memory_space<vmem>>, vector<16x256xf32>
    tpu.vector_store %arg22[%c0_92, %c0_93], %211 {strides = array<i32>} : memref<16x256xf32, #tpu.memory_space<vmem>>, vector<16x256xf32>,
    %c1_i32 = arith.constant 1 : i32
    %213 = arith.cmpi eq, %arg0, %c1_i32 : i32
    %214 = arith.extui %213 : i1 to i32
    %c0_i32_94 = arith.constant 0 : i32
    %215 = arith.cmpi ne, %214, %c0_i32_94 : i32
    scf.if %215 {
      %216 = vector.extract_strided_slice %211 {offsets = [0, 0], sizes = [1, 256], strides = [1, 1]} : vector<16x256xf32> to vector<1x256xf32>
      %217 = arith.truncf %216 : vector<1x256xf32> to vector<1x256xbf16>
      %c0_95 = arith.constant 0 : index
      %c0_96 = arith.constant 0 : index
      %218 = vector.load %arg17[%c0_95, %c0_96] : memref<256x256xbf16, #tpu.memory_space<vmem>>, vector<256x256xbf16>
      %cst_97 = arith.constant dense<0.000000e+00> : vector<1x256xf32>
      %219 = tpu.matmul %217, %218, %cst_97 {dimension_numbers = #tpu.dot_dimension_numbers<[1], [0], [0], [1], [0, 0, 1, 1], [], []>} : vector<1x256xbf16>, vector<256x256xbf16>, vector<1x256xf32> -> vector<1x256xf32>
      %c0_98 = arith.constant 0 : index
      %c0_99 = arith.constant 0 : index
      %220 = vector.load %arg18[%c0_98, %c0_99] : memref<1x256xf32, #tpu.memory_space<vmem>>, vector<1x256xf32>
      %221 = arith.addf %219, %220 : vector<1x256xf32>
      %222 = math.tanh %221 : vector<1x256xf32>
      %223 = arith.truncf %222 : vector<1x256xf32> to vector<1x256xbf16>
      %c0_100 = arith.constant 0 : index
      %c0_101 = arith.constant 0 : index
      %224 = vector.load %arg19[%c0_100, %c0_101] : memref<256x128xbf16, #tpu.memory_space<vmem>>, vector<256x128xbf16>
      %cst_102 = arith.constant dense<0.000000e+00> : vector<1x128xf32>
      %225 = tpu.matmul %223, %224, %cst_102 {dimension_numbers = #tpu.dot_dimension_numbers<[1], [0], [0], [1], [0, 0, 1, 1], [], []>} : vector<1x256xbf16>, vector<256x128xbf16>, vector<1x128xf32> -> vector<1x128xf32>
      %c0_103 = arith.constant 0 : index
      %c0_104 = arith.constant 0 : index
      %226 = vector.load %arg20[%c0_103, %c0_104] : memref<1x128xf32, #tpu.memory_space<vmem>>, vector<1x128xf32>
      %227 = arith.addf %225, %226 : vector<1x128xf32>
      %c0_105 = arith.constant 0 : index
      %c0_106 = arith.constant 0 : index
      %228 = vector.load %arg21[%c0_105, %c0_106] : memref<2x128xf32, #tpu.memory_space<vmem>>, vector<1x128xf32>
      tpu.vector_store %arg21[%c0_105, %c0_106], %227 {strides = array<i32>} : memref<2x128xf32, #tpu.memory_space<vmem>>, vector<1x128xf32>,
      %229 = vector.extract_strided_slice %211 {offsets = [8, 0], sizes = [1, 256], strides = [1, 1]} : vector<16x256xf32> to vector<1x256xf32>
      %230 = arith.truncf %229 : vector<1x256xf32> to vector<1x256xbf16>
      %c0_107 = arith.constant 0 : index
      %c0_108 = arith.constant 0 : index
      %231 = vector.load %arg17[%c0_107, %c0_108] : memref<256x256xbf16, #tpu.memory_space<vmem>>, vector<256x256xbf16>
      %cst_109 = arith.constant dense<0.000000e+00> : vector<1x256xf32>
      %232 = tpu.matmul %230, %231, %cst_109 {dimension_numbers = #tpu.dot_dimension_numbers<[1], [0], [0], [1], [0, 0, 1, 1], [], []>} : vector<1x256xbf16>, vector<256x256xbf16>, vector<1x256xf32> -> vector<1x256xf32>
      %c0_110 = arith.constant 0 : index
      %c0_111 = arith.constant 0 : index
      %233 = vector.load %arg18[%c0_110, %c0_111] : memref<1x256xf32, #tpu.memory_space<vmem>>, vector<1x256xf32>
      %234 = arith.addf %232, %233 : vector<1x256xf32>
      %235 = math.tanh %234 : vector<1x256xf32>
      %236 = arith.truncf %235 : vector<1x256xf32> to vector<1x256xbf16>
      %c0_112 = arith.constant 0 : index
      %c0_113 = arith.constant 0 : index
      %237 = vector.load %arg19[%c0_112, %c0_113] : memref<256x128xbf16, #tpu.memory_space<vmem>>, vector<256x128xbf16>
      %cst_114 = arith.constant dense<0.000000e+00> : vector<1x128xf32>
      %238 = tpu.matmul %236, %237, %cst_114 {dimension_numbers = #tpu.dot_dimension_numbers<[1], [0], [0], [1], [0, 0, 1, 1], [], []>} : vector<1x256xbf16>, vector<256x128xbf16>, vector<1x128xf32> -> vector<1x128xf32>
      %c0_115 = arith.constant 0 : index
      %c0_116 = arith.constant 0 : index
      %239 = vector.load %arg20[%c0_115, %c0_116] : memref<1x128xf32, #tpu.memory_space<vmem>>, vector<1x128xf32>
      %240 = arith.addf %238, %239 : vector<1x128xf32>
      %c1_117 = arith.constant 1 : index
      %c0_118 = arith.constant 0 : index
      %241 = vector.load %arg21[%c1_117, %c0_118] : memref<2x128xf32, #tpu.memory_space<vmem>>, vector<1x128xf32>
      tpu.vector_store %arg21[%c1_117, %c0_118], %240 {strides = array<i32>} : memref<2x128xf32, #tpu.memory_space<vmem>>, vector<1x128xf32>,
    } else {
    }
    return
  }
  func.func @transform_0(%arg0: i32) -> (i32, i32, i32) {
    %c0_i32 = arith.constant 0 : i32
    %c0_i32_0 = arith.constant 0 : i32
    %c0_i32_1 = arith.constant 0 : i32
    %c0_i32_2 = arith.constant 0 : i32
    return %c0_i32, %c0_i32_0, %c0_i32_1 : i32, i32, i32
  }
  func.func @transform_1(%arg0: i32) -> (i32, i32) {
    %c0_i32 = arith.constant 0 : i32
    %c0_i32_0 = arith.constant 0 : i32
    %c0_i32_1 = arith.constant 0 : i32
    return %c0_i32, %c0_i32_0 : i32, i32
  }
  func.func @transform_2(%arg0: i32) -> (i32, i32) {
    %c0_i32 = arith.constant 0 : i32
    %c0_i32_0 = arith.constant 0 : i32
    %c0_i32_1 = arith.constant 0 : i32
    return %c0_i32, %c0_i32_0 : i32, i32
  }
  func.func @transform_3(%arg0: i32) -> (i32, i32) {
    %c0_i32 = arith.constant 0 : i32
    %c0_i32_0 = arith.constant 0 : i32
    %c0_i32_1 = arith.constant 0 : i32
    return %c0_i32, %c0_i32_0 : i32, i32
  }
  func.func @transform_4(%arg0: i32) -> (i32, i32, i32) {
    %c0_i32 = arith.constant 0 : i32
    %c0_i32_0 = arith.constant 0 : i32
    %c0_i32_1 = arith.constant 0 : i32
    return %arg0, %c0_i32, %c0_i32_0 : i32, i32, i32
  }
  func.func @transform_5(%arg0: i32) -> (i32, i32, i32) {
    %c0_i32 = arith.constant 0 : i32
    %c0_i32_0 = arith.constant 0 : i32
    %c0_i32_1 = arith.constant 0 : i32
    return %arg0, %c0_i32, %c0_i32_0 : i32, i32, i32
  }
  func.func @transform_6(%arg0: i32) -> (i32, i32, i32) {
    %c0_i32 = arith.constant 0 : i32
    %c0_i32_0 = arith.constant 0 : i32
    %c0_i32_1 = arith.constant 0 : i32
    return %arg0, %c0_i32, %c0_i32_0 : i32, i32, i32
  }
  func.func @transform_7(%arg0: i32) -> (i32, i32, i32) {
    %c0_i32 = arith.constant 0 : i32
    %c0_i32_0 = arith.constant 0 : i32
    %c0_i32_1 = arith.constant 0 : i32
    return %arg0, %c0_i32, %c0_i32_0 : i32, i32, i32
  }
  func.func @transform_8(%arg0: i32) -> (i32, i32, i32) {
    %c0_i32 = arith.constant 0 : i32
    %c0_i32_0 = arith.constant 0 : i32
    %c0_i32_1 = arith.constant 0 : i32
    return %arg0, %c0_i32, %c0_i32_0 : i32, i32, i32
  }
  func.func @transform_9(%arg0: i32) -> (i32, i32, i32) {
    %c0_i32 = arith.constant 0 : i32
    %c0_i32_0 = arith.constant 0 : i32
    %c0_i32_1 = arith.constant 0 : i32
    return %arg0, %c0_i32, %c0_i32_0 : i32, i32, i32
  }
  func.func @transform_10(%arg0: i32) -> (i32, i32, i32) {
    %c0_i32 = arith.constant 0 : i32
    %c0_i32_0 = arith.constant 0 : i32
    %c0_i32_1 = arith.constant 0 : i32
    return %arg0, %c0_i32, %c0_i32_0 : i32, i32, i32
  }
  func.func @transform_11(%arg0: i32) -> (i32, i32, i32) {
    %c0_i32 = arith.constant 0 : i32
    %c0_i32_0 = arith.constant 0 : i32
    %c0_i32_1 = arith.constant 0 : i32
    return %arg0, %c0_i32, %c0_i32_0 : i32, i32, i32
  }
  func.func @transform_12(%arg0: i32) -> (i32, i32, i32) {
    %c0_i32 = arith.constant 0 : i32
    %c0_i32_0 = arith.constant 0 : i32
    %c0_i32_1 = arith.constant 0 : i32
    return %arg0, %c0_i32, %c0_i32_0 : i32, i32, i32
  }
  func.func @transform_13(%arg0: i32) -> (i32, i32, i32) {
    %c0_i32 = arith.constant 0 : i32
    %c0_i32_0 = arith.constant 0 : i32
    %c0_i32_1 = arith.constant 0 : i32
    return %arg0, %c0_i32, %c0_i32_0 : i32, i32, i32
  }
  func.func @transform_14(%arg0: i32) -> (i32, i32, i32) {
    %c0_i32 = arith.constant 0 : i32
    %c0_i32_0 = arith.constant 0 : i32
    %c0_i32_1 = arith.constant 0 : i32
    return %arg0, %c0_i32, %c0_i32_0 : i32, i32, i32
  }
  func.func @transform_15(%arg0: i32) -> (i32, i32, i32) {
    %c0_i32 = arith.constant 0 : i32
    %c0_i32_0 = arith.constant 0 : i32
    %c0_i32_1 = arith.constant 0 : i32
    return %arg0, %c0_i32, %c0_i32_0 : i32, i32, i32
  }
  func.func @transform_16(%arg0: i32) -> (i32, i32) {
    %c0_i32 = arith.constant 0 : i32
    %c0_i32_0 = arith.constant 0 : i32
    %c0_i32_1 = arith.constant 0 : i32
    return %c0_i32, %c0_i32_0 : i32, i32
  }
  func.func @transform_17(%arg0: i32) -> (i32, i32) {
    %c0_i32 = arith.constant 0 : i32
    %c0_i32_0 = arith.constant 0 : i32
    %c0_i32_1 = arith.constant 0 : i32
    return %c0_i32, %c0_i32_0 : i32, i32
  }
  func.func @transform_18(%arg0: i32) -> (i32, i32) {
    %c0_i32 = arith.constant 0 : i32
    %c0_i32_0 = arith.constant 0 : i32
    %c0_i32_1 = arith.constant 0 : i32
    return %c0_i32, %c0_i32_0 : i32, i32
  }
  func.func @transform_19(%arg0: i32) -> (i32, i32) {
    %c0_i32 = arith.constant 0 : i32
    %c0_i32_0 = arith.constant 0 : i32
    %c0_i32_1 = arith.constant 0 : i32
    return %c0_i32, %c0_i32_0 : i32, i32
  }
  func.func @transform_20(%arg0: i32) -> (i32, i32) {
    %c0_i32 = arith.constant 0 : i32
    %c0_i32_0 = arith.constant 0 : i32
    %c0_i32_1 = arith.constant 0 : i32
    return %c0_i32, %c0_i32_0 : i32, i32
  }
}

</mosaic_0001>

<bundles_post_ra>
// kernel: pet_product_classifier_forward.1
= control target key start
LH: loop header
LB: loop body
LE: loop exit
PB: predicated region body
PF: predicated region fallthrough
CT: control target
= control target key end

     0   :  { %s7118_s0 = inlined_call_operand.vmem [shape: f32[2,1,8], index: 0, kind: input, shape index: {}]   ;;  %s7119_s1 = inlined_call_operand.vmem [shape: f32[16,256], index: 1, kind: input, shape index: {}]   ;;  %s7120_s2 = inlined_call_operand.vmem [shape: f32[1,256], index: 2, kind: input, shape index: {}]   ;;  %s7121_s3 = inlined_call_operand.vmem [shape: f32[1,256], index: 3, kind: input, shape index: {}]   ;;  %s7122_s4 = inlined_call_operand.hbm [shape: bf16[2,256,768], index: 4, kind: input, shape index: {}]   ;;  %s7123_s5 = inlined_call_operand.vmem [shape: f32[2,1,768], index: 5, kind: input, shape index: {}]   ;;  %s7124_s6 = inlined_call_operand.vmem [shape: bf16[2,256,256], index: 6, kind: input, shape index: {}]   ;;  %s7125_s7 = inlined_call_operand.vmem [shape: f32[2,1,256], index: 7, kind: input, shape index: {}]   ;;  %s7126_s8 = inlined_call_operand.vmem [shape: f32[2,1,256], index: 8, kind: input, shape index: {}]   ;;  %s7127_s9 = inlined_call_operand.vmem [shape: f32[2,1,256], index: 9, kind: input, shape index: {}]   ;;  %s7128_s10 = inlined_call_operand.hbm [shape: bf16[2,256,512], index: 10, kind: input, shape index: {}]   ;;  %s7129_s11 = inlined_call_operand.vmem [shape: f32[2,1,512], index: 11, kind: input, shape index: {}]   ;;  %s7130_s12 = inlined_call_operand.hbm [shape: bf16[2,512,256], index: 12, kind: input, shape index: {}]   ;;  %s7131_s13 = inlined_call_operand.vmem [shape: f32[2,1,256], index: 13, kind: input, shape index: {}]   ;;  %s7132_s14 = inlined_call_operand.vmem [shape: f32[2,1,256], index: 14, kind: input, shape index: {}]   ;;  %s7133_s15 = inlined_call_operand.vmem [shape: f32[2,1,256], index: 15, kind: input, shape index: {}]   ;;  %s7134_s16 = inlined_call_operand.vmem [shape: bf16[256,256], index: 16, kind: input, shape index: {}]   ;;  %s7135_s17 = inlined_call_operand.vmem [shape: f32[1,256], index: 17, kind: input, shape index: {}]   ;;  %s7136_s18 = inlined_call_operand.vmem [shape: bf16[256,128], index: 18, kind: input, shape index: {}]   ;;  %s7137_s19 = inlined_call_operand.vmem [shape: f32[1,128], index: 19, kind: input, shape index: {}]   ;;  %s7138_s20 = inlined_call_operand.hbm [shape: f32[2,128], index: 20, kind: output, shape index: {}]  }
   0x1   :  { %7154 = sst [smem:[#allocation18_spill]] %s7118_s0 }
   0x2   :  { %7155 = sst [smem:[#allocation19_spill]] %s7119_s1 }
   0x3   :  { %7156 = sst [smem:[#allocation20_spill]] %s7120_s2 }
   0x4   :  { %7157 = sst [smem:[#allocation21_spill]] %s7121_s3 }
   0x5   :  { %7158 = sst [smem:[#allocation22_spill]] %s7122_s4 }
   0x6   :  { %7159 = sst [smem:[#allocation23_spill]] %s7123_s5 }
   0x7   :  { %7160 = sst [smem:[#allocation24_spill]] %s7124_s6 }
   0x8   :  { %7161 = sst [smem:[#allocation25_spill]] %s7128_s10 }
   0x9   :  { %7162 = sst [smem:[#allocation26_spill]] %s7130_s12 }
   0xa   :  { %7163 = sst [smem:[#allocation27_spill]] %s7132_s14 }
   0xb   :  { %7164 = sst [smem:[#allocation28_spill]] %s7133_s15 }
   0xc   :  { %7165 = sst [smem:[#allocation29_spill]] %s7134_s16 }
   0xd   :  { %7166 = sst [smem:[#allocation30_spill]] %s7135_s17 }
   0xe   :  { %7167 = sst [smem:[#allocation31_spill]] %s7136_s18 }
   0xf   :  { %7168 = sst [smem:[#allocation32_spill]] %s7137_s19 }
  0x10   :  { %7169 = sst [smem:[#allocation33_spill]] %s7138_s20 }
  0x11   :  { %25 = vsyncpa [#allocation5], 0 }
  0x12   :  { %27 = vsyncpa [#allocation5 + $0x1], 0 }
  0x13   :  { %28 = vsyncpa [#allocation8], 0 }
  0x14   :  { %30 = vsyncpa [#allocation8 + $0x1], 0 }
  0x15   :  { %31 = vsyncpa [#allocation6], 0  ;;  %s5980_s1 = smov 0   ;;  %s5982_s22 = smov 0  }
  0x16   :  { %s5984_s23 = smov 0   ;;  %s5986_s24 = smov 0  }
  0x17 LB: > { %7170 = sst [smem:[#allocation14_spill]] %s5853_s22  ;;  %s5999_s2 = sadd.s32 4294967295, %s5861_s24   ;;  %s5861_s24 = sphi %s5986_s24, %s7203_s24   ;;  %s5857_s23 = sphi %s5984_s23, %s7206_s23   ;;  %s5853_s22 = sphi %s5982_s22, %s7205_s22   ;;  %s5849_s1 = sphi %s5980_s1, %s7204_s1  }
  0x18   : > { %7171 = sst [smem:[#allocation15_spill]] %s5857_s23  ;;  %s6002_s25 = sadd.s32 1, %s5861_s24  }
  0x19   : > { %7172 = sst [smem:[#allocation16_spill]] %s6002_s25  ;;  %s125_s3 = ssub.s32 %s5861_s24, %s6002_s25 }
  0x1a   : > { %s128_s26 = sadd.s32 1, %s5857_s23  ;;  %p126_p0 = scmp.eq.s32.totalorder %s125_s3, 0 }
  0x1b   : > { %p135_p1 = scmp.ne.s32.totalorder %s5857_s23, %s5853_s22  ;;  %p136_p2 = scmp.eq.s32.totalorder %s5861_s24, 0 }
  0x1c   : > { %p141_p3 = scmp.ne.s32.totalorder %s5853_s22, %s5849_s1  ;;  %p142_p5 = scmp.eq.s32.totalorder %s5999_s2, 0 }
  0x1d   : > { %s6012_s27 = scalar_select %p126_p0, %s5857_s23, %s128_s26  }
  0x1e   : > { %p137_p4 = por %p136_p2, %p135_p1  ;;  %p5149_p6 = scmp.lt.s32.totalorder %s5861_s24, 2 }
  0x1f   : > { %7173 = sst [smem:[#allocation17_spill]] %s6012_s27  ;;  %p6016_p7 = por %p142_p5, %p141_p3 }
  0x20   : > { %s6021_s4 = sand.u32 1, %s5857_s23   ;;  %p6023_p8 = pnand %p5149_p6, %p137_p4 }
  0x21   : > { %s7174_s28 = scalar_select %p6016_p7, 1, 0 }
  0x22   : > { %s637_s30 = sand.u32 1, %s5861_s24   ;;  %s7146_s0 = sshll.u32 %s6021_s4, 9 }
  0x23   : > { %s7147_s21 = sshll.u32 %s5861_s24, 13  ;;  %s641_s1 = scalar_lea.vmem [#allocation7], %s7146_s0 }
  0x24   : > { %s648_s3 = sshll.u32 %s641_s1, 4  ;;  %s7176_s10 = sld [smem:[#allocation25_spill]]  ;;  %s6039_s3 = int_to_ptr.vmem [resolvable:$true] %s648_s3 }
  0x25   : > { %s6041_s23 = scalar_lea.sflag [#allocation8], %s637_s30  ;;  %p6047_p10 = pneg %p6023_p8 }
  0x2a   : > { %s6037_s25 = scalar_lea.hbm %s7176_s10, %s7147_s21  ;;  %s5716_s26 = scalar_lea.hbm %s7176_s10, 16384 }
  0x2b   : > { %s5711_s20 = scalar_lea.hbm %s6037_s25, 8192  ;;  %p5717_p13 = scmp.lt.s32.totalorder %s6037_s25, %s7176_s10 }
  0x2c   : > { %p5712_p9 = scmp.ne.s32.totalorder %s6037_s25, %s5711_s20  ;;  %p5718_p0 = scmp.lt.s32.totalorder %s5716_s26, %s5711_s20 }
  0x2e   : > { %p5714_p11 = pnand %p6047_p10, %p5712_p9  ;;  %p5719_p1 = por %p5718_p0, %p5717_p13 }
  0x30   : > { %p5715_p12 = pneg %p5714_p11 }
  0x32   : > { %p5720_p2 = pnand %p5719_p1, %p5715_p12 }
  0x34   : > { %5723 = shalt.err (!%p5720_p2)
}
  0x35   : > { %s5724_s30 = scalar_lea.vmem %s6039_s3, 8192  ;;  %s5863_s17 = smov [#allocation7]  }
  0x36   : > { %p5725_p3 = scmp.ne.s32.totalorder %s6039_s3, %s5724_s30  ;;  %s5729_s27 = sshll.u32 %s5863_s17, 4  ;;  %s5730_s27 = int_to_ptr.vmem [resolvable:$false] %s5729_s27 }
  0x37   : > { %s5731_s1 = scalar_lea.vmem %s5730_s27, 16384  ;;  %p5732_p6 = scmp.lt.s32.totalorder %s6039_s3, %s5730_s27 }
  0x38   : > { %p5727_p4 = pnand %p5725_p3, %p6047_p10  ;;  %p5733_p9 = scmp.lt.s32.totalorder %s5731_s1, %s5724_s30 }
  0x3a   : > { %p5728_p5 = pneg %p5727_p4  ;;  %p5734_p11 = por %p5733_p9, %p5732_p6 }
  0x3c   : > { %p5735_p7 = pnand %p5734_p11, %p5728_p5 }
  0x3e   : > { %5738 = shalt.err (!%p5735_p7)
}
  0x3f   : > { %s5864_s20 = smov 256   ;;  %s5865_s17 = smov 16  }
  0x40   : > { %5145 = dma.hbm_to_vmem [thread:$0]  (!%p6023_p8), %s6037_s25, 8192, %s6039_s3, %s6041_s23, %s5864_s20, %s5864_s20, %s5865_s17  }
  0x41   : > { %s7178_s0 = sshll.u32 %s5861_s24, 13  ;;  %s7179_s12 = sld [smem:[#allocation26_spill]] }
  0x42   : > { %s7180_s27 = sshll.u32 %s6021_s4, 9  ;;  %p4637_p7 = scmp.ge.s32.totalorder %s5861_s24, 1 }
  0x43   : > { %s669_s1 = scalar_lea.vmem [#allocation9], %s7180_s27  ;;  %p705_p12 = scmp.lt.s32.totalorder %s5861_s24, 3 }
  0x44   : > { %s676_s10 = sshll.u32 %s669_s1, 4  ;;  %s5125_s18 = smul.u32 768, %s6021_s4  ;;  %s6080_s10 = int_to_ptr.vmem [resolvable:$true] %s676_s10 }
  0x45   : > { %p6084_p13 = pnand %p4637_p7, %p705_p12  ;;  %s5126_s25 = smul.u32 12288, %s5861_s24 }
  0x46   : > { %s7182_s17 = sld [smem:[#allocation22_spill]]  ;;  %s581_s27 = scalar_lea.sflag [#allocation5], %s6021_s4 }
  0x47   : > { %s6075_s30 = scalar_lea.hbm %s7179_s12, %s7178_s0  ;;  %s584_s0 = scalar_lea.vmem [#allocation4], %s5125_s18 }
  0x48   : > { %s7181_s16 = scalar_select %p6084_p13, 1, 0 }
  0x49   : > { %s591_s26 = sshll.u32 %s584_s0, 4  ;;  %s6094_s26 = int_to_ptr.vmem [resolvable:$true] %s591_s26 }
  0x4c   : > { %s6092_s21 = scalar_lea.hbm %s7182_s17, %s5126_s25  ;;  %s5744_s14 = scalar_lea.hbm %s7182_s17, 24576 }
  0x4d   : > { %s5739_s1 = scalar_lea.hbm %s6092_s21, 12288  ;;  %p5745_p3 = scmp.lt.s32.totalorder %s6092_s21, %s7182_s17 }
  0x4e   : > { %p5740_p0 = scmp.ne.s32.totalorder %s6092_s21, %s5739_s1  ;;  %p5746_p4 = scmp.lt.s32.totalorder %s5744_s14, %s5739_s1 }
  0x50   : > { %p5742_p1 = pnand %p5740_p0, %p6047_p10  ;;  %p5747_p5 = por %p5746_p4, %p5745_p3 }
  0x52   : > { %p5743_p2 = pneg %p5742_p1 }
  0x54   : > { %p5748_p6 = pnand %p5747_p5, %p5743_p2 }
  0x56   : > { %5751 = shalt.err (!%p5748_p6)
}
  0x57   : > { %s5752_s18 = scalar_lea.vmem %s6094_s26, 12288  ;;  %s5866_s20 = smov [#allocation4]  }
  0x58   : > { %p5753_p9 = scmp.ne.s32.totalorder %s6094_s26, %s5752_s18  ;;  %s5757_s15 = sshll.u32 %s5866_s20, 4  ;;  %s5758_s15 = int_to_ptr.vmem [resolvable:$false] %s5757_s15 }
  0x59   : > { %s5759_s0 = scalar_lea.vmem %s5758_s15, 24576  ;;  %p5760_p12 = scmp.lt.s32.totalorder %s6094_s26, %s5758_s15 }
  0x5a   : > { %p5755_p11 = pnand %p5753_p9, %p6047_p10  ;;  %p5761_p0 = scmp.lt.s32.totalorder %s5759_s0, %s5752_s18 }
  0x5c   : > { %p5756_p7 = pneg %p5755_p11  ;;  %p5762_p1 = por %p5761_p0, %p5760_p12 }
  0x5e   : > { %p5763_p13 = pnand %p5762_p1, %p5756_p7 }
  0x60   : > { %5766 = shalt.err (!%p5763_p13)
}
  0x61   : > { %s5867_s14 = smov 384   ;;  %s5868_s1 = smov 24  }
  0x62   : > { %5142 = dma.hbm_to_vmem [thread:$0]  (!%p6023_p8), %s6092_s21, 12288, %s6094_s26, %s581_s27, %s5867_s14, %s5867_s14, %s5868_s1  }
  0x63   : > { %s5767_s24 = scalar_lea.hbm %s6075_s30, 8192  ;;  %s5772_s18 = scalar_lea.hbm %s7179_s12, 16384 }
  0x64   : > { %p5768_p2 = scmp.ne.s32.totalorder %s6075_s30, %s5767_s24  ;;  %p5773_p13 = scmp.lt.s32.totalorder %s6075_s30, %s7179_s12 }
  0x65   : > { %p5774_p5 = scmp.lt.s32.totalorder %s5772_s18, %s5767_s24 }
  0x66   : > { %p5770_p3 = pnand %p5768_p2, %p6047_p10 }
  0x67   : > { %p5775_p6 = por %p5774_p5, %p5773_p13 }
  0x68   : > { %p5771_p4 = pneg %p5770_p3 }
  0x6a   : > { %p5776_p9 = pnand %p5775_p6, %p5771_p4 }
  0x6c   : > { %5779 = shalt.err (!%p5776_p9)
}
  0x6d   : > { %s5780_s4 = scalar_lea.vmem %s6080_s10, 8192  ;;  %s5869_s21 = smov [#allocation9]  }
  0x6e   : > { %p5781_p11 = scmp.ne.s32.totalorder %s6080_s10, %s5780_s4  ;;  %s5785_s26 = sshll.u32 %s5869_s21, 4  ;;  %s5786_s26 = int_to_ptr.vmem [resolvable:$false] %s5785_s26 }
  0x6f   : > { %s5787_s27 = scalar_lea.vmem %s5786_s26, 16384  ;;  %p5788_p0 = scmp.lt.s32.totalorder %s6080_s10, %s5786_s26 }
  0x70   : > { %p5783_p7 = pnand %p5781_p11, %p6047_p10  ;;  %p5789_p1 = scmp.lt.s32.totalorder %s5787_s27, %s5780_s4 }
  0x72   : > { %p5784_p12 = pneg %p5783_p7  ;;  %p5790_p2 = por %p5789_p1, %p5788_p0 }
  0x74   : > { %p5791_p3 = pnand %p5790_p2, %p5784_p12 }
  0x76   : > { %5794 = shalt.err (!%p5791_p3)
}
  0x77   : > { %s5870_s0 = smov 128   ;;  %s5871_s14 = smov 8  }
  0x78   : > { %5148 = dma.hbm_to_vmem [thread:$0]  (!%p6023_p8), %s6075_s30, 8192, %s6080_s10, %s6041_s23, %s5870_s0, %s5870_s0, %s5871_s14  }
  0x79   : > { %p7183_p10 = scmp.ne.s32.totalorder %s7181_s16, 0 }
  0x7a   : > { %s711_s19 = sand.u32 (!%p7183_p10), 1, %s5853_s22   ;;  %p7184_p4 = scmp.ne.s32.totalorder (!%p7183_p10), %s7174_s28, 0 }
  0x7b   : > { %709 = sbr.rel (%p7183_p10) target bundleno = 5039 (0x13af), region = 100  ;;  %s712_s24 = scalar_lea.sflag (!%p7183_p10), [#allocation5], %s711_s19 }
  0x7c   : > { %s5127_s1 = smul.u32 (!%p7183_p10), 768, %s711_s19 }
  0x7e   : > { %s6143_s3 = scalar_lea.vmem (!%p7183_p10), [#allocation4], %s5127_s1 }
  0x80   : > { %5836 = dma.done.wait (%p7184_p4), %s712_s24, 12288  }
  0x81   : > { %5838 = vsyncadd (%p7184_p4), %s712_s24, 4294955008  ;;  %s720_s25 = sand.u32 1, %s5999_s2   ;;  %s4638_s29 = sshll.u32 %s711_s19, 9 }
  0x82   : > { %s721_s10 = scalar_lea.sflag [#allocation8], %s720_s25  ;;  %s6150_s23 = scalar_lea.vmem [#allocation7], %s4638_s29 }
  0x83   : > { %5840 = dma.done.wait (%p7184_p4), %s721_s10, 16384  }
  0x84   : > { %5842 = vsyncadd (%p7184_p4), %s721_s10, 4294950912  ;;  %p832_p8 = scmp.lt.s32.totalorder %s5999_s2, 1  ;;  %s7185_s6 = sld [smem:[#allocation24_spill]] }
  0x85   : > { %s7186_s5 = sld [smem:[#allocation23_spill]]  ;;  %s6199_s10 = scalar_lea.vmem [#allocation9], %s4638_s29 }
  0x86   : > { %s833_s16 = scalar_select %p832_p8, %s5999_s2, 1 }
  0x87   : > { %s7187_s19 = sld [smem:[#allocation27_spill]]  ;;  %p4649_p13 = scmp.ne.s32.totalorder %s5999_s2, 0 }
  0x88   : > { %s5128_s30 = smul.u32 6, %s833_s16  ;;  %s5016_s18 = sshll.u32 %s833_s16, 8 }
  0x89   : > { %s6163_s21 = sshll.u32 %s833_s16, 1  ;;  %s4645_s15 = sshll.u32 %s833_s16, 2 }
  0x8a   : > { %s6161_s4 = scalar_lea.vmem %s7185_s6, %s5016_s18  ;;  %s852_s20 = scalar_lea.vmem %s7127_s9, %s6163_s21 }
  0x8b   : > { %s6168_s28 = scalar_lea.vmem %s7186_s5, %s5128_s30  ;;  %s860_s6 = scalar_lea.vmem %s7131_s13, %s6163_s21 }
  0x8c   : > { %s6189_s5 = scalar_lea.vmem %s7129_s11, %s4645_s15  ;;  %s7188_s25 = sld [smem:[#allocation28_spill]] }
  0x8d   : > { %s864_s17 = scalar_lea.vmem %s7187_s19, %s6163_s21  ;;  %s7189_s26 = sld [smem:[#allocation19_spill]] (!%p4649_p13) }
  0x8e   : > { %873 = sbr.rel (%p4649_p13) target bundleno = 463 (0x1cf), region = 116  ;;  %s7190_s14 = sld [smem:[#allocation20_spill]] (!%p4649_p13) }
  0x8f   : > { %s7191_s16 = sld [smem:[#allocation21_spill]] (!%p4649_p13) }
  0x92   : > { %s868_s22 = scalar_lea.vmem %s7188_s25, %s6163_s21 }
  0x93   : > { %v874_v0 = vld [vmem:[%s7189_s26] sm:$0xff]  ;;  %v875_v1 = vld [vmem:[%s7189_s26 + $0x8] sm:$0xff]  ;;  %v876_v2 = vld [vmem:[%s7189_s26 + $0x10] sm:$0xff]  ;;  %v914_v24 = vlaneseq }
  0x94   : > { %v880_v3 = vadd.f32 %v875_v1, %v874_v0  ;;  %v877_v4 = vld [vmem:[%s7189_s26 + $0x18] sm:$0xff]  ;;  %v878_v30 = vld [vmem:[%s7190_s14] sm:$0x3] }
  0x95   : > { %v883_v5 = vadd.f32 %v877_v4, %v876_v2  ;;  %v915_v27 = vshrl.u32 %v914_v24, 7  ;;  %v879_v31 = vld [vmem:[%s7191_s16] sm:$0x3] }
  0x96   : > { %881 = vadd.xlane.f32.xlu0 %v880_v3 }
  0x97   : > { %v916_v28 = vsub.s32 0, %v915_v27  ;;  %v920_v29 = vsub.s32 1, %v915_v27 }
  0x99   : > { %v917_v32 = vrot.slane %v878_v30, %v916_v28  ;;  %v921_v33 = vrot.slane %v878_v30, %v920_v29  ;;  %v932_v35 = vrot.slane %v879_v31, %v916_v28  ;;  %v936_v36 = vrot.slane %v879_v31, %v920_v29 }
  0x9a   : > { %884 = vadd.xlane.f32.xlu0 %v883_v5 }
 0x11f   : > { %v882_v6 = vpop.xlane.xlu0 %881 }
 0x120   : > { %v887_v7 = vmul.f32 0.00390625, %v882_v6 }
 0x122   : > { %v889_v8 = vsub.f32 %v874_v0, %v887_v7  ;;  %v890_v9 = vsub.f32 %v875_v1, %v887_v7 }
 0x123   : > { %v885_v10 = vpop.xlane.xlu0 %884 }
 0x124   : > { %v888_v11 = vmul.f32 0.00390625, %v885_v10  ;;  %v893_v12 = vmul.f32 %v889_v8, %v889_v8  ;;  %v894_v13 = vmul.f32 %v890_v9, %v890_v9 }
 0x126   : > { %v891_v14 = vsub.f32 %v876_v2, %v888_v11  ;;  %v892_v15 = vsub.f32 %v877_v4, %v888_v11  ;;  %v897_v16 = vadd.f32 %v894_v13, %v893_v12 }
 0x128   : > { %898 = vadd.xlane.f32.xlu1 %v897_v16  ;;  %v895_v17 = vmul.f32 %v891_v14, %v891_v14  ;;  %v896_v18 = vmul.f32 %v892_v15, %v892_v15 }
 0x12a   : > { %v900_v19 = vadd.f32 %v896_v18, %v895_v17 }
 0x12c   : > { %901 = vadd.xlane.f32.xlu1 %v900_v19 }
 0x1b1   : > { %v899_v20 = vpop.xlane.xlu1 %898 }
 0x1b2   : > { %v903_v21 = vmul.f32 0.00390625, %v899_v20 }
 0x1b4   : > { %v905_v22 = vadd.f32 1e-12, %v903_v21 }
 0x1b5   : > { %v902_v23 = vpop.xlane.xlu1 %901 }
 0x1b6   : > { %5193 = vrsqrt.f32 %v905_v22  ;;  %v904_v25 = vmul.f32 0.00390625, %v902_v23 }
 0x1b8   : > { %v906_v26 = vadd.f32 1e-12, %v904_v25 }
 0x1ba   : > { %5195 = vrsqrt.f32 %v906_v26 }
 0x1c3   : > { %v5194_v34 = vpop.eup %5193 }
 0x1c4   : > { %v909_v37 = vmul.f32 %v5194_v34, %v889_v8  ;;  %v910_v38 = vmul.f32 %v5194_v34, %v890_v9 }
 0x1c6   : > { %v924_v39 = vmul.f32 %v917_v32, %v909_v37  ;;  %v925_v40 = vmul.f32 %v921_v33, %v910_v38 }
 0x1c7   : > { %v5196_v41 = vpop.eup %5195 }
 0x1c8   : > { %v939_v42 = vadd.f32 %v932_v35, %v924_v39  ;;  %v940_v43 = vadd.f32 %v936_v36, %v925_v40  ;;  %v911_v44 = vmul.f32 %v5196_v41, %v891_v14  ;;  %v912_v45 = vmul.f32 %v5196_v41, %v892_v15 }
 0x1ca   : > { %943 = vst [vmem:[#allocation2 + $0x10] sm:$0xff] %v939_v42  ;;  %944 = vst [vmem:[#allocation2] sm:$0xff] %v940_v43  ;;  %v926_v46 = vmul.f32 %v917_v32, %v911_v44  ;;  %v927_v47 = vmul.f32 %v921_v33, %v912_v45 }
 0x1cc   : > { %v941_v48 = vadd.f32 %v932_v35, %v926_v46  ;;  %v942_v49 = vadd.f32 %v936_v36, %v927_v47 }
 0x1ce   : > { %945 = vst [vmem:[#allocation2 + $0x18] sm:$0xff] %v941_v48  ;;  %946 = vst [vmem:[#allocation2 + $0x8] sm:$0xff] %v942_v49 }
 0x1cf PF: > { %v5197_v50 = vld [vmem:[%s6143_s3 + $0x15c] ss:$24 sps:$4 sm:$0xff]   ;;  %v5199_v51 = vld [vmem:[%s6143_s3 + $0x158] ss:$24 sps:$4 sm:$0xff]   ;;  %v5203_v54 = vld [vmem:[%s6143_s3 + $0x12c] ss:$24 sps:$4 sm:$0xff]   ;;  %s7193_s19 = scalar_lea.vmem %s7125_s7, %s6163_s21  ;;  %s7194_s25 = scalar_lea.vmem %s7126_s8, %s6163_s21 }
 0x1d0   : > { %1604 = vmatprep.subr.bf16.mxu1 %v5197_v50  ;;  %v5200_v52 = vld [vmem:[%s6143_s3 + $0x154] ss:$24 sps:$4 sm:$0xff]   ;;  %v5202_v53 = vld [vmem:[%s6143_s3 + $0x150] ss:$24 sps:$4 sm:$0xff]   ;;  %v5206_v56 = vld [vmem:[%s6143_s3 + $0x124] ss:$24 sps:$4 sm:$0xff]  }
 0x1d1   : > { %1605 = vmatpush1.bf16.msra.mxu1 %v5199_v51  ;;  %v5205_v55 = vld [vmem:[%s6143_s3 + $0x128] ss:$24 sps:$4 sm:$0xff]   ;;  %1561 = vmatprep.subr.bf16.mxu0 %v5200_v52  ;;  %v5209_v58 = vld [vmem:[%s6143_s3 + $0xfc] ss:$24 sps:$4 sm:$0xff]   ;;  %v5211_v59 = vld [vmem:[%s6143_s3 + $0xf8] ss:$24 sps:$4 sm:$0xff]  }
 0x1d2   : > { %1562 = vmatpush1.bf16.msra.mxu0 %v5202_v53  ;;  %1606 = vmatprep.subr.bf16.mxu1 %v5203_v54  ;;  %v5208_v57 = vld [vmem:[%s6143_s3 + $0x120] ss:$24 sps:$4 sm:$0xff]   ;;  %v5212_v60 = vld [vmem:[%s6143_s3 + $0xf4] ss:$24 sps:$4 sm:$0xff]   ;;  %v5214_v62 = vld [vmem:[%s6143_s3 + $0xf0] ss:$24 sps:$4 sm:$0xff]  }
 0x1d3   : > { %1563 = vmatprep.subr.bf16.mxu0 %v5206_v56  ;;  %v5215_v61 = vld [vmem:[%s6143_s3 + $0xcc] ss:$24 sps:$4 sm:$0xff]   ;;  %v5217_v0 = vld [vmem:[%s6143_s3 + $0xc8] ss:$24 sps:$4 sm:$0xff]   ;;  %v5221_v1 = vld [vmem:[%s6143_s3 + $0x9c] ss:$24 sps:$4 sm:$0xff]  }
 0x1d4   : > { %v5218_v63 = vld [vmem:[%s6143_s3 + $0xc4] ss:$24 sps:$4 sm:$0xff]   ;;  %v5220_v2 = vld [vmem:[%s6143_s3 + $0xc0] ss:$24 sps:$4 sm:$0xff]   ;;  %v5224_v3 = vld [vmem:[%s6143_s3 + $0x94] ss:$24 sps:$4 sm:$0xff]  }
 0x1d5   : > { %1607 = vmatpush1.bf16.msra.mxu1 %v5205_v55  ;;  %v5223_v4 = vld [vmem:[%s6143_s3 + $0x98] ss:$24 sps:$4 sm:$0xff]   ;;  %v5227_v5 = vld [vmem:[%s6143_s3 + $0x6c] ss:$24 sps:$4 sm:$0xff]   ;;  %v5229_v8 = vld [vmem:[%s6143_s3 + $0x68] ss:$24 sps:$4 sm:$0xff]  }
 0x1d6   : > { %1608 = vmatprep.subr.bf16.mxu1 %v5209_v58  ;;  %1564 = vmatpush1.bf16.msra.mxu0 %v5208_v57  ;;  %v5226_v6 = vld [vmem:[%s6143_s3 + $0x90] ss:$24 sps:$4 sm:$0xff]   ;;  %v5230_v7 = vld [vmem:[%s6143_s3 + $0x64] ss:$24 sps:$4 sm:$0xff]   ;;  %v5232_v10 = vld [vmem:[%s6143_s3 + $0x60] ss:$24 sps:$4 sm:$0xff]   ;;  %v1051_v57 = vlaneseq }
 0x1d7   : > { %1565 = vmatprep.subr.bf16.mxu0 %v5212_v60  ;;  %v5233_v9 = vld [vmem:[%s6143_s3 + $0x3c] ss:$24 sps:$4 sm:$0xff]   ;;  %v5235_v12 = vld [vmem:[%s6143_s3 + $0x38] ss:$24 sps:$4 sm:$0xff]   ;;  %v5239_v13 = vld [vmem:[%s6143_s3 + $0xc] ss:$24 sps:$4 sm:$0xff]  }
 0x1d8   : > { %v5236_v11 = vld [vmem:[%s6143_s3 + $0x34] ss:$24 sps:$4 sm:$0xff]   ;;  %v5238_v14 = vld [vmem:[%s6143_s3 + $0x30] ss:$24 sps:$4 sm:$0xff]   ;;  %v5242_v15 = vld [vmem:[%s6143_s3 + $0x4] ss:$24 sps:$4 sm:$0xff]  }
 0x1d9   : > { %1609 = vmatpush1.bf16.msra.mxu1 %v5211_v59  ;;  %v5241_v16 = vld [vmem:[%s6143_s3 + $0x8] ss:$24 sps:$4 sm:$0xff]   ;;  %v5245_v17 = vld [vmem:[%s6143_s3 + $0x2dc] ss:$24 sps:$4 sm:$0xff]   ;;  %v5247_v20 = vld [vmem:[%s6143_s3 + $0x2d8] ss:$24 sps:$4 sm:$0xff]  }
 0x1da   : > { %1610 = vmatprep.subr.bf16.mxu1 %v5215_v61  ;;  %1566 = vmatpush1.bf16.msra.mxu0 %v5214_v62  ;;  %v5244_v18 = vld [vmem:[%s6143_s3] ss:$24 sps:$4 sm:$0xff]   ;;  %v5248_v19 = vld [vmem:[%s6143_s3 + $0x2d4] ss:$24 sps:$4 sm:$0xff]   ;;  %v5250_v22 = vld [vmem:[%s6143_s3 + $0x2d0] ss:$24 sps:$4 sm:$0xff]  }
 0x1db   : > { %1567 = vmatprep.subr.bf16.mxu0 %v5218_v63  ;;  %v5251_v21 = vld [vmem:[%s6143_s3 + $0x2ac] ss:$24 sps:$4 sm:$0xff]   ;;  %v5253_v24 = vld [vmem:[%s6143_s3 + $0x2a8] ss:$24 sps:$4 sm:$0xff]   ;;  %v5257_v25 = vld [vmem:[%s6143_s3 + $0x27c] ss:$24 sps:$4 sm:$0xff]  }
 0x1dc   : > { %v5254_v23 = vld [vmem:[%s6143_s3 + $0x2a4] ss:$24 sps:$4 sm:$0xff]   ;;  %v5256_v26 = vld [vmem:[%s6143_s3 + $0x2a0] ss:$24 sps:$4 sm:$0xff]   ;;  %v5260_v27 = vld [vmem:[%s6143_s3 + $0x274] ss:$24 sps:$4 sm:$0xff]  }
 0x1dd   : > { %1611 = vmatpush1.bf16.msra.mxu1 %v5217_v0  ;;  %v5259_v28 = vld [vmem:[%s6143_s3 + $0x278] ss:$24 sps:$4 sm:$0xff]   ;;  %v5263_v29 = vld [vmem:[%s6143_s3 + $0x24c] ss:$24 sps:$4 sm:$0xff]   ;;  %v5265_v31 = vld [vmem:[%s6143_s3 + $0x248] ss:$24 sps:$4 sm:$0xff]  }
 0x1de   : > { %1612 = vmatprep.subr.bf16.mxu1 %v5221_v1  ;;  %1568 = vmatpush1.bf16.msra.mxu0 %v5220_v2  ;;  %v5262_v30 = vld [vmem:[%s6143_s3 + $0x270] ss:$24 sps:$4 sm:$0xff]   ;;  %v5266_v32 = vld [vmem:[%s6143_s3 + $0x244] ss:$24 sps:$4 sm:$0xff]   ;;  %v5268_v34 = vld [vmem:[%s6143_s3 + $0x240] ss:$24 sps:$4 sm:$0xff]  }
 0x1df   : > { %1569 = vmatprep.subr.bf16.mxu0 %v5224_v3  ;;  %v948_v33 = vld [vmem:[#allocation2] sm:$0xff]  ;;  %v5269_v35 = vld [vmem:[%s6143_s3 + $0x21c] ss:$24 sps:$4 sm:$0xff]   ;;  %v950_v36 = vld [vmem:[#allocation2 + $0x8] sm:$0xff]  ;;  %v5872_v56 = vmov 0.0   ;;  %vm5873_vm0 = vmmov 0  }
 0x1e0   : > { %v5272_v37 = vld [vmem:[%s6143_s3 + $0x214] ss:$24 sps:$4 sm:$0xff]   ;;  %v952_v38 = vpack.c.bf16 %v950_v36, %v948_v33  ;;  %v5271_v39 = vld [vmem:[%s6143_s3 + $0x218] ss:$24 sps:$4 sm:$0xff]   ;;  %v5278_v42 = vld [vmem:[%s6143_s3 + $0x1e4] ss:$24 sps:$4 sm:$0xff]  }
 0x1e1   : > { %1613 = vmatpush1.bf16.msra.mxu1 %v5223_v4  ;;  %v5275_v40 = vld [vmem:[%s6143_s3 + $0x1ec] ss:$24 sps:$4 sm:$0xff]   ;;  %v5274_v41 = vld [vmem:[%s6143_s3 + $0x210] ss:$24 sps:$4 sm:$0xff]   ;;  %v5281_v44 = vld [vmem:[%s6143_s3 + $0x1bc] ss:$24 sps:$4 sm:$0xff]  }
 0x1e2   : > { %1614 = vmatprep.subr.bf16.mxu1 %v5227_v5  ;;  %1570 = vmatpush1.bf16.msra.mxu0 %v5226_v6  ;;  %v5277_v43 = vld [vmem:[%s6143_s3 + $0x1e8] ss:$24 sps:$4 sm:$0xff]   ;;  %v5284_v46 = vld [vmem:[%s6143_s3 + $0x1b4] ss:$24 sps:$4 sm:$0xff]   ;;  %v5283_v47 = vld [vmem:[%s6143_s3 + $0x1b8] ss:$24 sps:$4 sm:$0xff]  }
 0x1e3   : > { %1571 = vmatprep.subr.bf16.mxu0 %v5230_v7  ;;  %1636 = vmatprep.mubr.bf16.mxu1 %v952_v38  ;;  %v5280_v45 = vld [vmem:[%s6143_s3 + $0x1e0] ss:$24 sps:$4 sm:$0xff]   ;;  %v5287_v48 = vld [vmem:[%s6143_s3 + $0x18c] ss:$24 sps:$4 sm:$0xff]   ;;  %v5286_v49 = vld [vmem:[%s6143_s3 + $0x1b0] ss:$24 sps:$4 sm:$0xff]  }
 0x1e4   : > { %1593 = vmatprep.mubr.bf16.mxu0 %v952_v38  ;;  %v5290_v50 = vld [vmem:[%s6143_s3 + $0x184] ss:$24 sps:$4 sm:$0xff]   ;;  %v5289_v51 = vld [vmem:[%s6143_s3 + $0x188] ss:$24 sps:$4 sm:$0xff]   ;;  %v6283_v52 = vld [vmem:[#allocation2 + $0x10] sm:$0xff]  ;;  %v6297_v58 = vshrl.u32 %v1051_v57, 7 }
 0x1e5   : > { %1615 = vmatpush1.bf16.msra.mxu1 %v5229_v8  ;;  %v6285_v53 = vld [vmem:[#allocation2 + $0x18] sm:$0xff]  ;;  %v6301_v60 = vld [vmem:[%s6168_s28] sm:$0x3f]  ;;  %s7192_s12 = sld [smem:[#allocation18_spill]]  ;;  %vm1743_vm1 = vcmask 64512   ;;  %vm1760_vm2 = vcmask 1043456  }
 0x1e6   : > { %1616 = vmatprep.subr.bf16.mxu1 %v5233_v9  ;;  %1572 = vmatpush1.bf16.msra.mxu0 %v5232_v10  ;;  %v5292_v54 = vld [vmem:[%s6143_s3 + $0x180] ss:$24 sps:$4 sm:$0xff]   ;;  %v6290_v55 = vpack.c.bf16 %v6285_v53, %v6283_v52  ;;  %v1061_v59 = vsub.s32 2, %v6297_v58  ;;  %v6304_v61 = vsub.s32 0, %v6297_v58  ;;  %v5331_v36 = vld [vmem:[%s6143_s3 + $0x224] ss:$24 sps:$4 sm:$0xff]  }
 0x1e7   : > { %1573 = vmatprep.subr.bf16.mxu0 %v5236_v11  ;;  %v5323_v33 = vld [vmem:[%s6143_s3 + $0x280] ss:$24 sps:$4 sm:$0xff]   ;;  %p4913_p5 = scmp.ne.s32.totalorder %s5999_s2, 1 }
 0x1e8   : > { %v1062_v62 = vrot.slane %v6301_v60, %v1061_v59  ;;  %v1054_v0 = vrot.slane %v6301_v60, %v6304_v61  ;;  %s7197_s21 = sld [smem:[#allocation29_spill]] (!%p4913_p5) }
 0x1e9   : > { %1617 = vmatpush1.bf16.msra.mxu1 %v5235_v12  ;;  %v5293_v12 = vld [vmem:[%s6143_s3 + $0x160] ss:$24 sps:$4 sm:$0xff]  }
 0x1ea   : > { %1618 = vmatprep.subr.bf16.mxu1 %v5239_v13  ;;  %1574 = vmatpush1.bf16.msra.mxu0 %v5238_v14  ;;  %v5295_v13 = vld [vmem:[%s6143_s3 + $0x164] ss:$24 sps:$4 sm:$0xff]   ;;  %v5298_v14 = vld [vmem:[%s6143_s3 + $0x134] ss:$24 sps:$4 sm:$0xff]  }
 0x1eb   : > { %1575 = vmatprep.subr.bf16.mxu0 %v5242_v15  ;;  %v5296_v15 = vld [vmem:[%s6143_s3 + $0x130] ss:$24 sps:$4 sm:$0xff]  }
 0x1ed   : > { %1619 = vmatpush1.bf16.msra.mxu1 %v5241_v16  ;;  %v5301_v16 = vld [vmem:[%s6143_s3 + $0x104] ss:$24 sps:$4 sm:$0xff]  }
 0x1ee   : > { %1620 = vmatprep.subr.bf16.mxu1 %v5245_v17  ;;  %1576 = vmatpush1.bf16.msra.mxu0 %v5244_v18  ;;  %v5299_v17 = vld [vmem:[%s6143_s3 + $0x100] ss:$24 sps:$4 sm:$0xff]   ;;  %v5304_v18 = vld [vmem:[%s6143_s3 + $0xd4] ss:$24 sps:$4 sm:$0xff]  }
 0x1ef   : > { %1577 = vmatprep.subr.bf16.mxu0 %v5248_v19  ;;  %v5302_v19 = vld [vmem:[%s6143_s3 + $0xd0] ss:$24 sps:$4 sm:$0xff]  }
 0x1f1   : > { %1621 = vmatpush2.bf16.msra.mxu1 %v5247_v20  ;;  %v5307_v20 = vld [vmem:[%s6143_s3 + $0xa4] ss:$24 sps:$4 sm:$0xff]  }
 0x1f2   : > { %1622 = vmatprep.subr.bf16.mxu1 %v5251_v21  ;;  %1578 = vmatpush2.bf16.msra.mxu0 %v5250_v22  ;;  %v5305_v21 = vld [vmem:[%s6143_s3 + $0xa0] ss:$24 sps:$4 sm:$0xff]   ;;  %v5310_v22 = vld [vmem:[%s6143_s3 + $0x74] ss:$24 sps:$4 sm:$0xff]  }
 0x1f3   : > { %1579 = vmatprep.subr.bf16.mxu0 %v5254_v23  ;;  %v5308_v23 = vld [vmem:[%s6143_s3 + $0x70] ss:$24 sps:$4 sm:$0xff]  }
 0x1f5   : > { %1623 = vmatpush2.bf16.msra.mxu1 %v5253_v24  ;;  %v5313_v24 = vld [vmem:[%s6143_s3 + $0x44] ss:$24 sps:$4 sm:$0xff]  }
 0x1f6   : > { %1624 = vmatprep.subr.bf16.mxu1 %v5257_v25  ;;  %1580 = vmatpush2.bf16.msra.mxu0 %v5256_v26  ;;  %v5311_v25 = vld [vmem:[%s6143_s3 + $0x40] ss:$24 sps:$4 sm:$0xff]   ;;  %v5316_v26 = vld [vmem:[%s6143_s3 + $0x14] ss:$24 sps:$4 sm:$0xff]  }
 0x1f7   : > { %1581 = vmatprep.subr.bf16.mxu0 %v5260_v27  ;;  %v5314_v27 = vld [vmem:[%s6143_s3 + $0x10] ss:$24 sps:$4 sm:$0xff]  }
 0x1f9   : > { %1625 = vmatpush2.bf16.msra.mxu1 %v5259_v28  ;;  %v5319_v28 = vld [vmem:[%s6143_s3 + $0x2e4] ss:$24 sps:$4 sm:$0xff]  }
 0x1fa   : > { %1626 = vmatprep.subr.bf16.mxu1 %v5263_v29  ;;  %1582 = vmatpush2.bf16.msra.mxu0 %v5262_v30  ;;  %v5317_v29 = vld [vmem:[%s6143_s3 + $0x2e0] ss:$24 sps:$4 sm:$0xff]   ;;  %v5322_v30 = vld [vmem:[%s6143_s3 + $0x2b4] ss:$24 sps:$4 sm:$0xff]  }
 0x1fb   : > { %1583 = vmatprep.subr.bf16.mxu0 %v5266_v32  ;;  %v5325_v32 = vld [vmem:[%s6143_s3 + $0x284] ss:$24 sps:$4 sm:$0xff]  }
 0x1fd   : > { %1627 = vmatpush2.bf16.msra.mxu1 %v5265_v31  ;;  %v5320_v31 = vld [vmem:[%s6143_s3 + $0x2b0] ss:$24 sps:$4 sm:$0xff]  }
 0x1fe   : > { %1628 = vmatprep.subr.bf16.mxu1 %v5269_v35  ;;  %1584 = vmatpush2.bf16.msra.mxu0 %v5268_v34  ;;  %v5328_v34 = vld [vmem:[%s6143_s3 + $0x254] ss:$24 sps:$4 sm:$0xff]   ;;  %v5326_v35 = vld [vmem:[%s6143_s3 + $0x250] ss:$24 sps:$4 sm:$0xff]  }
 0x1ff   : > { %1585 = vmatprep.subr.bf16.mxu0 %v5272_v37  ;;  %v5329_v37 = vld [vmem:[%s6143_s3 + $0x220] ss:$24 sps:$4 sm:$0xff]  }
 0x201   : > { %1629 = vmatpush2.bf16.msra.mxu1 %v5271_v39  ;;  %v5332_v39 = vld [vmem:[%s6143_s3 + $0x1f0] ss:$24 sps:$4 sm:$0xff]  }
 0x202   : > { %1630 = vmatprep.subr.bf16.mxu1 %v5275_v40  ;;  %1586 = vmatpush2.bf16.msra.mxu0 %v5274_v41  ;;  %v5337_v40 = vld [vmem:[%s6143_s3 + $0x1c4] ss:$24 sps:$4 sm:$0xff]   ;;  %v5335_v41 = vld [vmem:[%s6143_s3 + $0x1c0] ss:$24 sps:$4 sm:$0xff]  }
 0x203   : > { %1587 = vmatprep.subr.bf16.mxu0 %v5278_v42  ;;  %v5340_v42 = vld [vmem:[%s6143_s3 + $0x194] ss:$24 sps:$4 sm:$0xff]  }
 0x205   : > { %1631 = vmatpush2.bf16.msra.mxu1 %v5277_v43  ;;  %v5338_v43 = vld [vmem:[%s6143_s3 + $0x190] ss:$24 sps:$4 sm:$0xff]  }
 0x206   : > { %1632 = vmatprep.subr.bf16.mxu1 %v5281_v44  ;;  %1588 = vmatpush2.bf16.msra.mxu0 %v5280_v45  ;;  %v1690_v44 = vld [vmem:[%s7192_s12] sm:$0x1] }
 0x207   : > { %1589 = vmatprep.subr.bf16.mxu0 %v5284_v46  ;;  %v4746_v45 = vadd.f32 -1.0, %v1690_v44 }
 0x209   : > { %1633 = vmatpush2.bf16.msra.mxu1 %v5283_v47  ;;  %v1692_v46 = vmul.f32 1e+09, %v4746_v45 }
 0x20a   : > { %1634 = vmatprep.subr.bf16.mxu1 %v5287_v48  ;;  %1590 = vmatpush2.bf16.msra.mxu0 %v5286_v49 }
 0x20b   : > { %1591 = vmatprep.subr.bf16.mxu0 %v5290_v50  ;;  %v6361_v48 = vrot.slane %v1692_v46, %v6304_v61 }
 0x20d   : > { %1635 = vmatpush2.bf16.msra.mxu1 %v5289_v51 }
 0x20e   : > { %1592 = vmatpush2.bf16.msra.mxu0 %v5292_v54  ;;  %5077 = vmatprep.subr.bf16.mxu1 %v5872_v56 }
 0x20f   : > { %1647 = vmatprep.subr.bf16.mxu0 %v5295_v13 }
 0x210   : > { %1637 = vmatmul.mubr.bf16.vlgmr.msra.gmra.mxu1 %v6290_v55 }
 0x211   : > { %1594 = vmatmul.mubr.bf16.vlgmr.msra.gmra.mxu0 %v6290_v55  ;;  %5079 = vmatprep.mubr.msk.bf16.mxu1 %vm5873_vm0, %v5872_v56 }
 0x212   : > { %1679 = vmatprep.mubr.bf16.mxu0 %v952_v38  ;;  %1648 = vmatpush1.bf16.msra.mxu0 %v5293_v12  ;;  %v5334_v38 = vld [vmem:[%s6143_s3 + $0x1f4] ss:$24 sps:$4 sm:$0xff]  }
 0x213   : > { %1649 = vmatprep.subr.bf16.mxu0 %v5298_v14 }
 0x216   : > { %1650 = vmatpush1.bf16.msra.mxu0 %v5296_v15  ;;  %v1073_v15 = vsub.s32 5, %v6297_v58 }
 0x217   : > { %1651 = vmatprep.subr.bf16.mxu0 %v5301_v16 }
 0x21a   : > { %1652 = vmatpush1.bf16.msra.mxu0 %v5299_v17  ;;  %v1074_v17 = vrot.slane %v6301_v60, %v1073_v15 }
 0x21b   : > { %1653 = vmatprep.subr.bf16.mxu0 %v5304_v18 }
 0x21e   : > { %1654 = vmatpush1.bf16.msra.mxu0 %v5302_v19 }
 0x21f   : > { %1655 = vmatprep.subr.bf16.mxu0 %v5307_v20 }
 0x222   : > { %1656 = vmatpush1.bf16.msra.mxu0 %v5305_v21 }
 0x223   : > { %1657 = vmatprep.subr.bf16.mxu0 %v5310_v22 }
 0x226   : > { %1658 = vmatpush1.bf16.msra.mxu0 %v5308_v23 }
 0x227   : > { %1659 = vmatprep.subr.bf16.mxu0 %v5313_v24 }
 0x22a   : > { %1660 = vmatpush1.bf16.msra.mxu0 %v5311_v25 }
 0x22b   : > { %1661 = vmatprep.subr.bf16.mxu0 %v5316_v26 }
 0x22e   : > { %1662 = vmatpush1.bf16.msra.mxu0 %v5314_v27  ;;  %v1065_v27 = vsub.s32 3, %v6297_v58 }
 0x22f   : > { %1663 = vmatprep.subr.bf16.mxu0 %v5319_v28 }
 0x230   : > { %v6382_v28 = vrot.slane %v6301_v60, %v1065_v27 }
 0x232   : > { %1664 = vmatpush2.bf16.msra.mxu0 %v5317_v29  ;;  %v6385_v29 = vsub.s32 1, %v6297_v58 }
 0x233   : > { %1665 = vmatprep.subr.bf16.mxu0 %v5322_v30 }
 0x236   : > { %1666 = vmatpush2.bf16.msra.mxu0 %v5320_v31 }
 0x237   : > { %1667 = vmatprep.subr.bf16.mxu0 %v5325_v32 }
 0x23a   : > { %1668 = vmatpush2.bf16.msra.mxu0 %v5323_v33  ;;  %v6391_v33 = vrot.slane %v6301_v60, %v6385_v29 }
 0x23b   : > { %1669 = vmatprep.subr.bf16.mxu0 %v5328_v34 }
 0x23e   : > { %1670 = vmatpush2.bf16.msra.mxu0 %v5326_v35 }
 0x23f   : > { %1671 = vmatprep.subr.bf16.mxu0 %v5331_v36 }
 0x242   : > { %1672 = vmatpush2.bf16.msra.mxu0 %v5329_v37 }
 0x243   : > { %1673 = vmatprep.subr.bf16.mxu0 %v5334_v38 }
 0x246   : > { %1674 = vmatpush2.bf16.msra.mxu0 %v5332_v39 }
 0x247   : > { %1675 = vmatprep.subr.bf16.mxu0 %v5337_v40 }
 0x24a   : > { %1676 = vmatpush2.bf16.msra.mxu0 %v5335_v41 }
 0x24b   : > { %1677 = vmatprep.subr.bf16.mxu0 %v5340_v42 }
 0x24e   : > { %1678 = vmatpush2.bf16.msra.mxu0 %v5338_v43 }
 0x251   : > { %1680 = vmatmul.mubr.bf16.vlgmr.msra.gmra.mxu0 %v6290_v55 }
 0x2d0   : > { %v1638_v63 = vpop.f32.mrf.mxu1 }
 0x2d1   : > { %v1639_v1 = vadd.f32 %v1638_v63, %v1062_v62  ;;  %v1595_v2 = vpop.f32.mrf.mxu0  ;;  %v1069_v63 = vsub.s32 4, %v6297_v58 }
 0x2d2   : > { %v6311_v3 = vpop.f32.mrf.mxu1  ;;  %v1596_v5 = vadd.f32 %v1595_v2, %v1054_v0 }
 0x2d3   : > { %v1694_v4 = vpack.c.bf16 %v1639_v1, %v1639_v1  ;;  %v6313_v6 = vpop.f32.mrf.mxu0  ;;  %v1641_v31 = vadd.f32 %v6311_v3, %v6382_v28 }
 0x2d4   : > { %v1642_v7 = vpop.f32.mrf.mxu1  ;;  %v1693_v11 = vpack.c.bf16 %v1596_v5, %v1596_v5  ;;  %v1598_v37 = vadd.f32 %v6313_v6, %v6391_v33 }
 0x2d5   : > { %v6315_v8 = vadd.f32 %v1642_v7, %v1062_v62  ;;  %5078 = vmatpush3.bf16.xpose.msra.mxu1 %v1694_v4  ;;  %v1599_v9 = vpop.f32.mrf.mxu0  ;;  %v1806_v35 = vpack.c.bf16 %v1641_v31, %v1641_v31 }
 0x2d6   : > { %5083 = vmatprep.subr.bf16.mxu1 %v5872_v56  ;;  %v6318_v10 = vadd.f32 %v1599_v9, %v1054_v0  ;;  %v6358_v47 = vpop.f32.mrf.mxu1  ;;  %v1070_v0 = vrot.slane %v6301_v60, %v1069_v63  ;;  %v1805_v38 = vpack.c.bf16 %v1598_v37, %v1598_v37 }
 0x2d7   : > { %v6367_v1 = vpop.f32.mrf.mxu0 }
 0x2dc   : > { %5080 = vmatmul.mubr.bf16.vlgmr.msra.gmra.mxu1 %v1693_v11 }
 0x2dd   : > { %5085 = vmatprep.mubr.msk.bf16.mxu1 %vm5873_vm0, %v5872_v56 }
 0x311   : > { %v1681_v2 = vpop.f32.mrf.mxu0 }
 0x312   : > { %v1682_v4 = vadd.f32 %v1681_v2, %v1070_v0 }
 0x313   : > { %v1683_v16 = vpop.f32.mrf.mxu0 }
 0x314   : > { %v1756_v5 = vpack.c.bf16 %v1682_v4, %v1682_v4  ;;  %v1684_v36 = vadd.f32 %v1683_v16, %v1074_v17 }
 0x315   : > { %v1685_v18 = vpop.f32.mrf.mxu0 }
 0x316   : > { %v1762_v7 = vsel %vm1760_vm2, %v1756_v5, 0  ;;  %v1686_v19 = vadd.f32 %v1685_v18, %v1070_v0  ;;  %v1861_v3 = vpack.c.bf16 %v1684_v36, %v1684_v36  ;;  %v1913_v5 = vpack.c.bf16 %v6318_v10, %v6318_v10 }
 0x317   : > { %5084 = vmatpush3.bf16.msra.mxu1 %v1762_v7  ;;  %v1687_v20 = vpop.f32.mrf.mxu0 }
 0x318   : > { %5089 = vmatprep.subr.bf16.mxu1 %v5872_v56  ;;  %v1975_v21 = vpack.c.bf16 %v1686_v19, %v1686_v19  ;;  %v1688_v22 = vadd.f32 %v1687_v20, %v1074_v17  ;;  %v1866_v39 = vsel %vm1760_vm2, %v1861_v3, 0  ;;  %v1602_v3 = vadd.f32 %v6367_v1, %v6391_v33 }
 0x31a   : > { %v1980_v23 = vsel %vm1760_vm2, %v1975_v21, 0  ;;  %v2079_v24 = vpack.c.bf16 %v1688_v22, %v1688_v22 }
 0x31c   : > { %v6376_v25 = vsel %vm1760_vm2, %v2079_v24, 0 }
 0x39c   : > { %v1729_v49 = vpop.f32.mrf.mxu1 }
 0x39d   : > { %v1735_v50 = vmul.f32 0.088388346, %v1729_v49 }
 0x39e   : > { %v5081_v51 = vpop.f32.mrf.mxu1 }
 0x39f   : > { %v1742_v54 = vadd.f32 %v6361_v48, %v1735_v50 }
 0x3a0   : > { %v1732_v57 = vpop.f32.mrf.mxu1 }
 0x3a1   : > { %v1744_v55 = vsel %vm1743_vm1, %v1742_v54, -inf }
 0x3a2   : > { %1745 = vmax.xlane.f32.xlu0 %v1744_v55  ;;  %v5082_v62 = vpop.f32.mrf.mxu1 }
 0x42b   : > { %v1746_v9 = vpop.xlane.xlu0 %1745 }
 0x42c   : > { %v1747_v11 = vsub.f32 %v1742_v54, %v1746_v9 }
 0x42e   : > { %v1748_v12 = vmul.f32 1.442695, %v1747_v11 }
 0x430   : > { %5581 = vpow2.f32 %v1748_v12 }
 0x43d   : > { %v5582_v13 = vpop.eup %5581 }
 0x43e   : > { %v1750_v14 = vsel %vm1743_vm1, %v5582_v13, 0.0 }
 0x43f   : > { %1751 = vadd.xlane.f32.xlu0 %v1750_v14 }
 0x4c8   : > { %v1752_v26 = vpop.xlane.xlu0 %1751 }
 0x4c9   : > { %5583 = vrcp.f32 %v1752_v26 }
 0x4d6   : > { %v5584_v30 = vpop.eup %5583 }
 0x4d7   : > { %v1754_v32 = vmul.f32 %v5584_v30, %v5582_v13 }
 0x4d9   : > { %v1755_v34 = vpack.c.bf16 %v1754_v32, %v1754_v32 }
 0x4db   : > { %5086 = vmatmul.mubr.msk.bf16.vlgmr.msra.gmra.mxu1 %vm1743_vm1, %v1755_v34  ;;  %v1645_v34 = vadd.f32 %v6358_v47, %v6382_v28 }
 0x4dc   : > { %5090 = vmatpush3.bf16.xpose.msra.mxu1 %v1806_v35  ;;  %5091 = vmatprep.mubr.msk.bf16.mxu1 %vm5873_vm0, %v5872_v56 }
 0x4dd   : > { %5095 = vmatprep.subr.bf16.mxu1 %v5872_v56  ;;  %v2024_v37 = vpack.c.bf16 %v1645_v34, %v1645_v34 }
 0x4e3   : > { %5092 = vmatmul.mubr.bf16.vlgmr.msra.gmra.mxu1 %v1805_v38  ;;  %v2023_v38 = vpack.c.bf16 %v1602_v3, %v1602_v3 }
 0x4e4   : > { %5096 = vmatpush3.bf16.msra.mxu1 %v1866_v39  ;;  %5097 = vmatprep.mubr.msk.bf16.mxu1 %vm5873_vm0, %v5872_v56 }
 0x4e5   : > { %5101 = vmatprep.subr.bf16.mxu1 %v5872_v56 }
 0x59b   : > { %v6403_v60 = vpop.f32.mrf.mxu1 }
 0x59d   : > { %v5087_v40 = vpop.f32.mrf.mxu1 }
 0x59f   : > { %v1801_v41 = vpop.f32.mrf.mxu1 }
 0x5a1   : > { %v5088_v42 = vpop.f32.mrf.mxu1 }
 0x5a3   : > { %v1841_v43 = vpop.f32.mrf.mxu1 }
 0x5a4   : > { %v1847_v6 = vmul.f32 0.088388346, %v1841_v43 }
 0x5a5   : > { %v5093_v44 = vpop.f32.mrf.mxu1 }
 0x5a6   : > { %v1848_v45 = vadd.f32 %v1847_v6, %v6361_v48  ;;  %v1914_v48 = vpack.c.bf16 %v6315_v8, %v6315_v8  ;;  %v4749_v8 = vld [vmem:[%s7192_s12 + $0x1] sm:$0x1] }
 0x5a7   : > { %v1844_v46 = vpop.f32.mrf.mxu1  ;;  %v4750_v7 = vadd.f32 -1.0, %v4749_v8  ;;  %v5361_v8 = vld [vmem:[%s6161_s4 + $0x14] ss:$8 sps:$4 sm:$0xff]  }
 0x5a8   : > { %v1849_v49 = vsel %vm1743_vm1, %v1848_v45, -inf }
 0x5a9   : > { %1850 = vmax.xlane.f32.xlu1 %v1849_v49  ;;  %v5094_v50 = vpop.f32.mrf.mxu1  ;;  %v1912_v12 = vmul.f32 1e+09, %v4750_v7  ;;  %v5359_v7 = vld [vmem:[%s6161_s4 + $0x10] ss:$8 sps:$4 sm:$0xff]  }
 0x5aa   : > { %v5341_v50 = vld [vmem:[%s6161_s4 + $0x70] ss:$8 sps:$4 sm:$0xff]  }
 0x5ab   : > { %v1960_v10 = vrot.slane %v1912_v12, %v6304_v61  ;;  %v5362_v12 = vld [vmem:[%s6161_s4] ss:$8 sps:$4 sm:$0xff]  }
 0x632   : > { %v1851_v51 = vpop.xlane.xlu1 %1850 }
 0x633   : > { %v1852_v54 = vsub.f32 %v1848_v45, %v1851_v51  ;;  %v5343_v51 = vld [vmem:[%s6161_s4 + $0x74] ss:$8 sps:$4 sm:$0xff]  }
 0x634   : > { %2337 = vmatprep.subr.bf16.mxu0 %v5343_v51  ;;  %v5622_v51 = vld [vmem:[#allocation2 + $0x8] sm:$0xff] }
 0x635   : > { %v1853_v57 = vmul.f32 1.442695, %v1852_v54  ;;  %v5346_v54 = vld [vmem:[%s6161_s4 + $0x64] ss:$8 sps:$4 sm:$0xff]   ;;  %2338 = vmatpush1.bf16.msra.mxu0 %v5341_v50 }
 0x636   : > { %2339 = vmatprep.subr.bf16.mxu0 %v5346_v54 }
 0x637   : > { %5585 = vpow2.f32 %v1853_v57  ;;  %v5344_v57 = vld [vmem:[%s6161_s4 + $0x60] ss:$8 sps:$4 sm:$0xff]  }
 0x639   : > { %2340 = vmatpush1.bf16.msra.mxu0 %v5344_v57  ;;  %v5389_v57 = vld [vmem:[%s6150_s23 + $0xe0] ss:$16 sps:$4 sm:$0xff]  }
 0x644   : > { %v5586_v55 = vpop.eup %5585 }
 0x645   : > { %v1855_v62 = vsel %vm1743_vm1, %v5586_v55, 0.0 }
 0x646   : > { %1856 = vadd.xlane.f32.xlu1 %v1855_v62  ;;  %v5347_v62 = vld [vmem:[%s6161_s4 + $0x50] ss:$8 sps:$4 sm:$0xff]  }
 0x6cf   : > { %v1857_v63 = vpop.xlane.xlu1 %1856 }
 0x6d0   : > { %5587 = vrcp.f32 %v1857_v63  ;;  %v5352_v63 = vld [vmem:[%s6161_s4 + $0x44] ss:$8 sps:$4 sm:$0xff]  }
 0x6dd   : > { %v5588_v0 = vpop.eup %5587 }
 0x6de   : > { %v1859_v2 = vmul.f32 %v5588_v0, %v5586_v55  ;;  %v5349_v55 = vld [vmem:[%s6161_s4 + $0x54] ss:$8 sps:$4 sm:$0xff]   ;;  %v5350_v0 = vld [vmem:[%s6161_s4 + $0x40] ss:$8 sps:$4 sm:$0xff]  }
 0x6df   : > { %2341 = vmatprep.subr.bf16.mxu0 %v5349_v55  ;;  %v5391_v55 = vld [vmem:[%s6150_s23 + $0xe4] ss:$16 sps:$4 sm:$0xff]  }
 0x6e0   : > { %v1860_v4 = vpack.c.bf16 %v1859_v2, %v1859_v2  ;;  %2342 = vmatpush1.bf16.msra.mxu0 %v5347_v62  ;;  %v5355_v2 = vld [vmem:[%s6161_s4 + $0x34] ss:$8 sps:$4 sm:$0xff]   ;;  %v5392_v62 = vld [vmem:[%s6150_s23 + $0xe8] ss:$16 sps:$4 sm:$0xff]  }
 0x6e1   : > { %2343 = vmatprep.subr.bf16.mxu0 %v5352_v63  ;;  %v5394_v63 = vld [vmem:[%s6150_s23 + $0xec] ss:$16 sps:$4 sm:$0xff]  }
 0x6e2   : > { %5098 = vmatmul.mubr.msk.bf16.vlgmr.msra.gmra.mxu1 %vm1743_vm1, %v1860_v4  ;;  %v5353_v4 = vld [vmem:[%s6161_s4 + $0x30] ss:$8 sps:$4 sm:$0xff]  }
 0x6e3   : > { %5102 = vmatpush3.bf16.xpose.msra.mxu1 %v1914_v48  ;;  %5103 = vmatprep.mubr.msk.bf16.mxu1 %vm5873_vm0, %v5872_v56  ;;  %v5358_v48 = vld [vmem:[%s6161_s4 + $0x24] ss:$8 sps:$4 sm:$0xff]  }
 0x6e4   : > { %5107 = vmatprep.subr.bf16.mxu1 %v5872_v56  ;;  %2344 = vmatpush1.bf16.msra.mxu0 %v5350_v0  ;;  %v5397_v0 = vld [vmem:[%s6150_s23 + $0xc4] ss:$16 sps:$4 sm:$0xff]  }
 0x6e5   : > { %2345 = vmatprep.subr.bf16.mxu0 %v5355_v2  ;;  %v5395_v2 = vld [vmem:[%s6150_s23 + $0xc0] ss:$16 sps:$4 sm:$0xff]  }
 0x6e8   : > { %2346 = vmatpush1.bf16.msra.mxu0 %v5353_v4  ;;  %v5398_v4 = vld [vmem:[%s6150_s23 + $0xc8] ss:$16 sps:$4 sm:$0xff]  }
 0x6e9   : > { %2347 = vmatprep.subr.bf16.mxu0 %v5358_v48  ;;  %v5403_v48 = vld [vmem:[%s6150_s23 + $0xa4] ss:$16 sps:$4 sm:$0xff]  }
 0x6ea   : > { %5104 = vmatmul.mubr.bf16.vlgmr.msra.gmra.mxu1 %v1913_v5  ;;  %v5356_v5 = vld [vmem:[%s6161_s4 + $0x20] ss:$8 sps:$4 sm:$0xff]  }
 0x6eb   : > { %5108 = vmatpush3.bf16.msra.mxu1 %v1980_v23  ;;  %5109 = vmatprep.mubr.msk.bf16.mxu1 %vm5873_vm0, %v5872_v56 }
 0x6ec   : > { %5113 = vmatprep.subr.bf16.mxu1 %v5872_v56  ;;  %2348 = vmatpush1.bf16.msra.mxu0 %v5356_v5  ;;  %v5406_v5 = vld [vmem:[%s6150_s23 + $0xac] ss:$16 sps:$4 sm:$0xff]  }
 0x6ed   : > { %2349 = vmatprep.subr.bf16.mxu0 %v5361_v8  ;;  %v5401_v8 = vld [vmem:[%s6150_s23 + $0xa0] ss:$16 sps:$4 sm:$0xff]  }
 0x6f0   : > { %2350 = vmatpush1.bf16.msra.mxu0 %v5359_v7  ;;  %v5404_v7 = vld [vmem:[%s6150_s23 + $0xa8] ss:$16 sps:$4 sm:$0xff]  }
 0x7a2   : > { %v6422_v9 = vpop.f32.mrf.mxu1 }
 0x7a4   : > { %v5099_v11 = vpop.f32.mrf.mxu1 }
 0x7a5   : > { %v5364_v11 = vld [vmem:[%s6161_s4 + $0x4] ss:$8 sps:$4 sm:$0xff]  }
 0x7a6   : > { %v1905_v13 = vpop.f32.mrf.mxu1  ;;  %2351 = vmatprep.subr.bf16.mxu0 %v5364_v11  ;;  %v5409_v11 = vld [vmem:[%s6150_s23 + $0x84] ss:$16 sps:$4 sm:$0xff]  }
 0x7a7   : > { %v5367_v13 = vld [vmem:[%s6161_s4 + $0xf4] ss:$8 sps:$4 sm:$0xff]   ;;  %2352 = vmatpush1.bf16.msra.mxu0 %v5362_v12 }
 0x7a8   : > { %v5100_v14 = vpop.f32.mrf.mxu1  ;;  %2353 = vmatprep.subr.bf16.mxu0 %v5367_v13  ;;  %v5412_v12 = vld [vmem:[%s6150_s23 + $0x8c] ss:$16 sps:$4 sm:$0xff]   ;;  %v5407_v13 = vld [vmem:[%s6150_s23 + $0x80] ss:$16 sps:$4 sm:$0xff]  }
 0x7a9   : > { %v5365_v14 = vld [vmem:[%s6161_s4 + $0xf0] ss:$8 sps:$4 sm:$0xff]  }
 0x7aa   : > { %v1949_v15 = vpop.f32.mrf.mxu1 }
 0x7ab   : > { %v1955_v16 = vmul.f32 0.088388346, %v1949_v15  ;;  %2354 = vmatpush2.bf16.msra.mxu0 %v5365_v14  ;;  %v5368_v15 = vld [vmem:[%s6161_s4 + $0xe0] ss:$8 sps:$4 sm:$0xff]  }
 0x7ac   : > { %v5105_v17 = vpop.f32.mrf.mxu1  ;;  %v5410_v14 = vld [vmem:[%s6150_s23 + $0x88] ss:$16 sps:$4 sm:$0xff]  }
 0x7ad   : > { %v1962_v18 = vadd.f32 %v1960_v10, %v1955_v16  ;;  %v5373_v16 = vld [vmem:[%s6161_s4 + $0xd4] ss:$8 sps:$4 sm:$0xff]   ;;  %v5371_v17 = vld [vmem:[%s6161_s4 + $0xd0] ss:$8 sps:$4 sm:$0xff]  }
 0x7ae   : > { %v1952_v19 = vpop.f32.mrf.mxu1 }
 0x7af   : > { %v1963_v20 = vsel %vm1743_vm1, %v1962_v18, -inf  ;;  %v5374_v19 = vld [vmem:[%s6161_s4 + $0xc0] ss:$8 sps:$4 sm:$0xff]  }
 0x7b0   : > { %1964 = vmax.xlane.f32.xlu0 %v1963_v20  ;;  %v5106_v21 = vpop.f32.mrf.mxu1  ;;  %v5379_v20 = vld [vmem:[%s6161_s4 + $0xb4] ss:$8 sps:$4 sm:$0xff]  }
 0x7b1   : > { %v5377_v21 = vld [vmem:[%s6161_s4 + $0xb0] ss:$8 sps:$4 sm:$0xff]  }
 0x839   : > { %v1965_v22 = vpop.xlane.xlu0 %1964 }
 0x83a   : > { %v1966_v23 = vsub.f32 %v1962_v18, %v1965_v22  ;;  %v5376_v18 = vld [vmem:[%s6161_s4 + $0xc4] ss:$8 sps:$4 sm:$0xff]  }
 0x83b   : > { %v5382_v22 = vld [vmem:[%s6161_s4 + $0xa4] ss:$8 sps:$4 sm:$0xff]  }
 0x83c   : > { %v1967_v24 = vmul.f32 1.442695, %v1966_v23  ;;  %v5380_v23 = vld [vmem:[%s6161_s4 + $0xa0] ss:$8 sps:$4 sm:$0xff]  }
 0x83e   : > { %5589 = vpow2.f32 %v1967_v24  ;;  %v5385_v24 = vld [vmem:[%s6161_s4 + $0x94] ss:$8 sps:$4 sm:$0xff]  }
 0x84b   : > { %v5590_v26 = vpop.eup %5589 }
 0x84c   : > { %v1969_v30 = vsel %vm1743_vm1, %v5590_v26, 0.0 }
 0x84d   : > { %1970 = vadd.xlane.f32.xlu1 %v1969_v30 }
 0x8d6   : > { %v1971_v31 = vpop.xlane.xlu1 %1970 }
 0x8d7   : > { %5591 = vrcp.f32 %v1971_v31 }
 0x8e4   : > { %v5592_v32 = vpop.eup %5591 }
 0x8e5   : > { %v1973_v35 = vmul.f32 %v5592_v32, %v5590_v26  ;;  %v5383_v26 = vld [vmem:[%s6161_s4 + $0x90] ss:$8 sps:$4 sm:$0xff]  }
 0x8e7   : > { %v1974_v36 = vpack.c.bf16 %v1973_v35, %v1973_v35  ;;  %v5388_v35 = vld [vmem:[%s6161_s4 + $0x84] ss:$8 sps:$4 sm:$0xff]  }
 0x8e9   : > { %5110 = vmatmul.mubr.msk.bf16.vlgmr.msra.gmra.mxu1 %vm1743_vm1, %v1974_v36  ;;  %v5386_v36 = vld [vmem:[%s6161_s4 + $0x80] ss:$8 sps:$4 sm:$0xff]  }
 0x8ea   : > { %5114 = vmatpush3.bf16.xpose.msra.mxu1 %v2024_v37  ;;  %5115 = vmatprep.mubr.msk.bf16.mxu1 %vm5873_vm0, %v5872_v56 }
 0x8eb   : > { %5119 = vmatprep.subr.bf16.mxu1 %v5872_v56 }
 0x8f1   : > { %5116 = vmatmul.mubr.bf16.vlgmr.msra.gmra.mxu1 %v2023_v38 }
 0x8f2   : > { %5120 = vmatpush3.bf16.msra.mxu1 %v6376_v25  ;;  %5121 = vmatprep.mubr.msk.bf16.mxu1 %vm5873_vm0, %v5872_v56 }
 0x8f3   : > { %2857 = vmatprep.subr.bf16.mxu1 %v5391_v55  ;;  %v5458_v55 = vld [vmem:[%s6150_s23 + $0x188] ss:$16 sps:$4 sm:$0xff]  }
 0x9a9   : > { %v6438_v47 = vpop.f32.mrf.mxu1 }
 0x9aa   : > { %v2131_v38 = vpack.c.bf16 %v6438_v47, %v6403_v60 }
 0x9ab   : > { %v5111_v28 = vpop.f32.mrf.mxu1 }
 0x9ad   : > { %v2019_v39 = vpop.f32.mrf.mxu1 }
 0x9af   : > { %v5112_v40 = vpop.f32.mrf.mxu1 }
 0x9b1   : > { %v2059_v41 = vpop.f32.mrf.mxu1 }
 0x9b2   : > { %v2065_v42 = vmul.f32 0.088388346, %v2059_v41  ;;  %v2165_v41 = vld [vmem:[%s7193_s19] sm:$0x3]  ;;  %s7201_s19 = sld [smem:[#allocation32_spill]] (!%p4913_p5) }
 0x9b3   : > { %v5117_v1 = vpop.f32.mrf.mxu1 }
 0x9b4   : > { %v2066_v33 = vadd.f32 %v2065_v42, %v1960_v10  ;;  %v5370_v10 = vld [vmem:[%s6161_s4 + $0xe4] ss:$8 sps:$4 sm:$0xff]   ;;  %v2170_v42 = vrot.slane %v2165_v41, %v6304_v61  ;;  %v2174_v1 = vrot.slane %v2165_v41, %v6385_v29 }
 0x9b5   : > { %v2062_v43 = vpop.f32.mrf.mxu1  ;;  %2355 = vmatprep.subr.bf16.mxu0 %v5370_v10  ;;  %v5415_v10 = vld [vmem:[%s6150_s23 + $0x64] ss:$16 sps:$4 sm:$0xff]  }
 0x9b6   : > { %v2067_v6 = vsel %vm1743_vm1, %v2066_v33, -inf  ;;  %2356 = vmatpush2.bf16.msra.mxu0 %v5368_v15  ;;  %v5418_v15 = vld [vmem:[%s6150_s23 + $0x6c] ss:$16 sps:$4 sm:$0xff]  }
 0x9b7   : > { %2068 = vmax.xlane.f32.xlu0 %v2067_v6  ;;  %v5118_v25 = vpop.f32.mrf.mxu1  ;;  %2357 = vmatprep.subr.bf16.mxu0 %v5373_v16  ;;  %v5413_v16 = vld [vmem:[%s6150_s23 + $0x60] ss:$16 sps:$4 sm:$0xff]  }
 0x9b8   : > { %v5621_v25 = vld [vmem:[#allocation2] sm:$0xff] }
 0x9ba   : > { %2358 = vmatpush2.bf16.msra.mxu0 %v5371_v17  ;;  %v5416_v17 = vld [vmem:[%s6150_s23 + $0x68] ss:$16 sps:$4 sm:$0xff]  }
 0x9bb   : > { %2359 = vmatprep.subr.bf16.mxu0 %v5376_v18  ;;  %v5421_v18 = vld [vmem:[%s6150_s23 + $0x44] ss:$16 sps:$4 sm:$0xff]  }
 0x9be   : > { %2360 = vmatpush2.bf16.msra.mxu0 %v5374_v19  ;;  %v5424_v19 = vld [vmem:[%s6150_s23 + $0x4c] ss:$16 sps:$4 sm:$0xff]  }
 0x9bf   : > { %2361 = vmatprep.subr.bf16.mxu0 %v5379_v20  ;;  %v5419_v20 = vld [vmem:[%s6150_s23 + $0x40] ss:$16 sps:$4 sm:$0xff]  }
 0x9c2   : > { %2362 = vmatpush2.bf16.msra.mxu0 %v5377_v21  ;;  %v5422_v21 = vld [vmem:[%s6150_s23 + $0x48] ss:$16 sps:$4 sm:$0xff]  }
 0x9c3   : > { %2363 = vmatprep.subr.bf16.mxu0 %v5382_v22  ;;  %v5427_v22 = vld [vmem:[%s6150_s23 + $0x24] ss:$16 sps:$4 sm:$0xff]  }
 0x9c6   : > { %2364 = vmatpush2.bf16.msra.mxu0 %v5380_v23  ;;  %v5430_v23 = vld [vmem:[%s6150_s23 + $0x2c] ss:$16 sps:$4 sm:$0xff]  }
 0x9c7   : > { %2365 = vmatprep.subr.bf16.mxu0 %v5385_v24  ;;  %v5425_v24 = vld [vmem:[%s6150_s23 + $0x20] ss:$16 sps:$4 sm:$0xff]  }
 0x9ca   : > { %2366 = vmatpush2.bf16.msra.mxu0 %v5383_v26  ;;  %v5428_v26 = vld [vmem:[%s6150_s23 + $0x28] ss:$16 sps:$4 sm:$0xff]  }
 0x9cb   : > { %2367 = vmatprep.subr.bf16.mxu0 %v5388_v35  ;;  %v5439_v35 = vld [vmem:[%s6150_s23 + $0x1e4] ss:$16 sps:$4 sm:$0xff]  }
 0x9ce   : > { %2368 = vmatpush2.bf16.msra.mxu0 %v5386_v36  ;;  %v5442_v36 = vld [vmem:[%s6150_s23 + $0x1ec] ss:$16 sps:$4 sm:$0xff]  }
 0x9cf   : > { %2900 = vmatprep.subr.bf16.mxu0 %v5394_v63  ;;  %v5463_v63 = vld [vmem:[%s6150_s23 + $0x164] ss:$16 sps:$4 sm:$0xff]  }
 0xa40   : > { %v2069_v56 = vpop.xlane.xlu0 %2068 }
 0xa41   : > { %v2070_v44 = vsub.f32 %v2066_v33, %v2069_v56 }
 0xa43   : > { %v2071_v45 = vmul.f32 1.442695, %v2070_v44 }
 0xa45   : > { %5593 = vpow2.f32 %v2071_v45 }
 0xa52   : > { %v6441_v46 = vpop.eup %5593 }
 0xa53   : > { %v2073_v49 = vsel %vm1743_vm1, %v6441_v46, 0.0 }
 0xa54   : > { %2074 = vadd.xlane.f32.xlu1 %v2073_v49 }
 0xadd   : > { %v2075_v30 = vpop.xlane.xlu1 %2074 }
 0xade   : > { %5595 = vrcp.f32 %v2075_v30  ;;  %v5433_v30 = vld [vmem:[%s6150_s23 + $0x4] ss:$16 sps:$4 sm:$0xff]  }
 0xaeb   : > { %v5596_v31 = vpop.eup %5595 }
 0xaec   : > { %v2077_v32 = vmul.f32 %v5596_v31, %v6441_v46  ;;  %v5436_v31 = vld [vmem:[%s6150_s23 + $0xc] ss:$16 sps:$4 sm:$0xff]  }
 0xaee   : > { %v2078_v34 = vpack.c.bf16 %v2077_v32, %v2077_v32  ;;  %v5431_v32 = vld [vmem:[%s6150_s23] ss:$16 sps:$4 sm:$0xff]  }
 0xaf0   : > { %5122 = vmatmul.mubr.msk.bf16.vlgmr.msra.gmra.mxu1 %vm1743_vm1, %v2078_v34  ;;  %v5434_v34 = vld [vmem:[%s6150_s23 + $0x8] ss:$16 sps:$4 sm:$0xff]  }
 0xaf1   : > { %2858 = vmatpush1.bf16.msra.mxu1 %v5389_v57  ;;  %v5455_v57 = vld [vmem:[%s6150_s23 + $0x180] ss:$16 sps:$4 sm:$0xff]  }
 0xaf2   : > { %2859 = vmatprep.subr.bf16.mxu1 %v5397_v0  ;;  %v5466_v0 = vld [vmem:[%s6150_s23 + $0x16c] ss:$16 sps:$4 sm:$0xff]  }
 0xaf5   : > { %2860 = vmatpush1.bf16.msra.mxu1 %v5395_v2  ;;  %v5464_v2 = vld [vmem:[%s6150_s23 + $0x168] ss:$16 sps:$4 sm:$0xff]  }
 0xaf6   : > { %2861 = vmatprep.subr.bf16.mxu1 %v5403_v48  ;;  %v5472_v48 = vld [vmem:[%s6150_s23 + $0x14c] ss:$16 sps:$4 sm:$0xff]  }
 0xaf9   : > { %2862 = vmatpush1.bf16.msra.mxu1 %v5401_v8  ;;  %v5470_v8 = vld [vmem:[%s6150_s23 + $0x148] ss:$16 sps:$4 sm:$0xff]  }
 0xafa   : > { %2863 = vmatprep.subr.bf16.mxu1 %v5409_v11  ;;  %v5478_v11 = vld [vmem:[%s6150_s23 + $0x12c] ss:$16 sps:$4 sm:$0xff]  }
 0xafd   : > { %2864 = vmatpush1.bf16.msra.mxu1 %v5407_v13  ;;  %v5476_v13 = vld [vmem:[%s6150_s23 + $0x128] ss:$16 sps:$4 sm:$0xff]  }
 0xafe   : > { %2865 = vmatprep.subr.bf16.mxu1 %v5415_v10  ;;  %v5484_v10 = vld [vmem:[%s6150_s23 + $0x10c] ss:$16 sps:$4 sm:$0xff]  }
 0xb01   : > { %2866 = vmatpush1.bf16.msra.mxu1 %v5413_v16  ;;  %v5482_v16 = vld [vmem:[%s6150_s23 + $0x108] ss:$16 sps:$4 sm:$0xff]  }
 0xb02   : > { %2867 = vmatprep.subr.bf16.mxu1 %v5421_v18  ;;  %v5490_v18 = vld [vmem:[%s6199_s10 + $0x174] ss:$8 sps:$4 sm:$0xff]  }
 0xb05   : > { %2868 = vmatpush1.bf16.msra.mxu1 %v5419_v20 }
 0xb06   : > { %2869 = vmatprep.subr.bf16.mxu1 %v5427_v22 }
 0xb09   : > { %2870 = vmatpush1.bf16.msra.mxu1 %v5425_v24 }
 0xb0a   : > { %2871 = vmatprep.subr.bf16.mxu1 %v5433_v30 }
 0xb0d   : > { %2872 = vmatpush1.bf16.msra.mxu1 %v5431_v32 }
 0xb0e   : > { %2873 = vmatprep.subr.bf16.mxu1 %v5439_v35 }
 0xbb0   : > { %v2120_v37 = vpop.f32.mrf.mxu1 }
 0xbb1   : > { %v2132_v3 = vpack.c.bf16 %v2120_v37, %v6422_v9  ;;  %v5437_v37 = vld [vmem:[%s6150_s23 + $0x1e0] ss:$16 sps:$4 sm:$0xff]  }
 0xbb2   : > { %v5123_v28 = vpop.f32.mrf.mxu1  ;;  %2874 = vmatpush2.bf16.msra.mxu1 %v5437_v37 }
 0xbb3   : > { %2369 = vmatprep.mubr.bf16.mxu0 %v2132_v3  ;;  %v5440_v3 = vld [vmem:[%s6150_s23 + $0x1e8] ss:$16 sps:$4 sm:$0xff]  }
 0xbb4   : > { %v2123_v39 = vpop.f32.mrf.mxu1  ;;  %2370 = vmatmul.mubr.bf16.vlgmr.msra.gmra.mxu0 %v2131_v38 }
 0xbb5   : > { %2901 = vmatpush1.bf16.msra.mxu0 %v5392_v62  ;;  %v5460_v62 = vld [vmem:[%s6150_s23 + $0x18c] ss:$16 sps:$4 sm:$0xff]  }
 0xbb6   : > { %v5124_v40 = vpop.f32.mrf.mxu1 }
 0xc74   : > { %v2371_v33 = vpop.f32.mrf.mxu0 }
 0xc75   : > { %v2372_v43 = vadd.f32 %v2371_v33, %v2170_v42 }
 0xc76   : > { %v2373_v9 = vpop.f32.mrf.mxu0 }
 0xc77   : > { %v2374_v6 = vadd.f32 %v2373_v9, %v2174_v1  ;;  %v6490_v47 = vadd.f32 %v2372_v43, %v6283_v52 }
 0xc78   : > { %v2375_v60 = vpop.f32.mrf.mxu0 }
 0xc79   : > { %v6492_v56 = vadd.f32 %v5621_v25, %v2374_v6  ;;  %v2376_v44 = vadd.f32 %v2375_v60, %v2170_v42 }
 0xc7a   : > { %v2377_v45 = vpop.f32.mrf.mxu0 }
 0xc7b   : > { %v2378_v46 = vadd.f32 %v2377_v45, %v2174_v1  ;;  %v2386_v49 = vadd.f32 %v6492_v56, %v6490_v47  ;;  %v6497_v50 = vadd.f32 %v2376_v44, %v6285_v53  ;;  %v5400_v53 = vld [vmem:[%s6150_s23 + $0xcc] ss:$16 sps:$4 sm:$0xff]   ;;  %v5443_v45 = vld [vmem:[%s6150_s23 + $0x1c0] ss:$16 sps:$4 sm:$0xff]  }
 0xc7c   : > { %2902 = vmatprep.subr.bf16.mxu0 %v5400_v53  ;;  %v5448_v44 = vld [vmem:[%s6150_s23 + $0x1cc] ss:$16 sps:$4 sm:$0xff]   ;;  %v5461_v53 = vld [vmem:[%s6150_s23 + $0x160] ss:$16 sps:$4 sm:$0xff]  }
 0xc7d   : > { %v6499_v54 = vadd.f32 %v5622_v51, %v2378_v46  ;;  %2387 = vadd.xlane.f32.xlu0 %v2386_v49  ;;  %2903 = vmatpush1.bf16.msra.mxu0 %v5398_v4  ;;  %v5446_v46 = vld [vmem:[%s6150_s23 + $0x1c8] ss:$16 sps:$4 sm:$0xff]   ;;  %v5451_v49 = vld [vmem:[%s6150_s23 + $0x1a4] ss:$16 sps:$4 sm:$0xff]   ;;  %v5449_v51 = vld [vmem:[%s6150_s23 + $0x1a0] ss:$16 sps:$4 sm:$0xff]  }
 0xc7e   : > { %2904 = vmatprep.subr.bf16.mxu0 %v5406_v5  ;;  %v5469_v4 = vld [vmem:[%s6150_s23 + $0x144] ss:$16 sps:$4 sm:$0xff]   ;;  %v5467_v5 = vld [vmem:[%s6150_s23 + $0x140] ss:$16 sps:$4 sm:$0xff]  }
 0xc7f   : > { %v2389_v52 = vadd.f32 %v6499_v54, %v6497_v50 }
 0xc81   : > { %2390 = vadd.xlane.f32.xlu1 %v2389_v52  ;;  %2905 = vmatpush1.bf16.msra.mxu0 %v5404_v7  ;;  %v5457_v52 = vld [vmem:[%s6150_s23 + $0x184] ss:$16 sps:$4 sm:$0xff]  }
 0xc82   : > { %2906 = vmatprep.subr.bf16.mxu0 %v5412_v12  ;;  %v5475_v7 = vld [vmem:[%s6150_s23 + $0x124] ss:$16 sps:$4 sm:$0xff]   ;;  %v5473_v12 = vld [vmem:[%s6150_s23 + $0x120] ss:$16 sps:$4 sm:$0xff]  }
 0xc85   : > { %2907 = vmatpush1.bf16.msra.mxu0 %v5410_v14  ;;  %v5481_v14 = vld [vmem:[%s6150_s23 + $0x104] ss:$16 sps:$4 sm:$0xff]  }
 0xc86   : > { %2908 = vmatprep.subr.bf16.mxu0 %v5418_v15  ;;  %v5479_v15 = vld [vmem:[%s6150_s23 + $0x100] ss:$16 sps:$4 sm:$0xff]  }
 0xc89   : > { %2909 = vmatpush1.bf16.msra.mxu0 %v5416_v17  ;;  %v5487_v17 = vld [vmem:[%s6199_s10 + $0x74] ss:$8 sps:$4 sm:$0xff]  }
 0xc8a   : > { %2910 = vmatprep.subr.bf16.mxu0 %v5424_v19 }
 0xc8d   : > { %2911 = vmatpush1.bf16.msra.mxu0 %v5422_v21 }
 0xc8e   : > { %2912 = vmatprep.subr.bf16.mxu0 %v5430_v23 }
 0xc91   : > { %2913 = vmatpush1.bf16.msra.mxu0 %v5428_v26  ;;  %v2384_v26 = vld [vmem:[%s7194_s25] sm:$0x3] }
 0xc92   : > { %2914 = vmatprep.subr.bf16.mxu0 %v5436_v31  ;;  %v2385_v31 = vld [vmem:[%s852_s20] sm:$0x3]  ;;  %v2427_v35 = vrot.slane %v2384_v26, %v6385_v29  ;;  %s7200_s20 = sld [smem:[#allocation30_spill]] (!%p4913_p5) }
 0xc95   : > { %2915 = vmatpush1.bf16.msra.mxu0 %v5434_v34  ;;  %v2423_v34 = vrot.slane %v2384_v26, %v6304_v61  ;;  %v5542_v26 = vld [vmem:[%s6199_s10 + $0x1e0] ss:$8 sps:$4 sm:$0xff]  }
 0xc96   : > { %2916 = vmatprep.subr.bf16.mxu0 %v5442_v36 }
 0xc99   : > { %2917 = vmatpush2.bf16.msra.mxu0 %v5440_v3  ;;  %v2438_v3 = vrot.slane %v2385_v31, %v6304_v61 }
 0xc9a   : > { %2918 = vmatprep.subr.bf16.mxu0 %v5448_v44  ;;  %v5493_v44 = vld [vmem:[%s6199_s10 + $0x64] ss:$8 sps:$4 sm:$0xff]  }
 0xc9d   : > { %2919 = vmatpush2.bf16.msra.mxu0 %v5446_v46  ;;  %v5491_v46 = vld [vmem:[%s6199_s10 + $0x60] ss:$8 sps:$4 sm:$0xff]  }
 0xd06   : > { %v2388_v38 = vpop.xlane.xlu0 %2387 }
 0xd07   : > { %v2393_v28 = vmul.f32 0.00390625, %v2388_v38  ;;  %v2442_v38 = vrot.slane %v2385_v31, %v6385_v29  ;;  %v5550_v31 = vld [vmem:[%s6199_s10 + $0x1d4] ss:$8 sps:$4 sm:$0xff]  }
 0xd09   : > { %v6540_v39 = vsub.f32 %v6490_v47, %v2393_v28  ;;  %v6543_v40 = vsub.f32 %v6492_v56, %v2393_v28  ;;  %v5445_v56 = vld [vmem:[%s6150_s23 + $0x1c4] ss:$16 sps:$4 sm:$0xff]  }
 0xd0a   : > { %v2391_v41 = vpop.xlane.xlu1 %2390  ;;  %2875 = vmatprep.subr.bf16.mxu1 %v5445_v56  ;;  %v5488_v56 = vld [vmem:[%s6199_s10 + $0x170] ss:$8 sps:$4 sm:$0xff]  }
 0xd0b   : > { %v2394_v42 = vmul.f32 0.00390625, %v2391_v41  ;;  %v2399_v1 = vmul.f32 %v6540_v39, %v6540_v39  ;;  %v2400_v33 = vmul.f32 %v6543_v40, %v6543_v40  ;;  %2876 = vmatpush2.bf16.msra.mxu1 %v5443_v45  ;;  %v5496_v45 = vld [vmem:[%s6199_s10 + $0x164] ss:$8 sps:$4 sm:$0xff]  }
 0xd0c   : > { %2877 = vmatprep.subr.bf16.mxu1 %v5451_v49  ;;  %v5494_v49 = vld [vmem:[%s6199_s10 + $0x160] ss:$8 sps:$4 sm:$0xff]  }
 0xd0d   : > { %v6550_v43 = vsub.f32 %v6497_v50, %v2394_v42  ;;  %v6553_v9 = vsub.f32 %v6499_v54, %v2394_v42  ;;  %v2403_v6 = vadd.f32 %v2400_v33, %v2399_v1  ;;  %v5454_v50 = vld [vmem:[%s6150_s23 + $0x1ac] ss:$16 sps:$4 sm:$0xff]   ;;  %v5452_v54 = vld [vmem:[%s6150_s23 + $0x1a8] ss:$16 sps:$4 sm:$0xff]   ;;  %s7198_s23 = sld [smem:[#allocation31_spill]] (!%p4913_p5) }
 0xd0e   : > { %2920 = vmatprep.subr.bf16.mxu0 %v5454_v50  ;;  %v5499_v50 = vld [vmem:[%s6199_s10 + $0x54] ss:$8 sps:$4 sm:$0xff]  }
 0xd0f   : > { %2404 = vadd.xlane.f32.xlu0 %v2403_v6  ;;  %v2401_v60 = vmul.f32 %v6550_v43, %v6550_v43  ;;  %v2402_v47 = vmul.f32 %v6553_v9, %v6553_v9  ;;  %2878 = vmatpush2.bf16.msra.mxu1 %v5449_v51  ;;  %v5502_v51 = vld [vmem:[%s6199_s10 + $0x154] ss:$8 sps:$4 sm:$0xff]  }
 0xd10   : > { %2921 = vmatpush2.bf16.msra.mxu0 %v5452_v54  ;;  %2879 = vmatprep.subr.bf16.mxu1 %v5457_v52  ;;  %v5497_v54 = vld [vmem:[%s6199_s10 + $0x50] ss:$8 sps:$4 sm:$0xff]  }
 0xd11   : > { %v2406_v25 = vadd.f32 %v2402_v47, %v2401_v60  ;;  %2922 = vmatprep.subr.bf16.mxu0 %v5460_v62  ;;  %v5500_v52 = vld [vmem:[%s6199_s10 + $0x150] ss:$8 sps:$4 sm:$0xff]   ;;  %v5503_v62 = vld [vmem:[%s6199_s10 + $0x40] ss:$8 sps:$4 sm:$0xff]  }
 0xd13   : > { %2407 = vadd.xlane.f32.xlu1 %v2406_v25  ;;  %2880 = vmatpush2.bf16.msra.mxu1 %v5455_v57  ;;  %v5505_v57 = vld [vmem:[%s6199_s10 + $0x44] ss:$8 sps:$4 sm:$0xff]   ;;  %s7199_s25 = smov (!%p4913_p5), %s7198_s23 }
 0xd14   : > { %2923 = vmatpush2.bf16.msra.mxu0 %v5458_v55  ;;  %2881 = vmatprep.subr.bf16.mxu1 %v5463_v63  ;;  %v5508_v55 = vld [vmem:[%s6199_s10 + $0x144] ss:$8 sps:$4 sm:$0xff]   ;;  %v5506_v63 = vld [vmem:[%s6199_s10 + $0x140] ss:$8 sps:$4 sm:$0xff]  }
 0xd15   : > { %2924 = vmatprep.subr.bf16.mxu0 %v5466_v0  ;;  %v5511_v0 = vld [vmem:[%s6199_s10 + $0x34] ss:$8 sps:$4 sm:$0xff]  }
 0xd17   : > { %2882 = vmatpush2.bf16.msra.mxu1 %v5461_v53  ;;  %v5514_v53 = vld [vmem:[%s6199_s10 + $0x134] ss:$8 sps:$4 sm:$0xff]  }
 0xd18   : > { %2925 = vmatpush2.bf16.msra.mxu0 %v5464_v2  ;;  %2883 = vmatprep.subr.bf16.mxu1 %v5469_v4  ;;  %v5509_v2 = vld [vmem:[%s6199_s10 + $0x30] ss:$8 sps:$4 sm:$0xff]  }
 0xd19   : > { %2926 = vmatprep.subr.bf16.mxu0 %v5472_v48  ;;  %v5512_v4 = vld [vmem:[%s6199_s10 + $0x130] ss:$8 sps:$4 sm:$0xff]   ;;  %v5517_v48 = vld [vmem:[%s6199_s10 + $0x24] ss:$8 sps:$4 sm:$0xff]  }
 0xd1b   : > { %2884 = vmatpush2.bf16.msra.mxu1 %v5467_v5  ;;  %v5520_v5 = vld [vmem:[%s6199_s10 + $0x124] ss:$8 sps:$4 sm:$0xff]  }
 0xd1c   : > { %2927 = vmatpush2.bf16.msra.mxu0 %v5470_v8  ;;  %2885 = vmatprep.subr.bf16.mxu1 %v5475_v7  ;;  %v5515_v8 = vld [vmem:[%s6199_s10 + $0x20] ss:$8 sps:$4 sm:$0xff]  }
 0xd1d   : > { %2928 = vmatprep.subr.bf16.mxu0 %v5478_v11  ;;  %v5518_v7 = vld [vmem:[%s6199_s10 + $0x120] ss:$8 sps:$4 sm:$0xff]   ;;  %v5523_v11 = vld [vmem:[%s6199_s10 + $0x14] ss:$8 sps:$4 sm:$0xff]  }
 0xd1f   : > { %2886 = vmatpush2.bf16.msra.mxu1 %v5473_v12  ;;  %v5526_v12 = vld [vmem:[%s6199_s10 + $0x114] ss:$8 sps:$4 sm:$0xff]  }
 0xd20   : > { %2929 = vmatpush2.bf16.msra.mxu0 %v5476_v13  ;;  %2887 = vmatprep.subr.bf16.mxu1 %v5481_v14  ;;  %v5521_v13 = vld [vmem:[%s6199_s10 + $0x10] ss:$8 sps:$4 sm:$0xff]  }
 0xd21   : > { %2930 = vmatprep.subr.bf16.mxu0 %v5484_v10  ;;  %v5524_v14 = vld [vmem:[%s6199_s10 + $0x110] ss:$8 sps:$4 sm:$0xff]   ;;  %v5529_v10 = vld [vmem:[%s6199_s10 + $0x4] ss:$8 sps:$4 sm:$0xff]  }
 0xd23   : > { %2888 = vmatpush2.bf16.msra.mxu1 %v5479_v15  ;;  %v5532_v15 = vld [vmem:[%s6199_s10 + $0x104] ss:$8 sps:$4 sm:$0xff]  }
 0xd24   : > { %2931 = vmatpush2.bf16.msra.mxu0 %v5482_v16  ;;  %3415 = vmatprep.subr.bf16.mxu1 %v5487_v17  ;;  %v5527_v16 = vld [vmem:[%s6199_s10] ss:$8 sps:$4 sm:$0xff]  }
 0xd25   : > { %3458 = vmatprep.subr.bf16.mxu0 %v5490_v18  ;;  %v5530_v17 = vld [vmem:[%s6199_s10 + $0x100] ss:$8 sps:$4 sm:$0xff]   ;;  %v5535_v18 = vld [vmem:[%s6199_s10 + $0xf4] ss:$8 sps:$4 sm:$0xff]  }
 0xd98   : > { %v2405_v19 = vpop.xlane.xlu0 %2404 }
 0xd99   : > { %v2409_v20 = vmul.f32 0.00390625, %v2405_v19  ;;  %v5538_v19 = vld [vmem:[%s6199_s10 + $0x1f4] ss:$8 sps:$4 sm:$0xff]  }
 0xd9b   : > { %v2411_v21 = vadd.f32 1e-12, %v2409_v20  ;;  %v5533_v20 = vld [vmem:[%s6199_s10 + $0xf0] ss:$8 sps:$4 sm:$0xff]  }
 0xd9c   : > { %v2408_v22 = vpop.xlane.xlu1 %2407 }
 0xd9d   : > { %5597 = vrsqrt.f32 %v2411_v21  ;;  %v2410_v23 = vmul.f32 0.00390625, %v2408_v22  ;;  %v5536_v21 = vld [vmem:[%s6199_s10 + $0x1f0] ss:$8 sps:$4 sm:$0xff]   ;;  %v5541_v22 = vld [vmem:[%s6199_s10 + $0xe4] ss:$8 sps:$4 sm:$0xff]  }
 0xd9f   : > { %v2412_v24 = vadd.f32 1e-12, %v2410_v23  ;;  %v5544_v23 = vld [vmem:[%s6199_s10 + $0x1e4] ss:$8 sps:$4 sm:$0xff]  }
 0xda1   : > { %5599 = vrsqrt.f32 %v2412_v24  ;;  %v5539_v24 = vld [vmem:[%s6199_s10 + $0xe0] ss:$8 sps:$4 sm:$0xff]  }
 0xdaa   : > { %v5598_v30 = vpop.eup %5597 }
 0xdab   : > { %v2416_v32 = vmul.f32 %v5598_v30, %v6543_v40  ;;  %v2415_v36 = vmul.f32 %v5598_v30, %v6540_v39  ;;  %v5547_v30 = vld [vmem:[%s6199_s10 + $0xd4] ss:$8 sps:$4 sm:$0xff]  }
 0xdad   : > { %v2431_v41 = vmul.f32 %v2427_v35, %v2416_v32  ;;  %v2430_v42 = vmul.f32 %v2423_v34, %v2415_v36  ;;  %v5545_v32 = vld [vmem:[%s6199_s10 + $0xd0] ss:$8 sps:$4 sm:$0xff]   ;;  %v5553_v36 = vld [vmem:[%s6199_s10 + $0xc4] ss:$8 sps:$4 sm:$0xff]  }
 0xdae   : > { %v5600_v37 = vpop.eup %5599 }
 0xdaf   : > { %v2418_v28 = vmul.f32 %v5600_v37, %v6553_v9  ;;  %v2417_v40 = vmul.f32 %v5600_v37, %v6550_v43  ;;  %v6607_v6 = vadd.f32 %v2442_v38, %v2431_v41  ;;  %v6611_v60 = vadd.f32 %v2438_v3, %v2430_v42  ;;  %v5485_v9 = vld [vmem:[%s6199_s10 + $0x70] ss:$8 sps:$4 sm:$0xff]   ;;  %v5554_v37 = vld [vmem:[%s6199_s10 + $0x1c0] ss:$8 sps:$4 sm:$0xff]   ;;  %v5565_v42 = vld [vmem:[%s6199_s10 + $0xa4] ss:$8 sps:$4 sm:$0xff]  }
 0xdb0   : > { %v5557_v41 = vld [vmem:[%s6199_s10 + $0xb0] ss:$8 sps:$4 sm:$0xff]  }
 0xdb1   : > { %v2433_v1 = vmul.f32 %v2427_v35, %v2418_v28  ;;  %v2432_v33 = vmul.f32 %v2423_v34, %v2417_v40  ;;  %v5548_v34 = vld [vmem:[%s6199_s10 + $0x1d0] ss:$8 sps:$4 sm:$0xff]   ;;  %v5551_v35 = vld [vmem:[%s6199_s10 + $0xc0] ss:$8 sps:$4 sm:$0xff]   ;;  %v5562_v28 = vld [vmem:[%s6199_s10 + $0x1b4] ss:$8 sps:$4 sm:$0xff]  }
 0xdb2   : > { %v5560_v40 = vld [vmem:[%s6199_s10 + $0x1b0] ss:$8 sps:$4 sm:$0xff]  }
 0xdb3   : > { %v6609_v39 = vadd.f32 %v2442_v38, %v2433_v1  ;;  %v6613_v47 = vadd.f32 %v2438_v3, %v2432_v33  ;;  %v5556_v3 = vld [vmem:[%s6199_s10 + $0x1c4] ss:$8 sps:$4 sm:$0xff]   ;;  %v5559_v38 = vld [vmem:[%s6199_s10 + $0xb4] ss:$8 sps:$4 sm:$0xff]   ;;  %v5563_v33 = vld [vmem:[%s6199_s10 + $0xa0] ss:$8 sps:$4 sm:$0xff]  }
 0xdb4   : > { %v5568_v1 = vld [vmem:[%s6199_s10 + $0x1a4] ss:$8 sps:$4 sm:$0xff]  }
 0xdb5   : > { %v2450_v25 = vpack.c.bf16 %v6609_v39, %v6607_v6  ;;  %v2449_v43 = vpack.c.bf16 %v6613_v47, %v6611_v60 }
 0xdb7   : > { %2889 = vmatprep.mubr.bf16.mxu1 %v2450_v25  ;;  %2932 = vmatprep.mubr.bf16.mxu0 %v2450_v25  ;;  %v5566_v25 = vld [vmem:[%s6199_s10 + $0x1a0] ss:$8 sps:$4 sm:$0xff]  }
 0xdb8   : > { %2890 = vmatmul.mubr.bf16.vlgmr.msra.gmra.mxu1 %v2449_v43  ;;  %2933 = vmatmul.mubr.bf16.vlgmr.msra.gmra.mxu0 %v2449_v43  ;;  %v5571_v43 = vld [vmem:[%s6199_s10 + $0x94] ss:$8 sps:$4 sm:$0xff]  }
 0xdb9   : > { %3416 = vmatpush1.bf16.msra.mxu1 %v5485_v9  ;;  %3459 = vmatpush1.bf16.msra.mxu0 %v5488_v56  ;;  %v5574_v9 = vld [vmem:[%s6199_s10 + $0x194] ss:$8 sps:$4 sm:$0xff]   ;;  %v5569_v56 = vld [vmem:[%s6199_s10 + $0x90] ss:$8 sps:$4 sm:$0xff]  }
 0xdba   : > { %3417 = vmatprep.subr.bf16.mxu1 %v5493_v44  ;;  %3460 = vmatprep.subr.bf16.mxu0 %v5496_v45  ;;  %v5572_v44 = vld [vmem:[%s6199_s10 + $0x190] ss:$8 sps:$4 sm:$0xff]   ;;  %v5577_v45 = vld [vmem:[%s6199_s10 + $0x84] ss:$8 sps:$4 sm:$0xff]  }
 0xdbd   : > { %3418 = vmatpush1.bf16.msra.mxu1 %v5491_v46  ;;  %3461 = vmatpush1.bf16.msra.mxu0 %v5494_v49  ;;  %v5580_v46 = vld [vmem:[%s6199_s10 + $0x184] ss:$8 sps:$4 sm:$0xff]   ;;  %v5575_v49 = vld [vmem:[%s6199_s10 + $0x80] ss:$8 sps:$4 sm:$0xff]  }
 0xdbe   : > { %3419 = vmatprep.subr.bf16.mxu1 %v5499_v50  ;;  %3462 = vmatprep.subr.bf16.mxu0 %v5502_v51  ;;  %v5578_v50 = vld [vmem:[%s6199_s10 + $0x180] ss:$8 sps:$4 sm:$0xff]  }
 0xdbf   : > { %v2515_v51 = vld [vmem:[%s6189_s5] sm:$0xf] }
 0xdc1   : > { %3420 = vmatpush1.bf16.msra.mxu1 %v5497_v54  ;;  %3463 = vmatpush1.bf16.msra.mxu0 %v5500_v52  ;;  %v2520_v54 = vrot.slane %v2515_v51, %v6304_v61  ;;  %v2528_v52 = vrot.slane %v2515_v51, %v1061_v59 }
 0xdc2   : > { %3421 = vmatprep.subr.bf16.mxu1 %v5505_v57  ;;  %3464 = vmatprep.subr.bf16.mxu0 %v5508_v55  ;;  %v2524_v57 = vrot.slane %v2515_v51, %v6385_v29  ;;  %v2532_v55 = vrot.slane %v2515_v51, %v1065_v27 }
 0xdc5   : > { %3422 = vmatpush1.bf16.msra.mxu1 %v5503_v62  ;;  %3465 = vmatpush1.bf16.msra.mxu0 %v5506_v63 }
 0xdc6   : > { %3423 = vmatprep.subr.bf16.mxu1 %v5511_v0  ;;  %3466 = vmatprep.subr.bf16.mxu0 %v5514_v53 }
 0xdc9   : > { %3424 = vmatpush1.bf16.msra.mxu1 %v5509_v2  ;;  %3467 = vmatpush1.bf16.msra.mxu0 %v5512_v4 }
 0xdca   : > { %3425 = vmatprep.subr.bf16.mxu1 %v5517_v48  ;;  %3468 = vmatprep.subr.bf16.mxu0 %v5520_v5 }
 0xdcd   : > { %3426 = vmatpush1.bf16.msra.mxu1 %v5515_v8  ;;  %3469 = vmatpush1.bf16.msra.mxu0 %v5518_v7 }
 0xdce   : > { %3427 = vmatprep.subr.bf16.mxu1 %v5523_v11  ;;  %3470 = vmatprep.subr.bf16.mxu0 %v5526_v12 }
 0xdd1   : > { %3428 = vmatpush1.bf16.msra.mxu1 %v5521_v13  ;;  %3471 = vmatpush1.bf16.msra.mxu0 %v5524_v14 }
 0xdd2   : > { %3429 = vmatprep.subr.bf16.mxu1 %v5529_v10  ;;  %3472 = vmatprep.subr.bf16.mxu0 %v5532_v15 }
 0xdd5   : > { %3430 = vmatpush1.bf16.msra.mxu1 %v5527_v16  ;;  %3473 = vmatpush1.bf16.msra.mxu0 %v5530_v17 }
 0xdd6   : > { %3431 = vmatprep.subr.bf16.mxu1 %v5535_v18  ;;  %3474 = vmatprep.subr.bf16.mxu0 %v5538_v19 }
 0xdd9   : > { %3432 = vmatpush2.bf16.msra.mxu1 %v5533_v20  ;;  %3475 = vmatpush2.bf16.msra.mxu0 %v5536_v21 }
 0xdda   : > { %3433 = vmatprep.subr.bf16.mxu1 %v5541_v22  ;;  %3476 = vmatprep.subr.bf16.mxu0 %v5544_v23 }
 0xddd   : > { %3434 = vmatpush2.bf16.msra.mxu1 %v5539_v24  ;;  %3477 = vmatpush2.bf16.msra.mxu0 %v5542_v26 }
 0xdde   : > { %3435 = vmatprep.subr.bf16.mxu1 %v5547_v30  ;;  %3478 = vmatprep.subr.bf16.mxu0 %v5550_v31 }
 0xde1   : > { %3436 = vmatpush2.bf16.msra.mxu1 %v5545_v32  ;;  %3479 = vmatpush2.bf16.msra.mxu0 %v5548_v34 }
 0xde2   : > { %3437 = vmatprep.subr.bf16.mxu1 %v5553_v36  ;;  %3480 = vmatprep.subr.bf16.mxu0 %v5556_v3 }
 0xde5   : > { %3438 = vmatpush2.bf16.msra.mxu1 %v5551_v35  ;;  %3481 = vmatpush2.bf16.msra.mxu0 %v5554_v37 }
 0xde6   : > { %3439 = vmatprep.subr.bf16.mxu1 %v5559_v38  ;;  %3482 = vmatprep.subr.bf16.mxu0 %v5562_v28 }
 0xde9   : > { %3440 = vmatpush2.bf16.msra.mxu1 %v5557_v41  ;;  %3483 = vmatpush2.bf16.msra.mxu0 %v5560_v40 }
 0xdea   : > { %3441 = vmatprep.subr.bf16.mxu1 %v5565_v42  ;;  %3484 = vmatprep.subr.bf16.mxu0 %v5568_v1 }
 0xded   : > { %3442 = vmatpush2.bf16.msra.mxu1 %v5563_v33  ;;  %3485 = vmatpush2.bf16.msra.mxu0 %v5566_v25 }
 0xdee   : > { %3443 = vmatprep.subr.bf16.mxu1 %v5571_v43  ;;  %3486 = vmatprep.subr.bf16.mxu0 %v5574_v9 }
 0xdf1   : > { %3444 = vmatpush2.bf16.msra.mxu1 %v5569_v56  ;;  %3487 = vmatpush2.bf16.msra.mxu0 %v5572_v44 }
 0xdf2   : > { %3445 = vmatprep.subr.bf16.mxu1 %v5577_v45  ;;  %3488 = vmatprep.subr.bf16.mxu0 %v5580_v46 }
 0xdf5   : > { %3446 = vmatpush2.bf16.msra.mxu1 %v5575_v49  ;;  %3489 = vmatpush2.bf16.msra.mxu0 %v5578_v50 }
 0xe78   : > { %v2891_v62 = vpop.f32.mrf.mxu1  ;;  %v2934_v63 = vpop.f32.mrf.mxu0 }
 0xe79   : > { %v6688_v0 = vadd.f32 %v2891_v62, %v2520_v54  ;;  %v6690_v53 = vadd.f32 %v2934_v63, %v2528_v52 }
 0xe7a   : > { %v2893_v2 = vpop.f32.mrf.mxu1  ;;  %v2936_v4 = vpop.f32.mrf.mxu0 }
 0xe7b   : > { %v2951_v48 = vmul.f32 0.044715, %v6688_v0  ;;  %v2953_v5 = vmul.f32 0.044715, %v6690_v53  ;;  %v2894_v8 = vadd.f32 %v2893_v2, %v2524_v57  ;;  %v6694_v7 = vadd.f32 %v2936_v4, %v2532_v55 }
 0xe7c   : > { %v2895_v59 = vpop.f32.mrf.mxu1  ;;  %v2938_v11 = vpop.f32.mrf.mxu0 }
 0xe7d   : > { %v2959_v58 = vmul.f32 %v2951_v48, %v6688_v0  ;;  %v2961_v27 = vmul.f32 %v2953_v5, %v6690_v53  ;;  %v2952_v12 = vmul.f32 0.044715, %v2894_v8  ;;  %v2954_v13 = vmul.f32 0.044715, %v6694_v7 }
 0xe7e   : > { %v2896_v14 = vadd.f32 %v2895_v59, %v2520_v54  ;;  %v6699_v10 = vadd.f32 %v2938_v11, %v2528_v52  ;;  %v2897_v15 = vpop.f32.mrf.mxu1  ;;  %v2940_v16 = vpop.f32.mrf.mxu0  ;;  %v2944_v48 = vmul.f32 0.5, %v2894_v8  ;;  %v2943_v59 = vmul.f32 0.5, %v6688_v0 }
 0xe7f   : > { %v2967_v17 = vmul.f32 %v2959_v58, %v6688_v0  ;;  %v2969_v18 = vmul.f32 %v2961_v27, %v6690_v53  ;;  %v2960_v19 = vmul.f32 %v2952_v12, %v2894_v8  ;;  %v2962_v20 = vmul.f32 %v2954_v13, %v6694_v7 }
 0xe80   : > { %v2955_v21 = vmul.f32 0.044715, %v2896_v14  ;;  %v2957_v22 = vmul.f32 0.044715, %v6699_v10  ;;  %v2898_v23 = vadd.f32 %v2897_v15, %v2524_v57  ;;  %v2941_v24 = vadd.f32 %v2940_v16, %v2532_v55 }
 0xe81   : > { %v2975_v26 = vadd.f32 %v2967_v17, %v6688_v0  ;;  %v2977_v30 = vadd.f32 %v2969_v18, %v6690_v53  ;;  %v2968_v31 = vmul.f32 %v2960_v19, %v2894_v8  ;;  %v2970_v32 = vmul.f32 %v2962_v20, %v6694_v7 }
 0xe82   : > { %v2963_v34 = vmul.f32 %v2955_v21, %v2896_v14  ;;  %v2965_v35 = vmul.f32 %v2957_v22, %v6699_v10  ;;  %v2956_v36 = vmul.f32 0.044715, %v2898_v23  ;;  %v2958_v37 = vmul.f32 0.044715, %v2941_v24 }
 0xe83   : > { %v2983_v3 = vmul.f32 0.7978846, %v2975_v26  ;;  %v2985_v38 = vmul.f32 0.7978846, %v2977_v30  ;;  %v2976_v28 = vadd.f32 %v2968_v31, %v2894_v8  ;;  %v2978_v25 = vadd.f32 %v2970_v32, %v6694_v7 }
 0xe84   : > { %v2971_v41 = vmul.f32 %v2963_v34, %v2896_v14  ;;  %v2973_v40 = vmul.f32 %v2965_v35, %v6699_v10  ;;  %v2964_v42 = vmul.f32 %v2956_v36, %v2898_v23  ;;  %v2966_v1 = vmul.f32 %v2958_v37, %v2941_v24 }
 0xe85   : > { %v2984_v33 = vmul.f32 0.7978846, %v2976_v28  ;;  %5601 = vtanh.f32 %v2983_v3  ;;  %v2986_v45 = vmul.f32 0.7978846, %v2978_v25  ;;  %v2947_v12 = vmul.f32 0.5, %v2896_v14 }
 0xe86   : > { %v2979_v43 = vadd.f32 %v2971_v41, %v2896_v14  ;;  %v2981_v9 = vadd.f32 %v2973_v40, %v6699_v10  ;;  %v2972_v56 = vmul.f32 %v2964_v42, %v2898_v23  ;;  %5603 = vtanh.f32 %v2985_v38 }
 0xe87   : > { %v2974_v44 = vmul.f32 %v2966_v1, %v2941_v24  ;;  %5605 = vtanh.f32 %v2984_v33  ;;  %v2948_v17 = vmul.f32 0.5, %v2898_v23  ;;  %v2949_v19 = vmul.f32 0.5, %v6699_v10 }
 0xe88   : > { %v2987_v46 = vmul.f32 0.7978846, %v2979_v43  ;;  %v2989_v49 = vmul.f32 0.7978846, %v2981_v9  ;;  %v2980_v50 = vadd.f32 %v2972_v56, %v2898_v23  ;;  %5607 = vtanh.f32 %v2986_v45 }
 0xe89   : > { %v2982_v51 = vadd.f32 %v2974_v44, %v2941_v24  ;;  %v2946_v21 = vmul.f32 0.5, %v6694_v7  ;;  %v2950_v22 = vmul.f32 0.5, %v2941_v24  ;;  %v2945_v31 = vmul.f32 0.5, %v6690_v53  ;;  %v3083_v7 = vld [vmem:[%s860_s6] sm:$0x3] }
 0xe8a   : > { %5609 = vtanh.f32 %v2987_v46  ;;  %v2988_v54 = vmul.f32 0.7978846, %v2980_v50  ;;  %v3088_v53 = vrot.slane %v3083_v7, %v6304_v61  ;;  %v3092_v24 = vrot.slane %v3083_v7, %v6385_v29 }
 0xe8b   : > { %5611 = vtanh.f32 %v2989_v49  ;;  %v2990_v52 = vmul.f32 0.7978846, %v2982_v51 }
 0xe8c   : > { %5613 = vtanh.f32 %v2988_v54 }
 0xe8d   : > { %5615 = vtanh.f32 %v2990_v52 }
 0xe92   : > { %v5602_v57 = vpop.eup %5601 }
 0xe93   : > { %v5604_v55 = vpop.eup %5603  ;;  %v2999_v13 = vadd.f32 1.0, %v5602_v57 }
 0xe94   : > { %v5606_v62 = vpop.eup %5605  ;;  %v3001_v20 = vadd.f32 1.0, %v5604_v55 }
 0xe95   : > { %v5608_v63 = vpop.eup %5607  ;;  %v3000_v5 = vadd.f32 1.0, %v5606_v62  ;;  %v3007_v35 = vmul.f32 %v2999_v13, %v2943_v59 }
 0xe96   : > { %v3002_v27 = vadd.f32 1.0, %v5608_v63  ;;  %v3009_v23 = vmul.f32 %v3001_v20, %v2945_v31  ;;  %v3505_v20 = vld [vmem:[%s864_s17] sm:$0x3] }
 0xe97   : > { %v5610_v2 = vpop.eup %5609  ;;  %v3008_v30 = vmul.f32 %v3000_v5, %v2944_v48 }
 0xe98   : > { %v5612_v4 = vpop.eup %5611  ;;  %v3003_v11 = vadd.f32 1.0, %v5610_v2  ;;  %v3010_v14 = vmul.f32 %v3002_v27, %v2946_v21  ;;  %v3506_v21 = vld [vmem:[%s868_s22] sm:$0x3] }
 0xe99   : > { %v5614_v58 = vpop.eup %5613  ;;  %v3005_v15 = vadd.f32 1.0, %v5612_v4 }
 0xe9a   : > { %v5616_v16 = vpop.eup %5615  ;;  %v3004_v18 = vadd.f32 1.0, %v5614_v58  ;;  %v3011_v8 = vmul.f32 %v3003_v11, %v2947_v12 }
 0xe9b   : > { %v3006_v26 = vadd.f32 1.0, %v5616_v16  ;;  %v3013_v32 = vmul.f32 %v3005_v15, %v2949_v19 }
 0xe9c   : > { %v3012_v0 = vmul.f32 %v3004_v18, %v2948_v17  ;;  %v3015_v3 = vpack.c.bf16 %v3011_v8, %v3007_v35 }
 0xe9d   : > { %v3014_v34 = vmul.f32 %v3006_v26, %v2950_v22  ;;  %v3017_v10 = vpack.c.bf16 %v3013_v32, %v3009_v23  ;;  %v3543_v22 = vrot.slane %v3505_v20, %v6304_v61  ;;  %v3547_v26 = vrot.slane %v3505_v20, %v6385_v29 }
 0xe9e   : > { %v3016_v36 = vpack.c.bf16 %v3012_v0, %v3008_v30  ;;  %v3558_v30 = vrot.slane %v3506_v21, %v6304_v61  ;;  %v3562_v0 = vrot.slane %v3506_v21, %v6385_v29 }
 0xe9f   : > { %v3018_v37 = vpack.c.bf16 %v3014_v34, %v3010_v14 }
 0xea0   : > { %3447 = vmatprep.mubr.bf16.mxu1 %v3016_v36 }
 0xea1   : > { %3490 = vmatprep.mubr.bf16.mxu0 %v3018_v37  ;;  %3448 = vmatmul.mubr.bf16.vlgmr.msra.gmra.mxu1 %v3015_v3 }
 0xea2   : > { %3491 = vmatmul.mubr.bf16.vlgmr.msra.gmra.mxu0 %v3017_v10 }
 0xf61   : > { %v3449_v38 = vpop.f32.mrf.mxu1 }
 0xf62   : > { %v3450_v28 = vadd.f32 %v3449_v38, %v3088_v53  ;;  %v3492_v41 = vpop.f32.mrf.mxu0 }
 0xf63   : > { %v3451_v40 = vpop.f32.mrf.mxu1 }
 0xf64   : > { %v3493_v42 = vadd.f32 %v3492_v41, %v3450_v28  ;;  %v3452_v1 = vadd.f32 %v3451_v40, %v3092_v24  ;;  %v3494_v33 = vpop.f32.mrf.mxu0 }
 0xf65   : > { %v3453_v25 = vpop.f32.mrf.mxu1 }
 0xf66   : > { %v3495_v43 = vadd.f32 %v3494_v33, %v3452_v1  ;;  %v3454_v9 = vadd.f32 %v3453_v25, %v3088_v53  ;;  %v3496_v56 = vpop.f32.mrf.mxu0  ;;  %v3501_v45 = vadd.f32 %v3493_v42, %v6611_v60 }
 0xf67   : > { %v3455_v44 = vpop.f32.mrf.mxu1 }
 0xf68   : > { %v3502_v46 = vadd.f32 %v3495_v43, %v6607_v6  ;;  %v3497_v49 = vadd.f32 %v3496_v56, %v3454_v9  ;;  %v3456_v50 = vadd.f32 %v3455_v44, %v3092_v24  ;;  %v3498_v51 = vpop.f32.mrf.mxu0 }
 0xf6a   : > { %v3499_v54 = vadd.f32 %v3498_v51, %v3456_v50  ;;  %v3507_v52 = vadd.f32 %v3502_v46, %v3501_v45  ;;  %v3503_v57 = vadd.f32 %v3497_v49, %v6613_v47 }
 0xf6c   : > { %v3504_v55 = vadd.f32 %v3499_v54, %v6609_v39  ;;  %3508 = vadd.xlane.f32.xlu0 %v3507_v52 }
 0xf6e   : > { %v3510_v62 = vadd.f32 %v3504_v55, %v3503_v57 }
 0xf70   : > { %3511 = vadd.xlane.f32.xlu1 %v3510_v62 }
 0xff5   : > { %v3509_v63 = vpop.xlane.xlu0 %3508 }
 0xff6   : > { %v3513_v2 = vmul.f32 0.00390625, %v3509_v63 }
 0xff8   : > { %v3515_v4 = vsub.f32 %v3501_v45, %v3513_v2  ;;  %v3516_v48 = vsub.f32 %v3502_v46, %v3513_v2 }
 0xff9   : > { %v3512_v5 = vpop.xlane.xlu1 %3511 }
 0xffa   : > { %v3514_v60 = vmul.f32 0.00390625, %v3512_v5  ;;  %v3519_v59 = vmul.f32 %v3515_v4, %v3515_v4  ;;  %v3520_v6 = vmul.f32 %v3516_v48, %v3516_v48 }
 0xffc   : > { %v3517_v11 = vsub.f32 %v3503_v57, %v3514_v60  ;;  %v3518_v58 = vsub.f32 %v3504_v55, %v3514_v60  ;;  %v3523_v27 = vadd.f32 %v3520_v6, %v3519_v59 }
 0xffe   : > { %3524 = vadd.xlane.f32.xlu0 %v3523_v27  ;;  %v3521_v47 = vmul.f32 %v3517_v11, %v3517_v11  ;;  %v3522_v12 = vmul.f32 %v3518_v58, %v3518_v58 }
0x1000   : > { %v3526_v39 = vadd.f32 %v3522_v12, %v3521_v47 }
0x1002   : > { %3527 = vadd.xlane.f32.xlu1 %v3526_v39 }
0x1087   : > { %v3525_v13 = vpop.xlane.xlu0 %3524 }
0x1088   : > { %v3529_v15 = vmul.f32 0.00390625, %v3525_v13 }
0x108a   : > { %v3531_v16 = vadd.f32 1e-12, %v3529_v15 }
0x108b   : > { %v3528_v17 = vpop.xlane.xlu1 %3527 }
0x108c   : > { %5617 = vrsqrt.f32 %v3531_v16  ;;  %v3530_v18 = vmul.f32 0.00390625, %v3528_v17 }
0x108e   : > { %v3532_v19 = vadd.f32 1e-12, %v3530_v18 }
0x1090   : > { %5619 = vrsqrt.f32 %v3532_v19 }
0x1099   : > { %v5618_v8 = vpop.eup %5617 }
0x109a   : > { %v3535_v31 = vmul.f32 %v5618_v8, %v3515_v4  ;;  %v3536_v32 = vmul.f32 %v5618_v8, %v3516_v48 }
0x109c   : > { %v3550_v14 = vmul.f32 %v3543_v22, %v3535_v31  ;;  %v3551_v34 = vmul.f32 %v3547_v26, %v3536_v32 }
0x109d   : > { %v5620_v35 = vpop.eup %5619 }
0x109e   : > { %v6741_v36 = vadd.f32 %v3558_v30, %v3550_v14  ;;  %v3566_v23 = vadd.f32 %v3562_v0, %v3551_v34  ;;  %v3537_v37 = vmul.f32 %v5620_v35, %v3517_v11  ;;  %v3538_v3 = vmul.f32 %v5620_v35, %v3518_v58 }
0x10a0   : > { %3569 = vst [vmem:[#allocation2 + $0x10] sm:$0xff] %v6741_v36  ;;  %3570 = vst [vmem:[#allocation2] sm:$0xff] %v3566_v23  ;;  %v3552_v10 = vmul.f32 %v3543_v22, %v3537_v37  ;;  %v3553_v7 = vmul.f32 %v3547_v26, %v3538_v3  ;;  %3576 = sbr.rel (%p4913_p5) target bundleno = 5018 (0x139a), region = 120 }
0x10a2   : > { %v6744_v53 = vadd.f32 %v3558_v30, %v3552_v10  ;;  %v6746_v24 = vadd.f32 %v3562_v0, %v3553_v7 }
0x10a4   : > { %3571 = vst [vmem:[#allocation2 + $0x18] sm:$0xff] %v6744_v53  ;;  %3572 = vst [vmem:[#allocation2 + $0x8] sm:$0xff] %v6746_v24 }
0x10a5   : > { %v6754_v38 = vld [vmem:[%s7197_s21 + $0x74] ss:$8 sps:$4 sm:$0xff]   ;;  %v3578_v28 = vpack.c.bf16 %v3566_v23, %v3566_v23  ;;  %v6759_v41 = vld [vmem:[%s7197_s21 + $0x70] ss:$8 sps:$4 sm:$0xff]   ;;  %v6765_v40 = vld [vmem:[%s7197_s21 + $0x64] ss:$8 sps:$4 sm:$0xff]   ;;  %v3577_v17 = vpack.c.bf16 %v6741_v36, %v6741_v36 }
0x10a6   : > { %3783 = vmatprep.subr.bf16.mxu0 %v6754_v38  ;;  %v6771_v42 = vld [vmem:[%s7197_s21 + $0x60] ss:$8 sps:$4 sm:$0xff]   ;;  %v6777_v1 = vld [vmem:[%s7197_s21 + $0x54] ss:$8 sps:$4 sm:$0xff]   ;;  %v6783_v33 = vld [vmem:[%s7197_s21 + $0x50] ss:$8 sps:$4 sm:$0xff]  }
0x10a7   : > { %3815 = vmatprep.mubr.bf16.mxu0 %v3578_v28  ;;  %3784 = vmatpush1.bf16.msra.mxu0 %v6759_v41  ;;  %v6789_v25 = vld [vmem:[%s7197_s21 + $0x44] ss:$8 sps:$4 sm:$0xff]   ;;  %v6795_v43 = vld [vmem:[%s7197_s21 + $0x40] ss:$8 sps:$4 sm:$0xff]   ;;  %v6801_v9 = vld [vmem:[%s7197_s21 + $0x34] ss:$8 sps:$4 sm:$0xff]  }
0x10a8   : > { %3785 = vmatprep.subr.bf16.mxu0 %v6765_v40  ;;  %v6807_v56 = vld [vmem:[%s7197_s21 + $0x30] ss:$8 sps:$4 sm:$0xff]   ;;  %v6813_v44 = vld [vmem:[%s7197_s21 + $0x24] ss:$8 sps:$4 sm:$0xff]   ;;  %v6819_v45 = vld [vmem:[%s7197_s21 + $0x20] ss:$8 sps:$4 sm:$0xff]  }
0x10a9   : > { %v6825_v46 = vld [vmem:[%s7197_s21 + $0x14] ss:$8 sps:$4 sm:$0xff]   ;;  %v6830_v49 = vld [vmem:[%s7197_s21 + $0x10] ss:$8 sps:$4 sm:$0xff]   ;;  %v6835_v50 = vld [vmem:[%s7197_s21 + $0x4] ss:$8 sps:$4 sm:$0xff]  }
0x10aa   : > { %v5671_v51 = vld [vmem:[%s7198_s23 + $0x78] sm:$0xff]   ;;  %v5673_v52 = vld [vmem:[%s7199_s25 + $0x70] sm:$0xff]   ;;  %v6851_v57 = vld [vmem:[%s7197_s21] ss:$8 sps:$4 sm:$0xff]  }
0x10ab   : > { %3786 = vmatpush1.bf16.msra.mxu0 %v6771_v42  ;;  %v5672_v54 = vld [vmem:[%s7199_s25 + $0x38] sm:$0xff]   ;;  %5033 = vmatprep.subr.bf16.mxu1 %v5671_v51  ;;  %v5674_v55 = vld [vmem:[%s7199_s25 + $0x30] sm:$0xff]   ;;  %v5675_v62 = vld [vmem:[%s7199_s25 + $0x68] sm:$0xff]  }
0x10ac   : > { %3787 = vmatprep.subr.bf16.mxu0 %v6777_v1  ;;  %5034 = vmatpush3.bf16.msra.mxu1 %v5672_v54  ;;  %v6863_v63 = vld [vmem:[%s7197_s21 + $0xf4] ss:$8 sps:$4 sm:$0xff]   ;;  %v5676_v2 = vld [vmem:[%s7199_s25 + $0x28] sm:$0xff]   ;;  %v6872_v4 = vld [vmem:[%s7197_s21 + $0xf0] ss:$8 sps:$4 sm:$0xff]  }
0x10ad   : > { %5035 = vmatprep.subr.bf16.mxu1 %v5673_v52  ;;  %v6877_v48 = vld [vmem:[%s7197_s21 + $0xe4] ss:$8 sps:$4 sm:$0xff]   ;;  %v6884_v5 = vld [vmem:[%s7197_s21 + $0xe0] ss:$8 sps:$4 sm:$0xff]   ;;  %v6889_v60 = vld [vmem:[%s7197_s21 + $0xd4] ss:$8 sps:$4 sm:$0xff]  }
0x10ae   : > { %v6896_v59 = vld [vmem:[%s7197_s21 + $0xd0] ss:$8 sps:$4 sm:$0xff]   ;;  %v6901_v6 = vld [vmem:[%s7197_s21 + $0xc4] ss:$8 sps:$4 sm:$0xff]   ;;  %v6908_v11 = vld [vmem:[%s7197_s21 + $0xc0] ss:$8 sps:$4 sm:$0xff]  }
0x10af   : > { %3788 = vmatpush1.bf16.msra.mxu0 %v6783_v33  ;;  %v6913_v58 = vld [vmem:[%s7197_s21 + $0xb4] ss:$8 sps:$4 sm:$0xff]   ;;  %v6921_v27 = vld [vmem:[%s7197_s21 + $0xb0] ss:$8 sps:$4 sm:$0xff]   ;;  %v6927_v47 = vld [vmem:[%s7197_s21 + $0xa4] ss:$8 sps:$4 sm:$0xff]  }
0x10b0   : > { %3789 = vmatprep.subr.bf16.mxu0 %v6789_v25  ;;  %5036 = vmatpush3.bf16.msra.mxu1 %v5674_v55  ;;  %v6933_v12 = vld [vmem:[%s7197_s21 + $0xa0] ss:$8 sps:$4 sm:$0xff]   ;;  %v6939_v39 = vld [vmem:[%s7197_s21 + $0x94] ss:$8 sps:$4 sm:$0xff]   ;;  %v6945_v13 = vld [vmem:[%s7197_s21 + $0x90] ss:$8 sps:$4 sm:$0xff]  }
0x10b1   : > { %5037 = vmatprep.subr.bf16.mxu1 %v5675_v62  ;;  %v6951_v15 = vld [vmem:[%s7197_s21 + $0x84] ss:$8 sps:$4 sm:$0xff]   ;;  %v6957_v16 = vld [vmem:[%s7197_s21 + $0x80] ss:$8 sps:$4 sm:$0xff]   ;;  %v5679_v20 = vld [vmem:[%s7199_s25 + $0x58] sm:$0xff]  }
0x10b2   : > { %v5677_v18 = vld [vmem:[%s7199_s25 + $0x60] sm:$0xff]   ;;  %v5680_v21 = vld [vmem:[%s7199_s25 + $0x18] sm:$0xff]   ;;  %v5681_v22 = vld [vmem:[%s7199_s25 + $0x50] sm:$0xff]  }
0x10b3   : > { %3790 = vmatpush1.bf16.msra.mxu0 %v6795_v43  ;;  %v5678_v19 = vld [vmem:[%s7199_s25 + $0x20] sm:$0xff]   ;;  %v5682_v26 = vld [vmem:[%s7199_s25 + $0x10] sm:$0xff]   ;;  %v5683_v8 = vld [vmem:[%s7199_s25 + $0x48] sm:$0xff]  }
0x10b4   : > { %3791 = vmatprep.subr.bf16.mxu0 %v6801_v9  ;;  %5038 = vmatpush3.bf16.msra.mxu1 %v5676_v2  ;;  %v5684_v30 = vld [vmem:[%s7199_s25 + $0x8] sm:$0xff]   ;;  %v5685_v0 = vld [vmem:[%s7199_s25 + $0x40] sm:$0xff]  }
0x10b5   : > { %5039 = vmatprep.subr.bf16.mxu1 %v5677_v18  ;;  %v5686_v31 = vld [vmem:[%s7199_s25] sm:$0xff]  }
0x10b6   : > { %v3611_v32 = vld [vmem:[%s7200_s20] sm:$0x3] }
0x10b7   : > { %3792 = vmatpush1.bf16.msra.mxu0 %v6807_v56  ;;  %v3776_v14 = vrot.slane %v3611_v32, %v6304_v61  ;;  %v3780_v34 = vrot.slane %v3611_v32, %v6385_v29  ;;  %v5702_v52 = vld [vmem:[%s7199_s25] sm:$0xff]  }
0x10b8   : > { %3793 = vmatprep.subr.bf16.mxu0 %v6813_v44  ;;  %5040 = vmatpush3.bf16.msra.mxu1 %v5678_v19  ;;  %v3860_v55 = vld [vmem:[%s7201_s19] sm:$0x1] }
0x10b9   : > { %5041 = vmatprep.subr.bf16.mxu1 %v5679_v20 }
0x10bb   : > { %3794 = vmatpush1.bf16.msra.mxu0 %v6819_v45 }
0x10bc   : > { %3795 = vmatprep.subr.bf16.mxu0 %v6825_v46  ;;  %5042 = vmatpush3.bf16.msra.mxu1 %v5680_v21 }
0x10bd   : > { %5043 = vmatprep.subr.bf16.mxu1 %v5681_v22 }
0x10bf   : > { %3796 = vmatpush1.bf16.msra.mxu0 %v6830_v49 }
0x10c0   : > { %3797 = vmatprep.subr.bf16.mxu0 %v6835_v50  ;;  %5044 = vmatpush3.bf16.msra.mxu1 %v5682_v26 }
0x10c1   : > { %5045 = vmatprep.subr.bf16.mxu1 %v5683_v8 }
0x10c3   : > { %3798 = vmatpush1.bf16.msra.mxu0 %v6851_v57 }
0x10c4   : > { %3799 = vmatprep.subr.bf16.mxu0 %v6863_v63  ;;  %5046 = vmatpush3.bf16.msra.mxu1 %v5684_v30 }
0x10c5   : > { %5047 = vmatprep.subr.bf16.mxu1 %v5685_v0 }
0x10c7   : > { %3800 = vmatpush2.bf16.msra.mxu0 %v6872_v4 }
0x10c8   : > { %3801 = vmatprep.subr.bf16.mxu0 %v6877_v48  ;;  %5048 = vmatpush3.bf16.msra.mxu1 %v5686_v31 }
0x10c9   : > { %4204 = vmatprep.subr.bf16.mxu1 %v6754_v38  ;;  %v3999_v38 = vpack.c.bf16 %v6746_v24, %v6746_v24  ;;  %v3998_v24 = vpack.c.bf16 %v6744_v53, %v6744_v53  ;;  %v5690_v53 = vld [vmem:[%s7199_s25 + $0x30] sm:$0xff]  }
0x10cb   : > { %3802 = vmatpush2.bf16.msra.mxu0 %v6884_v5 }
0x10cc   : > { %3803 = vmatprep.subr.bf16.mxu0 %v6889_v60 }
0x10cf   : > { %3804 = vmatpush2.bf16.msra.mxu0 %v6896_v59 }
0x10d0   : > { %3805 = vmatprep.subr.bf16.mxu0 %v6901_v6 }
0x10d3   : > { %3806 = vmatpush2.bf16.msra.mxu0 %v6908_v11 }
0x10d4   : > { %3807 = vmatprep.subr.bf16.mxu0 %v6913_v58 }
0x10d7   : > { %3808 = vmatpush2.bf16.msra.mxu0 %v6921_v27 }
0x10d8   : > { %3809 = vmatprep.subr.bf16.mxu0 %v6927_v47 }
0x10db   : > { %3810 = vmatpush2.bf16.msra.mxu0 %v6933_v12 }
0x10dc   : > { %3811 = vmatprep.subr.bf16.mxu0 %v6939_v39 }
0x10df   : > { %3812 = vmatpush2.bf16.msra.mxu0 %v6945_v13 }
0x10e0   : > { %3813 = vmatprep.subr.bf16.mxu0 %v6951_v15 }
0x10e3   : > { %3814 = vmatpush2.bf16.msra.mxu0 %v6957_v16 }
0x10e6   : > { %3816 = vmatmul.mubr.bf16.vlgmr.msra.gmra.mxu0 %v3577_v17 }
0x11a6   : > { %v3817_v35 = vpop.f32.mrf.mxu0 }
0x11a7   : > { %v3818_v36 = vadd.f32 %v3817_v35, %v3776_v14 }
0x11a8   : > { %v3819_v23 = vpop.f32.mrf.mxu0 }
0x11a9   : > { %v3820_v37 = vadd.f32 %v3819_v23, %v3780_v34  ;;  %5703 = vtanh.f32 %v3818_v36 }
0x11aa   : > { %v3821_v3 = vpop.f32.mrf.mxu0 }
0x11ab   : > { %5705 = vtanh.f32 %v3820_v37 }
0x11ac   : > { %v3822_v10 = vpop.f32.mrf.mxu0 }
0x11b6   : > { %v5704_v7 = vpop.eup %5703 }
0x11b7   : > { %v3826_v54 = vpack.c.bf16 %v5704_v7, %v5704_v7 }
0x11b8   : > { %v5706_v28 = vpop.eup %5705 }
0x11b9   : > { %v3827_v51 = vpack.c.bf16 %v5706_v28, %v5706_v28 }
0x11bb   : > { %3989 = vmatprep.mubr.bf16.mxu1 %v3827_v51 }
0x11bc   : > { %3990 = vmatmul.mubr.bf16.vlgmr.msra.gmra.mxu1 %v3826_v54 }
0x11bd   : > { %4205 = vmatpush1.bf16.msra.mxu1 %v6759_v41  ;;  %4236 = vmatprep.mubr.bf16.mxu1 %v3999_v38  ;;  %v5687_v41 = vld [vmem:[%s7199_s25 + $0x78] sm:$0xff]  }
0x11be   : > { %4206 = vmatprep.subr.bf16.mxu1 %v6765_v40  ;;  %v5688_v40 = vld [vmem:[%s7199_s25 + $0x38] sm:$0xff]   ;;  %5055 = vmatprep.subr.bf16.mxu0 %v5687_v41 }
0x11bf   : > { %5056 = vmatpush3.bf16.msra.mxu0 %v5688_v40 }
0x11c1   : > { %4207 = vmatpush1.bf16.msra.mxu1 %v6771_v42  ;;  %v5689_v42 = vld [vmem:[%s7199_s25 + $0x70] sm:$0xff]  }
0x11c2   : > { %4208 = vmatprep.subr.bf16.mxu1 %v6777_v1  ;;  %5057 = vmatprep.subr.bf16.mxu0 %v5689_v42  ;;  %v5691_v1 = vld [vmem:[%s7199_s25 + $0x68] sm:$0xff]  }
0x11c3   : > { %5058 = vmatpush3.bf16.msra.mxu0 %v5690_v53 }
0x11c4   : > { %5059 = vmatprep.subr.bf16.mxu0 %v5691_v1 }
0x11c5   : > { %4209 = vmatpush1.bf16.msra.mxu1 %v6783_v33  ;;  %v5692_v33 = vld [vmem:[%s7199_s25 + $0x28] sm:$0xff]  }
0x11c6   : > { %4210 = vmatprep.subr.bf16.mxu1 %v6789_v25  ;;  %v5693_v25 = vld [vmem:[%s7199_s25 + $0x60] sm:$0xff]  }
0x11c7   : > { %5060 = vmatpush3.bf16.msra.mxu0 %v5692_v33 }
0x11c8   : > { %5061 = vmatprep.subr.bf16.mxu0 %v5693_v25 }
0x11c9   : > { %4211 = vmatpush1.bf16.msra.mxu1 %v6795_v43  ;;  %v5694_v43 = vld [vmem:[%s7199_s25 + $0x20] sm:$0xff]  }
0x11ca   : > { %4212 = vmatprep.subr.bf16.mxu1 %v6801_v9  ;;  %v5695_v9 = vld [vmem:[%s7199_s25 + $0x58] sm:$0xff]  }
0x11cb   : > { %5062 = vmatpush3.bf16.msra.mxu0 %v5694_v43 }
0x11cc   : > { %5063 = vmatprep.subr.bf16.mxu0 %v5695_v9 }
0x11cd   : > { %4213 = vmatpush1.bf16.msra.mxu1 %v6807_v56  ;;  %v5696_v56 = vld [vmem:[%s7199_s25 + $0x18] sm:$0xff]  }
0x11ce   : > { %4214 = vmatprep.subr.bf16.mxu1 %v6813_v44  ;;  %v5697_v44 = vld [vmem:[%s7199_s25 + $0x50] sm:$0xff]  }
0x11cf   : > { %5064 = vmatpush3.bf16.msra.mxu0 %v5696_v56 }
0x11d0   : > { %5065 = vmatprep.subr.bf16.mxu0 %v5697_v44 }
0x11d1   : > { %4215 = vmatpush1.bf16.msra.mxu1 %v6819_v45  ;;  %v5698_v45 = vld [vmem:[%s7199_s25 + $0x10] sm:$0xff]  }
0x11d2   : > { %4216 = vmatprep.subr.bf16.mxu1 %v6825_v46  ;;  %v5699_v46 = vld [vmem:[%s7199_s25 + $0x48] sm:$0xff]  }
0x11d3   : > { %5066 = vmatpush3.bf16.msra.mxu0 %v5698_v45 }
0x11d4   : > { %5067 = vmatprep.subr.bf16.mxu0 %v5699_v46 }
0x11d5   : > { %4217 = vmatpush1.bf16.msra.mxu1 %v6830_v49  ;;  %v5700_v49 = vld [vmem:[%s7199_s25 + $0x8] sm:$0xff]  }
0x11d6   : > { %4218 = vmatprep.subr.bf16.mxu1 %v6835_v50  ;;  %v5701_v50 = vld [vmem:[%s7199_s25 + $0x40] sm:$0xff]  }
0x11d7   : > { %5068 = vmatpush3.bf16.msra.mxu0 %v5700_v49 }
0x11d8   : > { %5069 = vmatprep.subr.bf16.mxu0 %v5701_v50 }
0x11d9   : > { %4219 = vmatpush1.bf16.msra.mxu1 %v6851_v57 }
0x11da   : > { %4220 = vmatprep.subr.bf16.mxu1 %v6863_v63 }
0x11db   : > { %5070 = vmatpush3.bf16.msra.mxu0 %v5702_v52 }
0x11dd   : > { %4221 = vmatpush2.bf16.msra.mxu1 %v6872_v4 }
0x11de   : > { %4222 = vmatprep.subr.bf16.mxu1 %v6877_v48 }
0x11e1   : > { %4223 = vmatpush2.bf16.msra.mxu1 %v6884_v5  ;;  %v4032_v5 = vld [vmem:[%s7200_s20] sm:$0x3] }
0x11e2   : > { %4224 = vmatprep.subr.bf16.mxu1 %v6889_v60  ;;  %v4197_v60 = vrot.slane %v4032_v5, %v6304_v61  ;;  %v4281_v61 = vld [vmem:[%s7201_s19] sm:$0x1] }
0x11e5   : > { %4225 = vmatpush2.bf16.msra.mxu1 %v6896_v59  ;;  %v4201_v59 = vrot.slane %v4032_v5, %v6385_v29 }
0x11e6   : > { %4226 = vmatprep.subr.bf16.mxu1 %v6901_v6 }
0x11e9   : > { %4227 = vmatpush2.bf16.msra.mxu1 %v6908_v11 }
0x11ea   : > { %4228 = vmatprep.subr.bf16.mxu1 %v6913_v58 }
0x11ed   : > { %4229 = vmatpush2.bf16.msra.mxu1 %v6921_v27 }
0x11ee   : > { %4230 = vmatprep.subr.bf16.mxu1 %v6927_v47 }
0x11f1   : > { %4231 = vmatpush2.bf16.msra.mxu1 %v6933_v12 }
0x11f2   : > { %4232 = vmatprep.subr.bf16.mxu1 %v6939_v39 }
0x11f5   : > { %4233 = vmatpush2.bf16.msra.mxu1 %v6945_v13 }
0x11f6   : > { %4234 = vmatprep.subr.bf16.mxu1 %v6951_v15 }
0x11f9   : > { %4235 = vmatpush2.bf16.msra.mxu1 %v6957_v16 }
0x11fc   : > { %4237 = vmatmul.mubr.bf16.vlgmr.msra.gmra.mxu1 %v3998_v24 }
0x127c   : > { %v5049_v57 = vpop.f32.mrf.mxu1 }
0x127e   : > { %v5050_v62 = vpop.f32.mrf.mxu1 }
0x127f   : > { %v5051_v63 = vadd.f32 %v5050_v62, %v5049_v57 }
0x1280   : > { %v5052_v2 = vpop.f32.mrf.mxu1 }
0x1281   : > { %v3992_v4 = vadd.f32 %v5051_v63, %v3860_v55 }
0x1282   : > { %v5053_v48 = vpop.f32.mrf.mxu1 }
0x1283   : > { %3997 = vst [vmem:[#allocation10] sm:$0x1] %v3992_v4 }
0x12bc   : > { %v4238_v6 = vpop.f32.mrf.mxu1 }
0x12bd   : > { %v4239_v11 = vadd.f32 %v4238_v6, %v4197_v60 }
0x12be   : > { %v4240_v58 = vpop.f32.mrf.mxu1 }
0x12bf   : > { %v4241_v27 = vadd.f32 %v4240_v58, %v4201_v59  ;;  %5707 = vtanh.f32 %v4239_v11 }
0x12c0   : > { %v4242_v47 = vpop.f32.mrf.mxu1 }
0x12c1   : > { %5709 = vtanh.f32 %v4241_v27 }
0x12c2   : > { %v4243_v12 = vpop.f32.mrf.mxu1 }
0x12cc   : > { %v5708_v39 = vpop.eup %5707 }
0x12cd   : > { %v4247_v16 = vpack.c.bf16 %v5708_v39, %v5708_v39 }
0x12ce   : > { %v5710_v13 = vpop.eup %5709 }
0x12cf   : > { %v4248_v15 = vpack.c.bf16 %v5710_v13, %v5710_v13 }
0x12d1   : > { %4410 = vmatprep.mubr.bf16.mxu0 %v4248_v15 }
0x12d2   : > { %4411 = vmatmul.mubr.bf16.vlgmr.msra.gmra.mxu0 %v4247_v16 }
0x1392   : > { %v5071_v17 = vpop.f32.mrf.mxu0 }
0x1394   : > { %v5072_v29 = vpop.f32.mrf.mxu0 }
0x1395   : > { %v5073_v18 = vadd.f32 %v5072_v29, %v5071_v17 }
0x1396   : > { %v5074_v19 = vpop.f32.mrf.mxu0 }
0x1397   : > { %v4413_v20 = vadd.f32 %v5073_v18, %v4281_v61 }
0x1398   : > { %v5075_v21 = vpop.f32.mrf.mxu0 }
0x1399   : > { %4418 = vst [vmem:[#allocation10 + $0x1] sm:$0x1] %v4413_v20 }
0x139a PF: > { %p5150_p6 = scmp.eq.s32.totalorder %s5999_s2, 1  ;;  %s5874_s5 = smov [#allocation10]  }
0x139b   : > { %s4426_s6 = sshll.u32 %s5874_s5, 4  ;;  %s4427_s6 = int_to_ptr.vmem [resolvable:$true] %s4426_s6 }
0x139c   : > { %s5795_s10 = scalar_lea.vmem %s4427_s6, 32  ;;  %p5802_p12 = scmp.lt.s32.totalorder %s4427_s6, %s4427_s6 }
0x139d   : > { %p5796_p9 = scmp.ne.s32.totalorder %s4427_s6, %s5795_s10  ;;  %p5803_p0 = scmp.lt.s32.totalorder %s5795_s10, %s5795_s10 }
0x139f   : > { %p5797_p11 = pnand %p5796_p9, %p5150_p6  ;;  %p5804_p1 = por %p5803_p0, %p5802_p12 }
0x13a1   : > { %p5798_p7 = pneg %p5797_p11 }
0x13a3   : > { %p5805_p2 = pnand %p5804_p1, %p5798_p7 }
0x13a5   : > { %5808 = shalt.err (!%p5805_p2)
}
0x13a6   : > { %s7202_s24 = sld [smem:[#allocation33_spill]] }
0x13ac   : > { %5136 = dma.vmem_to_hbm [thread:$0]  (%p5150_p6), %s4427_s6, 32, %s7202_s24, [#allocation6]  }
0x13ad   : > { %5844 = dma.done.wait (%p5150_p6), [#allocation6], 32  }
0x13ae   : > { %5846 = vsyncadd (%p5150_p6), [#allocation6], 4294967264 }
0x13af PF: > { %s7203_s24 = sld [smem:[#allocation16_spill]] }
0x13b0   : > { %s7204_s1 = sld [smem:[#allocation14_spill]] }
0x13b1   : > { %s7205_s22 = sld [smem:[#allocation15_spill]] }
0x13b2   : > { %s7206_s23 = sld [smem:[#allocation17_spill]] }
0x13b5   : > { %p34_p3 = scmp.ge.s32.totalorder %s7203_s24, 4  }
0x13b7   :  { %36 = sbr.rel (!%p34_p3) target bundleno = 23 (0x17), region = 197 }
0x13bc   :  { %4439 = vsyncpa [#allocation5], 1 }
0x13bd   :  { %4441 = vsyncpa [#allocation5 + $0x1], 1 }
0x13be   :  { %4442 = vsyncpa [#allocation8], 1 }
0x13bf   :  { %4444 = vsyncpa [#allocation8 + $0x1], 1 }
0x13c0   :  { %4445 = vsyncpa [#allocation6], 1 }
0x13c1   :  { %4447 = vsyncpa [#allocation6 + $0x1], 1 }

</bundles_post_ra>
